<compile_context>
chip_gen: v7x
topology: tpu7x:2x2x1
jax: 0.10.0
libtpu: 0.0.40
codegen_flags: <defaults>
</compile_context>

<pallas_src>
import functools

import jax
import jax.numpy as jnp
import numpy as np
from jax import lax
from jax.experimental import pallas as pl
from jax.experimental.pallas import tpu as pltpu

NEG_SLOPE = 0.01  # F.leaky_relu default negative_slope


def _leaky_relu(v):
    return jnp.maximum(v, NEG_SLOPE * v)


def _stable_sigmoid(v):
    z = jnp.exp(-jnp.abs(v))
    return jnp.where(v >= 0, 1.0 / (1.0 + z), z / (1.0 + z))


def _round_up(n, m):
    return ((n + m - 1) // m) * m


def _device_kind():
    try:
        return jax.devices()[0].device_kind.lower()
    except Exception:
        return ""


def _default_epilogue_dtype():
    # v5e VPU has no packed-bf16 ALU -> keep elementwise epilogues in f32 there.
    # v6e / v7x execute packed bf16 -> bf16 epilogue halves the VALU work.
    return jnp.float32 if "v5" in _device_kind() else jnp.bfloat16


def _default_num_splits(batch, n_tiles):
    # v7x has 2 TensorCores: when the batch axis alone cannot balance both,
    # add a second "parallel" axis over halves of the point dimension.
    if "v7" in _device_kind() and batch % 2 == 1 and n_tiles >= 2:
        return 2
    return 1


# -----------------------------------------------------------------------------
# Kernel bodies
# -----------------------------------------------------------------------------
def _backbone_tile(x_ref, w1_ref, b1_ref, w2_ref, b2_ref, w3_ref, b3_ref,
                   epi_dtype):
    """Point-wise MLP on one (T, 8) coordinate tile.

    Returns x1 (T,128) / x2 (T,256) in `epi_dtype` and x3 (T,nlat) in f32.
    All matmuls run on the MXU with f32 accumulation; conv1 stays f32
    (coordinate precision, K=8 is negligible), conv2/conv3 use bf16 operands.
    """
    x = x_ref[...]                                                   # (T, 8) f32
    h1 = jnp.dot(x, w1_ref[...], preferred_element_type=jnp.float32)
    x1 = _leaky_relu(h1.astype(epi_dtype) + b1_ref[...])            # (T, 128)
    h2 = jnp.dot(x1.astype(jnp.bfloat16), w2_ref[...],
                 preferred_element_type=jnp.float32)
    x2 = _leaky_relu(h2.astype(epi_dtype) + b2_ref[...])            # (T, 256)
    x3 = jnp.dot(x2.astype(jnp.bfloat16), w3_ref[...],
                 preferred_element_type=jnp.float32) + b3_ref[...]  # (T, nlat) f32
    return x1, x2, x3


def _row_validity(tile_n, tiles_per_split, n_valid):
    """(T, 1) bool mask: True for rows that index real points (< n_valid)."""
    s = pl.program_id(1)
    t = pl.program_id(2)
    row0 = (s * tiles_per_split + t) * tile_n
    rows = row0 + lax.broadcasted_iota(jnp.int32, (tile_n, 1), 0)
    return rows < n_valid


def _acc_max(acc_ref, val, valid):
    if valid is not None:
        val = jnp.where(valid, val, jnp.asarray(-jnp.inf, val.dtype))
    pooled = jnp.max(val, axis=0, keepdims=True).astype(acc_ref.dtype)
    acc_ref[...] = jnp.maximum(acc_ref[...], pooled)


def _dis_pool_kernel(x_ref, w1_ref, b1_ref, w2_ref, b2_ref, w3_ref, b3_ref,
                     p3_ref, *, tile_n, tiles_per_split, n_valid, needs_mask,
                     epi_dtype):
    @pl.when(pl.program_id(2) == 0)
    def _():
        p3_ref[...] = jnp.full(p3_ref.shape, -jnp.inf, p3_ref.dtype)

    _, _, x3 = _backbone_tile(x_ref, w1_ref, b1_ref, w2_ref, b2_ref,
                              w3_ref, b3_ref, epi_dtype)
    valid = _row_validity(tile_n, tiles_per_split, n_valid) if needs_mask else None
    _acc_max(p3_ref, x3, valid)


def _cont_pool_kernel(x_ref, w1_ref, b1_ref, w2_ref, b2_ref, w3_ref, b3_ref,
                      p1_ref, p2_ref, p3_ref, *, tile_n, tiles_per_split,
                      n_valid, needs_mask, epi_dtype):
    @pl.when(pl.program_id(2) == 0)
    def _():
        for ref in (p1_ref, p2_ref, p3_ref):
            ref[...] = jnp.full(ref.shape, -jnp.inf, ref.dtype)

    x1, x2, x3 = _backbone_tile(x_ref, w1_ref, b1_ref, w2_ref, b2_ref,
                                w3_ref, b3_ref, epi_dtype)
    valid = _row_validity(tile_n, tiles_per_split, n_valid) if needs_mask else None
    _acc_max(p1_ref, x1, valid)
    _acc_max(p2_ref, x2, valid)
    _acc_max(p3_ref, x3, valid)


# -----------------------------------------------------------------------------
# Wrapper
# -----------------------------------------------------------------------------
def init_params(key, nlatent, cont_dim):
    """Deterministic init mirroring PyTorch defaults (U(-1/sqrt(fan_in), +))."""
    def lin(k, fan_in, fan_out):
        kw, kb = jax.random.split(k)
        bound = 1.0 / np.sqrt(fan_in)
        w = jax.random.uniform(kw, (fan_in, fan_out), jnp.float32, -bound, bound)
        b = jax.random.uniform(kb, (1, fan_out), jnp.float32, -bound, bound)
        return w, b

    ks = jax.random.split(key, 9)
    return {
        'conv1': lin(ks[0], 3, 128),
        'conv2': lin(ks[1], 128, 256),
        'conv3': lin(ks[2], 256, nlatent),
        'fc1':   lin(ks[3], nlatent, 512),
        'fc2':   lin(ks[4], 512, 256),
        'fc3':   lin(ks[5], 256, 1),
        'cont1': lin(ks[6], 128, cont_dim),
        'cont2': lin(ks[7], 256, cont_dim),
        'cont3': lin(ks[8], nlatent, cont_dim),
    }


def _pooled_features(params, x, *, want_all, tile_n, num_splits, epilogue_dtype):
    """Run the backbone+max-pool kernel. Returns pooled features (B, C)."""
    B, N, _ = x.shape

    # --- tile sizing (second-to-last block dim must be a multiple of 8 or == N)
    tile_n = int(min(tile_n, N))
    if tile_n < N:
        tile_n = max(8, (tile_n // 8) * 8)
    n_tiles = pl.cdiv(N, tile_n)

    if num_splits is None:
        num_splits = _default_num_splits(B, n_tiles)
    num_splits = max(1, min(int(num_splits), n_tiles))
    tps = pl.cdiv(n_tiles, num_splits)          # point tiles per split
    needs_mask = (num_splits * tps * tile_n) != N

    epi = epilogue_dtype if epilogue_dtype is not None else _default_epilogue_dtype()

    # Zero-pad xyz -> 8 channels so the first layer is an aligned K=8 MXU matmul
    # (padded columns hit zero-padded weight rows, so the result is unchanged).
    x8 = jnp.pad(x.astype(jnp.float32), ((0, 0), (0, 0), (0, 5)))

    w1, b1 = params['conv1']
    w2, b2 = params['conv2']
    w3, b3 = params['conv3']
    nlat = b3.shape[-1]
    w1p = jnp.pad(w1, ((0, 5), (0, 0)))                          # (8, 128) f32
    args = (x8, w1p, b1.astype(epi),
            w2.astype(jnp.bfloat16), b2.astype(epi),
            w3.astype(jnp.bfloat16), b3.astype(jnp.float32))

    n_tiles_m1 = n_tiles - 1
    # Clamp the block index so a fully out-of-range tail tile (odd tile count
    # under a 2-way split) re-reads the last real tile; its rows are masked.
    x_spec = pl.BlockSpec(
        (None, tile_n, 8),
        lambda b, s, t: (b, jnp.minimum(s * tps + t, n_tiles_m1), 0))

    def full_spec(a):
        nd = a.ndim
        return pl.BlockSpec(a.shape, lambda b, s, t, _nd=nd: (0,) * _nd)

    in_specs = [x_spec] + [full_spec(a) for a in args[1:]]

    def out_spec(c):
        return pl.BlockSpec((None, None, 1, c), lambda b, s, t: (b, s, 0, 0))

    def out_shape(c):
        return jax.ShapeDtypeStruct((B, num_splits, 1, c), jnp.float32)

    static = dict(tile_n=tile_n, tiles_per_split=tps, n_valid=N,
                  needs_mask=needs_mask, epi_dtype=epi)

    if want_all:
        kern = functools.partial(_cont_pool_kernel, **static)
        outs = (out_shape(128), out_shape(256), out_shape(nlat))
        specs = (out_spec(128), out_spec(256), out_spec(nlat))
    else:
        kern = functools.partial(_dis_pool_kernel, **static)
        outs = (out_shape(nlat),)
        specs = (out_spec(nlat),)

    fn = pl.pallas_call(
        kern,
        out_shape=outs,
        grid_spec=pltpu.PrefetchScalarGridSpec(
            num_scalar_prefetch=0,
            grid=(B, num_splits, tps),
            in_specs=in_specs,
            out_specs=specs),
        compiler_params=pltpu.CompilerParams(
            dimension_semantics=("parallel", "parallel", "arbitrary")),
    )
    pooled = fn(*args)
    # Reduce the (tiny) per-split partial maxes and drop singleton dims.
    return tuple(p.max(axis=1).reshape(B, -1) for p in pooled)


def _dis_head(params, p3):
    fw1, fb1 = params['fc1']
    fw2, fb2 = params['fc2']
    fw3, fb3 = params['fc3']
    y1 = _leaky_relu(p3 @ fw1 + fb1)
    y2 = _leaky_relu(y1 @ fw2 + fb2)
    y3 = y2 @ fw3 + fb3
    return _stable_sigmoid(y3), y3


def _cont_heads(params, p1, p2, p3):
    outs = []
    for p, name in ((p1, 'cont1'), (p2, 'cont2'), (p3, 'cont3')):
        w, b = params[name]
        outs.append(p @ w + b)
    return outs


def discriminator_forward(params, x, mode='dis', *, tile_n=1024,
                          num_splits=None, epilogue_dtype=None):
    """x: (B, N, 3) float32 — same convention as the PyTorch forward's input."""
    if mode == 'dis':
        (p3,) = _pooled_features(params, x, want_all=False, tile_n=tile_n,
                                 num_splits=num_splits,
                                 epilogue_dtype=epilogue_dtype)
        return _dis_head(params, p3)
    elif mode == 'cont':
        p1, p2, p3 = _pooled_features(params, x, want_all=True, tile_n=tile_n,
                                      num_splits=num_splits,
                                      epilogue_dtype=epilogue_dtype)
        return _cont_heads(params, p1, p2, p3)
    elif mode == 'both':
        # One backbone pass feeding both heads (fusion suggested by the review).
        p1, p2, p3 = _pooled_features(params, x, want_all=True, tile_n=tile_n,
                                      num_splits=num_splits,
                                      epilogue_dtype=epilogue_dtype)
        return _dis_head(params, p3), _cont_heads(params, p1, p2, p3)
    else:
        raise ValueError('Invalid mode!')


# -----------------------------------------------------------------------------
# Pure-f32 JAX reference mirroring the PyTorch forward
# -----------------------------------------------------------------------------
def _reference_forward(params, x, mode='dis'):
    hp = jax.lax.Precision.HIGHEST
    lr = _leaky_relu
    w1, b1 = params['conv1']
    w2, b2 = params['conv2']
    w3, b3 = params['conv3']
    x1 = lr(jnp.dot(x, w1, precision=hp) + b1)
    x2 = lr(jnp.dot(x1, w2, precision=hp) + b2)
    x3 = jnp.dot(x2, w3, precision=hp) + b3
    if mode == 'dis':
        x4 = jnp.max(x3, axis=1)
        fw1, fb1 = params['fc1']
        fw2, fb2 = params['fc2']
        fw3, fb3 = params['fc3']
        y1 = lr(jnp.dot(x4, fw1, precision=hp) + fb1)
        y2 = lr(jnp.dot(y1, fw2, precision=hp) + fb2)
        y3 = jnp.dot(y2, fw3, precision=hp) + fb3
        return _stable_sigmoid(y3), y3
    else:
        cw1, cb1 = params['cont1']
        cw2, cb2 = params['cont2']
        cw3, cb3 = params['cont3']
        c1 = jnp.dot(jnp.max(x1, axis=1), cw1, precision=hp) + cb1
        c2 = jnp.dot(jnp.max(x2, axis=1), cw2, precision=hp) + cb2
        c3 = jnp.dot(jnp.max(x3, axis=1), cw3, precision=hp) + cb3
        return [c1, c2, c3]


if __name__ == "__main__":
    nlatent, cont_dim = 64, 8
    B, N = 2, 2500          # N deliberately not a multiple of the point tile

    key = jax.random.PRNGKey(0)
    k_x, k_p = jax.random.split(key)
    x = jax.random.normal(k_x, (B, N, 3), dtype=jnp.float32)
    params = init_params(k_p, nlatent, cont_dim)

    # dis mode: default tiling / split policy (tail-tile masking exercised)
    sig, y3 = discriminator_forward(params, x, mode='dis')
    sig, y3 = jax.block_until_ready(sig), jax.block_until_ready(y3)
    ref_sig, ref_y3 = _reference_forward(params, x, mode='dis')
    np.testing.assert_allclose(np.asarray(y3), np.asarray(ref_y3), rtol=2e-2, atol=2e-2)
    np.testing.assert_allclose(np.asarray(sig), np.asarray(ref_sig), rtol=2e-2, atol=2e-2)

    # cont mode: force the 2-way point split (v7x path + clamped tail tile)
    conts = discriminator_forward(params, x, mode='cont', num_splits=2)
    conts = [jax.block_until_ready(c) for c in conts]
    ref_conts = _reference_forward(params, x, mode='cont')
    for c, rc in zip(conts, ref_conts):
        np.testing.assert_allclose(np.asarray(c), np.asarray(rc), rtol=2e-2, atol=2e-2)

    # fused 'both' mode: one backbone pass feeding both heads
    (bsig, by3), bconts = discriminator_forward(params, x, mode='both')
    by3 = jax.block_until_ready(by3)
    np.testing.assert_allclose(np.asarray(by3), np.asarray(ref_y3), rtol=2e-2, atol=2e-2)

    print("KERNEL_OK")
</pallas_src>

<mosaic_0001>
module attributes {stable_mosaic.version = 11 : i64} {
  func.func @_dis_pool_kernel(%arg0: i32, %arg1: i32, %arg2: i32, %arg3: memref<1x1024x8xf32, #tpu.memory_space<vmem>>, %arg4: memref<8x128xf32, #tpu.memory_space<vmem>>, %arg5: memref<1x128xbf16, #tpu.memory_space<vmem>>, %arg6: memref<128x256xbf16, #tpu.memory_space<vmem>>, %arg7: memref<1x256xbf16, #tpu.memory_space<vmem>>, %arg8: memref<256x64xbf16, #tpu.memory_space<vmem>>, %arg9: memref<1x64xf32, #tpu.memory_space<vmem>>, %arg10: memref<1x1x1x64xf32, #tpu.memory_space<vmem>>) attributes {dimension_semantics = [#tpu.dimension_semantics<parallel>, #tpu.dimension_semantics<parallel>, #tpu.dimension_semantics<arbitrary>], iteration_bounds = array<i64: 2, 1, 3>, scalar_prefetch = 0 : i64, scratch_operands = 0 : i64, tpu.core_type = #tpu.core_type<tc>, window_params = [{transform_indices = @transform_0, window_bounds = array<i64: 1, 1024, 8>}, {pipeline_mode = #tpu.pipeline_mode<synchronous>, transform_indices = @transform_1, window_bounds = array<i64: 8, 128>}, {pipeline_mode = #tpu.pipeline_mode<synchronous>, transform_indices = @transform_2, window_bounds = array<i64: 1, 128>}, {pipeline_mode = #tpu.pipeline_mode<synchronous>, transform_indices = @transform_3, window_bounds = array<i64: 128, 256>}, {pipeline_mode = #tpu.pipeline_mode<synchronous>, transform_indices = @transform_4, window_bounds = array<i64: 1, 256>}, {pipeline_mode = #tpu.pipeline_mode<synchronous>, transform_indices = @transform_5, window_bounds = array<i64: 256, 64>}, {pipeline_mode = #tpu.pipeline_mode<synchronous>, transform_indices = @transform_6, window_bounds = array<i64: 1, 64>}, {transform_indices = @transform_7, window_bounds = array<i64: 1, 1, 1, 64>}]} {
    %c0_i32 = arith.constant 0 : i32
    %0 = arith.cmpi eq, %arg2, %c0_i32 : i32
    %1 = arith.extui %0 : i1 to i32
    %c0_i32_0 = arith.constant 0 : i32
    %2 = arith.cmpi ne, %1, %c0_i32_0 : i32
    scf.if %2 {
      %cst_29 = arith.constant 0xFF800000 : f32
      %48 = vector.broadcast %cst_29 : f32 to vector<1x64xf32>
      %c0_30 = arith.constant 0 : index
      %c0_31 = arith.constant 0 : index
      %c0_32 = arith.constant 0 : index
      %c0_33 = arith.constant 0 : index
      %49 = vector.load %arg10[%c0_30, %c0_31, %c0_32, %c0_33] : memref<1x1x1x64xf32, #tpu.memory_space<vmem>>, vector<1x1x1x64xf32>
      %50 = vector.shape_cast %49 : vector<1x1x1x64xf32> to vector<1x64xf32>
      %51 = vector.shape_cast %48 : vector<1x64xf32> to vector<1x1x1x64xf32>
      tpu.vector_store %arg10[%c0_30, %c0_31, %c0_32, %c0_33], %51 {strides = array<i32>} : memref<1x1x1x64xf32, #tpu.memory_space<vmem>>, vector<1x1x1x64xf32>,
    } else {
    }
    %c0 = arith.constant 0 : index
    %c0_1 = arith.constant 0 : index
    %c0_2 = arith.constant 0 : index
    %3 = vector.load %arg3[%c0, %c0_1, %c0_2] : memref<1x1024x8xf32, #tpu.memory_space<vmem>>, vector<1x1024x8xf32>
    %4 = vector.shape_cast %3 : vector<1x1024x8xf32> to vector<1024x8xf32>
    %c0_3 = arith.constant 0 : index
    %c0_4 = arith.constant 0 : index
    %5 = vector.load %arg4[%c0_3, %c0_4] : memref<8x128xf32, #tpu.memory_space<vmem>>, vector<8x128xf32>
    %cst = arith.constant dense<0.000000e+00> : vector<1024x128xf32>
    %6 = tpu.matmul %4, %5, %cst {dimension_numbers = #tpu.dot_dimension_numbers<[1], [0], [0], [1], [0, 0, 1, 1], [], []>} : vector<1024x8xf32>, vector<8x128xf32>, vector<1024x128xf32> -> vector<1024x128xf32>
    %7 = arith.truncf %6 : vector<1024x128xf32> to vector<1024x128xbf16>
    %c0_5 = arith.constant 0 : index
    %c0_6 = arith.constant 0 : index
    %8 = vector.load %arg5[%c0_5, %c0_6] : memref<1x128xbf16, #tpu.memory_space<vmem>>, vector<1x128xbf16>
    %9 = vector.broadcast %8 : vector<1x128xbf16> to vector<1024x128xbf16>
    %10 = arith.addf %7, %9 : vector<1024x128xbf16>
    %cst_7 = arith.constant 1.000980e-02 : bf16
    %11 = vector.broadcast %cst_7 : bf16 to vector<1024x128xbf16>
    %12 = arith.mulf %11, %10 : vector<1024x128xbf16>
    %13 = arith.maximumf %10, %12 : vector<1024x128xbf16>
    %c0_8 = arith.constant 0 : index
    %c0_9 = arith.constant 0 : index
    %14 = vector.load %arg6[%c0_8, %c0_9] : memref<128x256xbf16, #tpu.memory_space<vmem>>, vector<128x256xbf16>
    %cst_10 = arith.constant dense<0.000000e+00> : vector<1024x256xf32>
    %15 = tpu.matmul %13, %14, %cst_10 {dimension_numbers = #tpu.dot_dimension_numbers<[1], [0], [0], [1], [0, 0, 1, 1], [], []>} : vector<1024x128xbf16>, vector<128x256xbf16>, vector<1024x256xf32> -> vector<1024x256xf32>
    %16 = arith.truncf %15 : vector<1024x256xf32> to vector<1024x256xbf16>
    %c0_11 = arith.constant 0 : index
    %c0_12 = arith.constant 0 : index
    %17 = vector.load %arg7[%c0_11, %c0_12] : memref<1x256xbf16, #tpu.memory_space<vmem>>, vector<1x256xbf16>
    %18 = vector.broadcast %17 : vector<1x256xbf16> to vector<1024x256xbf16>
    %19 = arith.addf %16, %18 : vector<1024x256xbf16>
    %cst_13 = arith.constant 1.000980e-02 : bf16
    %20 = vector.broadcast %cst_13 : bf16 to vector<1024x256xbf16>
    %21 = arith.mulf %20, %19 : vector<1024x256xbf16>
    %22 = arith.maximumf %19, %21 : vector<1024x256xbf16>
    %c0_14 = arith.constant 0 : index
    %c0_15 = arith.constant 0 : index
    %23 = vector.load %arg8[%c0_14, %c0_15] : memref<256x64xbf16, #tpu.memory_space<vmem>>, vector<256x64xbf16>
    %cst_16 = arith.constant dense<0.000000e+00> : vector<1024x64xf32>
    %24 = tpu.matmul %22, %23, %cst_16 {dimension_numbers = #tpu.dot_dimension_numbers<[1], [0], [0], [1], [0, 0, 1, 1], [], []>} : vector<1024x256xbf16>, vector<256x64xbf16>, vector<1024x64xf32> -> vector<1024x64xf32>
    %c0_17 = arith.constant 0 : index
    %c0_18 = arith.constant 0 : index
    %25 = vector.load %arg9[%c0_17, %c0_18] : memref<1x64xf32, #tpu.memory_space<vmem>>, vector<1x64xf32>
    %26 = vector.broadcast %25 : vector<1x64xf32> to vector<1024x64xf32>
    %27 = arith.addf %24, %26 : vector<1024x64xf32>
    %c3_i32 = arith.constant 3 : i32
    %28 = arith.muli %arg1, %c3_i32 : i32
    %29 = arith.addi %28, %arg2 : i32
    %c1024_i32 = arith.constant 1024 : i32
    %30 = arith.muli %29, %c1024_i32 : i32
    %31 = tpu.iota {dimensions = array<i32: 0>} : vector<1024x1xi32>
    %32 = vector.broadcast %30 : i32 to vector<1024x1xi32>
    %33 = arith.addi %32, %31 : vector<1024x1xi32>
    %c2500_i32 = arith.constant 2500 : i32
    %34 = vector.broadcast %c2500_i32 : i32 to vector<1024x1xi32>
    %35 = arith.cmpi slt, %33, %34 : vector<1024x1xi32>
    %cst_19 = arith.constant 0xFF800000 : f32
    %36 = vector.shape_cast %35 : vector<1024x1xi1> to vector<1024x1xi1>
    %37 = vector.broadcast %36 : vector<1024x1xi1> to vector<1024x64xi1>
    %38 = vector.broadcast %cst_19 : f32 to vector<1024x64xf32>
    %39 = arith.select %37, %27, %38 : vector<1024x64xi1>, vector<1024x64xf32>
    %cst_20 = arith.constant dense<0xFF800000> : vector<64xf32>
    %40 = vector.multi_reduction <maximumf>, %39, %cst_20 [0] : vector<1024x64xf32> to vector<64xf32>
    %41 = vector.shape_cast %40 : vector<64xf32> to vector<1x64xf32>
    %c0_21 = arith.constant 0 : index
    %c0_22 = arith.constant 0 : index
    %c0_23 = arith.constant 0 : index
    %c0_24 = arith.constant 0 : index
    %42 = vector.load %arg10[%c0_21, %c0_22, %c0_23, %c0_24] : memref<1x1x1x64xf32, #tpu.memory_space<vmem>>, vector<1x1x1x64xf32>
    %43 = vector.shape_cast %42 : vector<1x1x1x64xf32> to vector<1x64xf32>
    %44 = arith.maximumf %43, %41 : vector<1x64xf32>
    %c0_25 = arith.constant 0 : index
    %c0_26 = arith.constant 0 : index
    %c0_27 = arith.constant 0 : index
    %c0_28 = arith.constant 0 : index
    %45 = vector.load %arg10[%c0_25, %c0_26, %c0_27, %c0_28] : memref<1x1x1x64xf32, #tpu.memory_space<vmem>>, vector<1x1x1x64xf32>
    %46 = vector.shape_cast %45 : vector<1x1x1x64xf32> to vector<1x64xf32>
    %47 = vector.shape_cast %44 : vector<1x64xf32> to vector<1x1x1x64xf32>
    tpu.vector_store %arg10[%c0_25, %c0_26, %c0_27, %c0_28], %47 {strides = array<i32>} : memref<1x1x1x64xf32, #tpu.memory_space<vmem>>, vector<1x1x1x64xf32>,
    return
  }
  func.func @transform_0(%arg0: i32, %arg1: i32, %arg2: i32) -> (i32, i32, i32) {
    %c3_i32 = arith.constant 3 : i32
    %0 = arith.muli %arg1, %c3_i32 : i32
    %1 = arith.addi %0, %arg2 : i32
    %c2_i32 = arith.constant 2 : i32
    %2 = arith.minsi %1, %c2_i32 : i32
    %c0_i32 = arith.constant 0 : i32
    %c0_i32_0 = arith.constant 0 : i32
    return %arg0, %2, %c0_i32 : i32, i32, i32
  }
  func.func @transform_1(%arg0: i32, %arg1: i32, %arg2: i32) -> (i32, i32) {
    %c0_i32 = arith.constant 0 : i32
    %c0_i32_0 = arith.constant 0 : i32
    %c0_i32_1 = arith.constant 0 : i32
    return %c0_i32, %c0_i32_0 : i32, i32
  }
  func.func @transform_2(%arg0: i32, %arg1: i32, %arg2: i32) -> (i32, i32) {
    %c0_i32 = arith.constant 0 : i32
    %c0_i32_0 = arith.constant 0 : i32
    %c0_i32_1 = arith.constant 0 : i32
    return %c0_i32, %c0_i32_0 : i32, i32
  }
  func.func @transform_3(%arg0: i32, %arg1: i32, %arg2: i32) -> (i32, i32) {
    %c0_i32 = arith.constant 0 : i32
    %c0_i32_0 = arith.constant 0 : i32
    %c0_i32_1 = arith.constant 0 : i32
    return %c0_i32, %c0_i32_0 : i32, i32
  }
  func.func @transform_4(%arg0: i32, %arg1: i32, %arg2: i32) -> (i32, i32) {
    %c0_i32 = arith.constant 0 : i32
    %c0_i32_0 = arith.constant 0 : i32
    %c0_i32_1 = arith.constant 0 : i32
    return %c0_i32, %c0_i32_0 : i32, i32
  }
  func.func @transform_5(%arg0: i32, %arg1: i32, %arg2: i32) -> (i32, i32) {
    %c0_i32 = arith.constant 0 : i32
    %c0_i32_0 = arith.constant 0 : i32
    %c0_i32_1 = arith.constant 0 : i32
    return %c0_i32, %c0_i32_0 : i32, i32
  }
  func.func @transform_6(%arg0: i32, %arg1: i32, %arg2: i32) -> (i32, i32) {
    %c0_i32 = arith.constant 0 : i32
    %c0_i32_0 = arith.constant 0 : i32
    %c0_i32_1 = arith.constant 0 : i32
    return %c0_i32, %c0_i32_0 : i32, i32
  }
  func.func @transform_7(%arg0: i32, %arg1: i32, %arg2: i32) -> (i32, i32, i32, i32) {
    %c0_i32 = arith.constant 0 : i32
    %c0_i32_0 = arith.constant 0 : i32
    %c0_i32_1 = arith.constant 0 : i32
    return %arg0, %arg1, %c0_i32, %c0_i32_0 : i32, i32, i32, i32
  }
}

</mosaic_0001>

<bundles_post_ra>
// kernel: tpu_custom_call.1
= control target key start
LH: loop header
LB: loop body
LE: loop exit
PB: predicated region body
PF: predicated region fallthrough
CT: control target
= control target key end

     0   :  { %12 = vsyncpa [#allocation3], 0  ;;  %s7585_s0 = inlined_call_operand.vmem [shape: f32[2,2500,8], index: 0, kind: input, shape index: {}]   ;;  %s7586_s1 = inlined_call_operand.vmem [shape: f32[8,128], index: 1, kind: input, shape index: {}]   ;;  %s7587_s2 = inlined_call_operand.vmem [shape: bf16[1,128], index: 2, kind: input, shape index: {}]   ;;  %s7588_s3 = inlined_call_operand.vmem [shape: bf16[128,256], index: 3, kind: input, shape index: {}]   ;;  %s7589_s4 = inlined_call_operand.vmem [shape: bf16[1,256], index: 4, kind: input, shape index: {}]   ;;  %s7590_s5 = inlined_call_operand.vmem [shape: bf16[256,64], index: 5, kind: input, shape index: {}]   ;;  %s7591_s6 = inlined_call_operand.vmem [shape: f32[1,64], index: 6, kind: input, shape index: {}]   ;;  %s7592_s7 = inlined_call_operand.hbm [shape: f32[2,1,1,64], index: 7, kind: output, shape index: {}]  }
   0x1   :  { %14 = vsyncpa [#allocation3 + $0x1], 0  ;;  %s5737_s24 = smov 0   ;;  %s5739_s25 = smov 0  }
   0x2   :  { %s5741_s26 = smov 0   ;;  %s5743_s27 = smov 0  }
   0x3   :  { %s5745_s28 = smov 0   ;;  %s5747_s29 = smov 0  }
   0x4   :  { %s5749_s30 = smov 0   ;;  %s5751_s8 = smov 0  }
   0x5 LB: > { %s4980_s9 = sadd.s32 4294967295, %s5691_s8   ;;  %s4981_s10 = sadd.s32 4294967294, %s5691_s8   ;;  %s5691_s8 = sphi %s5751_s8, %s20_s8   ;;  %s5687_s30 = sphi %s5749_s30, %s7793_s30   ;;  %s5683_s29 = sphi %s5747_s29, %s7792_s29   ;;  %s5679_s28 = sphi %s5745_s28, %s7791_s28   ;;  %s5675_s27 = sphi %s5743_s27, %s7790_s27   ;;  %s5671_s26 = sphi %s5741_s26, %s7789_s26   ;;  %s5667_s25 = sphi %s5739_s25, %s7788_s25   ;;  %s5663_s24 = sphi %s5737_s24, %s7787_s24  }
   0x6   : > { %s32_s11 = sadd.s32 1, %s5683_s29  ;;  %s39_s12 = sadd.s32 1, %s5687_s30 }
   0x7   : > { %p33_p0 = scmp.ge.s32.totalorder %s32_s11, 3  ;;  %p220_p1 = scmp.ne.s32.totalorder %s5671_s26, %s5667_s25 }
   0x8   : > { %p221_p2 = scmp.eq.s32.totalorder %s4980_s9, 5  ;;  %p226_p4 = scmp.ne.s32.totalorder %s5667_s25, %s5663_s24 }
   0x9   : > { %s7795_s11 = smov (%p33_p0, %s32_s11), 0  ;;  %s7797_s12 = smov (!%p33_p0, %s39_s12), %s5687_s30 }
   0xa   : > { %p5786_p3 = por %p221_p2, %p220_p1  ;;  %p41_p5 = scmp.ge.s32.totalorder %s7797_s12, 2 }
   0xb   : > { %p227_p6 = scmp.eq.s32.totalorder %s4981_s10, 5  ;;  %p4984_p7 = scmp.ge.s32.totalorder %s5691_s8, 1 }
   0xc   : > { %p292_p8 = scmp.lt.s32.totalorder %s5691_s8, 7  ;;  %s7799_s12 = smov (%p41_p5, %s7797_s12), 0 }
   0xd   : > { %7641 = sst [smem:[#allocation5_spill]] %s7799_s12  ;;  %p5796_p9 = por %p227_p6, %p226_p4 }
   0xe   : > { %p293_p10 = pnand %p4984_p7, %p292_p8  ;;  %s205_s15 = ssub.s32 %s5687_s30, %s7799_s12 }
   0xf   : > { %s210_s16 = sadd.s32 1, %s5671_s26  ;;  %p208_p11 = scmp.eq.s32.totalorder %s205_s15, 0 }
  0x10   : > { %296 = sbr.rel (%p293_p10) target bundleno = 1236 (0x4d4), region = 48 }
  0x11   : > { %s5804_s17 = scalar_select %p208_p11, %s5671_s26, %s210_s16  }
  0x17   : > { %s333_s18 = sand.u32 1, %s5667_s25   ;;  %p337_p12 = scmp.lt.s32.totalorder %s5675_s27, 2 }
  0x18   : > { %p344_p13 = scmp.lt.s32.totalorder %s5679_s28, 1  ;;  %s5818_s12 = scalar_lea.vmem [#allocation2], %s333_s18 }
  0x19   : > { %s338_s19 = scalar_select %p337_p12, %s5675_s27, 2 }
  0x1a   : > { %s345_s20 = scalar_select %p344_p13, %s5679_s28, 1 }
  0x1b   : > { %s4985_s21 = sshll.u32 %s338_s19, 7  ;;  %p4987_p1 = scmp.ne.s32.totalorder %s5675_s27, 0 }
  0x1c   : > { %p346_p0 = scmp.lt.s32.totalorder %s4985_s21, 312  ;;  %s5479_s22 = smul.u32 313, %s345_s20  ;;  %vm367_vm0 = vcmask (!%p4987_p1), 516096   ;;  %v5693_v0 = vmov (!%p4987_p1), -inf  }
  0x1d   : > { %366 = sbr.rel (%p4987_p1) target bundleno = 36 (0x24), region = 52  ;;  %368 = vst.msk [vmem:[%s5818_s12] sm:$0x1] (!%p4987_p1), %vm367_vm0, %v5693_v0 }
  0x1e   : > { %s7801_s21 = smov (!%p346_p0, %s4985_s21), 312 }
  0x1f   : > { %s349_s23 = sadd.s32 %s5479_s22, %s7801_s21 }
  0x20   : > { %s4986_s9 = sshll.u32 %s349_s23, 3 }
  0x21   : > { %s5814_s16 = scalar_lea.vmem %s7585_s0, %s4986_s9 }
  0x24 PF: > { %v497_v1 = vld [vmem:[%s7586_s1] sm:$0xff]  ;;  %vm498_vm1 = vcmask 64512   ;;  %v370_v3 = vld [vmem:[%s5814_s16 + $0x8] sm:$0xff]  ;;  %v371_v4 = vld [vmem:[%s5814_s16 + $0x10] sm:$0xff]  ;;  %s5150_s21 = sshll.u32 %s5675_s27, 10  ;;  %vm4624_vm5 = vcmask 523264  }
  0x25   : > { %v369_v2 = vld [vmem:[%s5814_s16] sm:$0xff]  ;;  %5283 = vmatprep.subr.mxu0 %v497_v1  ;;  %5477 = vmatprep.subr.mxu1 %v497_v1  ;;  %v372_v5 = vld [vmem:[%s5814_s16 + $0x18] sm:$0xff]  ;;  %v374_v7 = vld [vmem:[%s5814_s16 + $0x28] sm:$0xff]  ;;  %s5151_s20 = sshll.u32 %s5679_s28, 4  ;;  %s4891_s9 = scalar_lea.sflag [#allocation3], %s333_s18 }
  0x26   : > { %5285 = vmatprep.mubr.msk.f32.mxu0 %vm498_vm1, %v369_v2  ;;  %5284 = vmatpush3.msra.mxu0 %v497_v1  ;;  %v373_v6 = vld [vmem:[%s5814_s16 + $0x20] sm:$0xff]  ;;  %v434_v9 = vld [vmem:[%s5814_s16 + $0x208] sm:$0xff]  ;;  %v375_v10 = vld [vmem:[%s5814_s16 + $0x30] sm:$0xff]  ;;  %s7529_s23 = scalar_lea.hbm %s7592_s7, %s5151_s20  ;;  %s5696_s28 = smov [#allocation2]  }
  0x27   : > { %5286 = vmatmul.mubr.msk.f32.vlgmr.msra.gmra.mrb[0].mxu0 %vm498_vm1, %v370_v3  ;;  %5478 = vmatpush3.msra.mxu1 %v497_v1  ;;  %v433_v8 = vld [vmem:[%s5814_s16 + $0x200] sm:$0xff]  ;;  %v435_v13 = vld [vmem:[%s5814_s16 + $0x210] sm:$0xff]  ;;  %v436_v14 = vld [vmem:[%s5814_s16 + $0x218] sm:$0xff]  ;;  %s5601_s10 = sshll.u32 %s5696_s28, 4  ;;  %s5602_s10 = int_to_ptr.vmem [resolvable:$false] %s5601_s10 }
  0x28   : > { %5288 = vmatprep.mubr.msk.f32.mxu0 %vm498_vm1, %v371_v4  ;;  %5381 = vmatprep.mubr.msk.f32.mxu1 %vm498_vm1, %v433_v8  ;;  %v5554_v11 = vld [vmem:[%s7588_s3] ss:$8 sps:$4 sm:$0xff]   ;;  %v5556_v12 = vld [vmem:[%s7588_s3 + $0x4] ss:$8 sps:$4 sm:$0xff]   ;;  %v376_v15 = vld [vmem:[%s5814_s16 + $0x38] sm:$0xff]  ;;  %s5603_s15 = scalar_lea.vmem %s5602_s10, 32 }
  0x29   : > { %5382 = vmatmul.mubr.msk.f32.vlgmr.msra.gmra.mrb[0].mxu1 %vm498_vm1, %v434_v9  ;;  %1948 = vmatprep.subr.bf16.mxu1 %v5556_v12  ;;  %v437_v16 = vld [vmem:[%s5814_s16 + $0x220] sm:$0xff]  ;;  %v438_v18 = vld [vmem:[%s5814_s16 + $0x228] sm:$0xff]  ;;  %v5559_v19 = vld [vmem:[%s7588_s3 + $0x14] ss:$8 sps:$4 sm:$0xff]  }
  0x2a   : > { %v377_v17 = vld [vmem:[%s5814_s16 + $0x40] sm:$0xff]  ;;  %5384 = vmatprep.mubr.msk.f32.mxu1 %vm498_vm1, %v435_v13  ;;  %1949 = vmatpush1.bf16.msra.mxu1 %v5554_v11  ;;  %v378_v20 = vld [vmem:[%s5814_s16 + $0x48] sm:$0xff]  ;;  %v439_v21 = vld [vmem:[%s5814_s16 + $0x230] sm:$0xff] }
  0x2b   : > { %5289 = vmatmul.mubr.msk.f32.gmra.mrb[2].mxu0 %vm498_vm1, %v372_v5  ;;  %v5557_v22 = vld [vmem:[%s7588_s3 + $0x10] ss:$8 sps:$4 sm:$0xff]   ;;  %1950 = vmatprep.subr.bf16.mxu1 %v5559_v19  ;;  %v441_v26 = vld [vmem:[%s5814_s16 + $0x240] sm:$0xff]  ;;  %v442_v30 = vld [vmem:[%s5814_s16 + $0x248] sm:$0xff] }
  0x2c   : > { %5291 = vmatprep.mubr.msk.f32.mxu0 %vm498_vm1, %v373_v6  ;;  %v379_v23 = vld [vmem:[%s5814_s16 + $0x50] sm:$0xff]  ;;  %v380_v24 = vld [vmem:[%s5814_s16 + $0x58] sm:$0xff]  ;;  %v381_v27 = vld [vmem:[%s5814_s16 + $0x60] sm:$0xff] }
  0x2d   : > { %5385 = vmatmul.mubr.msk.f32.gmra.mrb[2].mxu1 %vm498_vm1, %v436_v14  ;;  %v440_v25 = vld [vmem:[%s5814_s16 + $0x238] sm:$0xff]  ;;  %v5560_v28 = vld [vmem:[%s7588_s3 + $0x20] ss:$8 sps:$4 sm:$0xff]   ;;  %v5562_v29 = vld [vmem:[%s7588_s3 + $0x24] ss:$8 sps:$4 sm:$0xff]  }
  0x2e   : > { %5387 = vmatprep.mubr.msk.f32.mxu1 %vm498_vm1, %v437_v16  ;;  %1951 = vmatpush1.bf16.msra.mxu1 %v5557_v22  ;;  %v382_v31 = vld [vmem:[%s5814_s16 + $0x68] sm:$0xff]  ;;  %v443_v32 = vld [vmem:[%s5814_s16 + $0x250] sm:$0xff]  ;;  %v444_v36 = vld [vmem:[%s5814_s16 + $0x258] sm:$0xff] }
  0x2f   : > { %5292 = vmatmul.mubr.msk.f32.gmra.mrb[4].mxu0 %vm498_vm1, %v374_v7  ;;  %1952 = vmatprep.subr.bf16.mxu1 %v5562_v29  ;;  %v383_v33 = vld [vmem:[%s5814_s16 + $0x70] sm:$0xff]  ;;  %v384_v37 = vld [vmem:[%s5814_s16 + $0x78] sm:$0xff]  ;;  %v445_v38 = vld [vmem:[%s5814_s16 + $0x260] sm:$0xff] }
  0x30   : > { %5294 = vmatprep.mubr.msk.f32.mxu0 %vm498_vm1, %v375_v10  ;;  %v5563_v34 = vld [vmem:[%s7588_s3 + $0x30] ss:$8 sps:$4 sm:$0xff]   ;;  %v5565_v35 = vld [vmem:[%s7588_s3 + $0x34] ss:$8 sps:$4 sm:$0xff]   ;;  %v385_v39 = vld [vmem:[%s5814_s16 + $0x80] sm:$0xff] }
  0x31   : > { %5388 = vmatmul.mubr.msk.f32.gmra.mrb[4].mxu1 %vm498_vm1, %v438_v18  ;;  %v446_v40 = vld [vmem:[%s5814_s16 + $0x268] sm:$0xff]  ;;  %v447_v43 = vld [vmem:[%s5814_s16 + $0x270] sm:$0xff]  ;;  %v388_v46 = vld [vmem:[%s5814_s16 + $0x98] sm:$0xff] }
  0x32   : > { %5390 = vmatprep.mubr.msk.f32.mxu1 %vm498_vm1, %v439_v21  ;;  %1953 = vmatpush1.bf16.msra.mxu1 %v5560_v28  ;;  %v5568_v41 = vld [vmem:[%s7588_s3 + $0x44] ss:$8 sps:$4 sm:$0xff]   ;;  %v5566_v44 = vld [vmem:[%s7588_s3 + $0x40] ss:$8 sps:$4 sm:$0xff]   ;;  %v387_v45 = vld [vmem:[%s5814_s16 + $0x90] sm:$0xff] }
  0x33   : > { %5295 = vmatmul.mubr.msk.f32.gmra.mrb[6].mxu0 %vm498_vm1, %v376_v15  ;;  %1954 = vmatprep.subr.bf16.mxu1 %v5565_v35  ;;  %v386_v42 = vld [vmem:[%s5814_s16 + $0x88] sm:$0xff]  ;;  %v448_v47 = vld [vmem:[%s5814_s16 + $0x278] sm:$0xff]  ;;  %v449_v48 = vld [vmem:[%s5814_s16 + $0x280] sm:$0xff] }
  0x34   : > { %5297 = vmatprep.mubr.msk.f32.mxu0 %vm498_vm1, %v377_v17  ;;  %v389_v49 = vld [vmem:[%s5814_s16 + $0xa0] sm:$0xff]  ;;  %v5569_v50 = vld [vmem:[%s7588_s3 + $0x50] ss:$8 sps:$4 sm:$0xff]   ;;  %v5571_v51 = vld [vmem:[%s7588_s3 + $0x54] ss:$8 sps:$4 sm:$0xff]  }
  0x35   : > { %5391 = vmatmul.mubr.msk.f32.gmra.mrb[6].mxu1 %vm498_vm1, %v440_v25  ;;  %v450_v52 = vld [vmem:[%s5814_s16 + $0x288] sm:$0xff]  ;;  %v451_v54 = vld [vmem:[%s5814_s16 + $0x290] sm:$0xff]  ;;  %v452_v58 = vld [vmem:[%s5814_s16 + $0x298] sm:$0xff] }
  0x36   : > { %5393 = vmatprep.mubr.msk.f32.mxu1 %vm498_vm1, %v441_v26  ;;  %1955 = vmatpush1.bf16.msra.mxu1 %v5563_v34  ;;  %v390_v53 = vld [vmem:[%s5814_s16 + $0xa8] sm:$0xff]  ;;  %v391_v55 = vld [vmem:[%s5814_s16 + $0xb0] sm:$0xff]  ;;  %v392_v59 = vld [vmem:[%s5814_s16 + $0xb8] sm:$0xff] }
  0x37   : > { %5298 = vmatmul.mubr.msk.f32.gmra.mrb[8].mxu0 %vm498_vm1, %v378_v20  ;;  %1956 = vmatprep.subr.bf16.mxu1 %v5568_v41  ;;  %v5572_v56 = vld [vmem:[%s7588_s3 + $0x60] ss:$8 sps:$4 sm:$0xff]   ;;  %v5574_v57 = vld [vmem:[%s7588_s3 + $0x64] ss:$8 sps:$4 sm:$0xff]   ;;  %v5577_v63 = vld [vmem:[%s7588_s3 + $0x74] ss:$8 sps:$4 sm:$0xff]  }
  0x38   : > { %5300 = vmatprep.mubr.msk.f32.mxu0 %vm498_vm1, %v379_v23  ;;  %v453_v60 = vld [vmem:[%s5814_s16 + $0x2a0] sm:$0xff]  ;;  %v454_v62 = vld [vmem:[%s5814_s16 + $0x2a8] sm:$0xff]  ;;  %v455_v1 = vld [vmem:[%s5814_s16 + $0x2b0] sm:$0xff] }
  0x39   : > { %5394 = vmatmul.mubr.msk.f32.gmra.mrb[8].mxu1 %vm498_vm1, %v442_v30  ;;  %v393_v61 = vld [vmem:[%s5814_s16 + $0xc0] sm:$0xff]  ;;  %v394_v0 = vld [vmem:[%s5814_s16 + $0xc8] sm:$0xff]  ;;  %v5575_v2 = vld [vmem:[%s7588_s3 + $0x70] ss:$8 sps:$4 sm:$0xff]  }
  0x3a   : > { %5396 = vmatprep.mubr.msk.f32.mxu1 %vm498_vm1, %v443_v32  ;;  %1957 = vmatpush1.bf16.msra.mxu1 %v5566_v44  ;;  %v395_v3 = vld [vmem:[%s5814_s16 + $0xd0] sm:$0xff]  ;;  %v456_v4 = vld [vmem:[%s5814_s16 + $0x2b8] sm:$0xff]  ;;  %v457_v6 = vld [vmem:[%s5814_s16 + $0x2c0] sm:$0xff] }
  0x3b   : > { %5301 = vmatmul.mubr.msk.f32.gmra.mrb[10].mxu0 %vm498_vm1, %v380_v24  ;;  %1958 = vmatprep.subr.bf16.mxu1 %v5571_v51  ;;  %v396_v5 = vld [vmem:[%s5814_s16 + $0xd8] sm:$0xff]  ;;  %v397_v7 = vld [vmem:[%s5814_s16 + $0xe0] sm:$0xff]  ;;  %v458_v8 = vld [vmem:[%s5814_s16 + $0x2c8] sm:$0xff]  ;;  %v7614_v51 = vmov 0  }
  0x3c   : > { %5303 = vmatprep.mubr.msk.f32.mxu0 %vm498_vm1, %v381_v27  ;;  %v398_v9 = vld [vmem:[%s5814_s16 + $0xe8] sm:$0xff]  ;;  %v459_v10 = vld [vmem:[%s5814_s16 + $0x2d0] sm:$0xff]  ;;  %v460_v12 = vld [vmem:[%s5814_s16 + $0x2d8] sm:$0xff]  ;;  %3306 = vmatprep.subr.bf16.mxu0 %v7614_v51 }
  0x3d   : > { %5397 = vmatmul.mubr.msk.f32.gmra.mrb[10].mxu1 %vm498_vm1, %v444_v36  ;;  %v399_v11 = vld [vmem:[%s5814_s16 + $0xf0] sm:$0xff]  ;;  %v400_v13 = vld [vmem:[%s5814_s16 + $0xf8] sm:$0xff]  ;;  %v461_v14 = vld [vmem:[%s5814_s16 + $0x2e0] sm:$0xff] }
  0x3e   : > { %5399 = vmatprep.mubr.msk.f32.mxu1 %vm498_vm1, %v445_v38  ;;  %1959 = vmatpush1.bf16.msra.mxu1 %v5569_v50  ;;  %v401_v15 = vld [vmem:[%s5814_s16 + $0x100] sm:$0xff]  ;;  %v462_v16 = vld [vmem:[%s5814_s16 + $0x2e8] sm:$0xff]  ;;  %v463_v18 = vld [vmem:[%s5814_s16 + $0x2f0] sm:$0xff] }
  0x3f   : > { %5304 = vmatmul.mubr.msk.f32.gmra.mrb[12].mxu0 %vm498_vm1, %v382_v31  ;;  %1960 = vmatprep.subr.bf16.mxu1 %v5574_v57  ;;  %v402_v17 = vld [vmem:[%s5814_s16 + $0x108] sm:$0xff]  ;;  %v403_v19 = vld [vmem:[%s5814_s16 + $0x110] sm:$0xff]  ;;  %v464_v20 = vld [vmem:[%s5814_s16 + $0x2f8] sm:$0xff] }
  0x40   : > { %5306 = vmatprep.mubr.msk.f32.mxu0 %vm498_vm1, %v383_v33  ;;  %v404_v21 = vld [vmem:[%s5814_s16 + $0x118] sm:$0xff]  ;;  %v465_v22 = vld [vmem:[%s5814_s16 + $0x300] sm:$0xff]  ;;  %v466_v24 = vld [vmem:[%s5814_s16 + $0x308] sm:$0xff] }
  0x41   : > { %5400 = vmatmul.mubr.msk.f32.gmra.mrb[12].mxu1 %vm498_vm1, %v446_v40  ;;  %v405_v23 = vld [vmem:[%s5814_s16 + $0x120] sm:$0xff]  ;;  %v406_v25 = vld [vmem:[%s5814_s16 + $0x128] sm:$0xff]  ;;  %v467_v26 = vld [vmem:[%s5814_s16 + $0x310] sm:$0xff] }
  0x42   : > { %5402 = vmatprep.mubr.msk.f32.mxu1 %vm498_vm1, %v447_v43  ;;  %1961 = vmatpush1.bf16.msra.mxu1 %v5572_v56  ;;  %v407_v27 = vld [vmem:[%s5814_s16 + $0x130] sm:$0xff]  ;;  %v468_v28 = vld [vmem:[%s5814_s16 + $0x318] sm:$0xff]  ;;  %v469_v30 = vld [vmem:[%s5814_s16 + $0x320] sm:$0xff] }
  0x43   : > { %5307 = vmatmul.mubr.msk.f32.gmra.mrb[14].mxu0 %vm498_vm1, %v384_v37  ;;  %1962 = vmatprep.subr.bf16.mxu1 %v5577_v63  ;;  %v408_v29 = vld [vmem:[%s5814_s16 + $0x138] sm:$0xff]  ;;  %v409_v31 = vld [vmem:[%s5814_s16 + $0x140] sm:$0xff]  ;;  %v470_v32 = vld [vmem:[%s5814_s16 + $0x328] sm:$0xff] }
  0x44   : > { %5309 = vmatprep.mubr.msk.f32.mxu0 %vm498_vm1, %v385_v39  ;;  %v410_v33 = vld [vmem:[%s5814_s16 + $0x148] sm:$0xff]  ;;  %v471_v34 = vld [vmem:[%s5814_s16 + $0x330] sm:$0xff]  ;;  %v472_v36 = vld [vmem:[%s5814_s16 + $0x338] sm:$0xff] }
  0x45   : > { %5403 = vmatmul.mubr.msk.f32.gmra.mrb[14].mxu1 %vm498_vm1, %v448_v47  ;;  %v411_v35 = vld [vmem:[%s5814_s16 + $0x150] sm:$0xff]  ;;  %v412_v37 = vld [vmem:[%s5814_s16 + $0x158] sm:$0xff]  ;;  %v473_v38 = vld [vmem:[%s5814_s16 + $0x340] sm:$0xff] }
  0x46   : > { %5405 = vmatprep.mubr.msk.f32.mxu1 %vm498_vm1, %v449_v48  ;;  %1963 = vmatpush1.bf16.msra.mxu1 %v5575_v2  ;;  %v413_v39 = vld [vmem:[%s5814_s16 + $0x160] sm:$0xff]  ;;  %v474_v40 = vld [vmem:[%s5814_s16 + $0x348] sm:$0xff]  ;;  %v415_v43 = vld [vmem:[%s5814_s16 + $0x170] sm:$0xff] }
  0x47   : > { %5310 = vmatmul.mubr.msk.f32.gmra.mrb[16].mxu0 %vm498_vm1, %v386_v42  ;;  %v414_v41 = vld [vmem:[%s5814_s16 + $0x168] sm:$0xff]  ;;  %v475_v42 = vld [vmem:[%s5814_s16 + $0x350] sm:$0xff]  ;;  %v476_v44 = vld [vmem:[%s5814_s16 + $0x358] sm:$0xff] }
  0x48   : > { %5312 = vmatprep.mubr.msk.f32.mxu0 %vm498_vm1, %v387_v45  ;;  %v477_v45 = vld [vmem:[%s5814_s16 + $0x360] sm:$0xff]  ;;  %v478_v48 = vld [vmem:[%s5814_s16 + $0x368] sm:$0xff]  ;;  %v424_v63 = vld [vmem:[%s5814_s16 + $0x1b8] sm:$0xff] }
  0x49   : > { %5406 = vmatmul.mubr.msk.f32.gmra.mrb[16].mxu1 %vm498_vm1, %v450_v52  ;;  %v417_v47 = vld [vmem:[%s5814_s16 + $0x180] sm:$0xff]  ;;  %v418_v50 = vld [vmem:[%s5814_s16 + $0x188] sm:$0xff]  ;;  %v419_v52 = vld [vmem:[%s5814_s16 + $0x190] sm:$0xff] }
  0x4a   : > { %5408 = vmatprep.mubr.msk.f32.mxu1 %vm498_vm1, %v451_v54  ;;  %v481_v54 = vld [vmem:[%s5814_s16 + $0x380] sm:$0xff]  ;;  %v482_v57 = vld [vmem:[%s5814_s16 + $0x388] sm:$0xff]  ;;  %v487_v2 = vld [vmem:[%s5814_s16 + $0x3b0] sm:$0xff] }
  0x4b   : > { %5313 = vmatmul.mubr.msk.f32.gmra.mrb[18].mxu0 %vm498_vm1, %v388_v46  ;;  %v416_v46 = vld [vmem:[%s5814_s16 + $0x178] sm:$0xff]  ;;  %v421_v56 = vld [vmem:[%s5814_s16 + $0x1a0] sm:$0xff] }
  0x4c   : > { %5315 = vmatprep.mubr.msk.f32.mxu0 %vm498_vm1, %v389_v49  ;;  %v479_v49 = vld [vmem:[%s5814_s16 + $0x370] sm:$0xff] }
  0x4d   : > { %5409 = vmatmul.mubr.msk.f32.gmra.mrb[18].mxu1 %vm498_vm1, %v452_v58  ;;  %v483_v58 = vld [vmem:[%s5814_s16 + $0x390] sm:$0xff] }
  0x4e   : > { %5411 = vmatprep.mubr.msk.f32.mxu1 %vm498_vm1, %v453_v60  ;;  %v423_v60 = vld [vmem:[%s5814_s16 + $0x1b0] sm:$0xff] }
  0x4f   : > { %5316 = vmatmul.mubr.msk.f32.gmra.mrb[20].mxu0 %vm498_vm1, %v390_v53  ;;  %v480_v53 = vld [vmem:[%s5814_s16 + $0x378] sm:$0xff] }
  0x50   : > { %5318 = vmatprep.mubr.msk.f32.mxu0 %vm498_vm1, %v391_v55  ;;  %v420_v55 = vld [vmem:[%s5814_s16 + $0x198] sm:$0xff] }
  0x51   : > { %5412 = vmatmul.mubr.msk.f32.gmra.mrb[20].mxu1 %vm498_vm1, %v454_v62  ;;  %v485_v62 = vld [vmem:[%s5814_s16 + $0x3a0] sm:$0xff] }
  0x52   : > { %5414 = vmatprep.mubr.msk.f32.mxu1 %vm498_vm1, %v455_v1  ;;  %v486_v1 = vld [vmem:[%s5814_s16 + $0x3a8] sm:$0xff] }
  0x53   : > { %5319 = vmatmul.mubr.msk.f32.gmra.mrb[22].mxu0 %vm498_vm1, %v392_v59  ;;  %v422_v59 = vld [vmem:[%s5814_s16 + $0x1a8] sm:$0xff] }
  0x54   : > { %5321 = vmatprep.mubr.msk.f32.mxu0 %vm498_vm1, %v393_v61  ;;  %v484_v61 = vld [vmem:[%s5814_s16 + $0x398] sm:$0xff] }
  0x55   : > { %5415 = vmatmul.mubr.msk.f32.gmra.mrb[22].mxu1 %vm498_vm1, %v456_v4  ;;  %v427_v4 = vld [vmem:[%s5814_s16 + $0x1d0] sm:$0xff] }
  0x56   : > { %5417 = vmatprep.mubr.msk.f32.mxu1 %vm498_vm1, %v457_v6  ;;  %v489_v6 = vld [vmem:[%s5814_s16 + $0x3c0] sm:$0xff] }
  0x57   : > { %5322 = vmatmul.mubr.msk.f32.gmra.mrb[24].mxu0 %vm498_vm1, %v394_v0  ;;  %v425_v0 = vld [vmem:[%s5814_s16 + $0x1c0] sm:$0xff] }
  0x58   : > { %5324 = vmatprep.mubr.msk.f32.mxu0 %vm498_vm1, %v395_v3  ;;  %v426_v3 = vld [vmem:[%s5814_s16 + $0x1c8] sm:$0xff] }
  0x59   : > { %5418 = vmatmul.mubr.msk.f32.gmra.mrb[24].mxu1 %vm498_vm1, %v458_v8  ;;  %v429_v8 = vld [vmem:[%s5814_s16 + $0x1e0] sm:$0xff] }
  0x5a   : > { %5420 = vmatprep.mubr.msk.f32.mxu1 %vm498_vm1, %v459_v10  ;;  %v491_v10 = vld [vmem:[%s5814_s16 + $0x3d0] sm:$0xff] }
  0x5b   : > { %5325 = vmatmul.mubr.msk.f32.gmra.mrb[26].mxu0 %vm498_vm1, %v396_v5  ;;  %v488_v5 = vld [vmem:[%s5814_s16 + $0x3b8] sm:$0xff] }
  0x5c   : > { %5327 = vmatprep.mubr.msk.f32.mxu0 %vm498_vm1, %v397_v7  ;;  %v428_v7 = vld [vmem:[%s5814_s16 + $0x1d8] sm:$0xff] }
  0x5d   : > { %5421 = vmatmul.mubr.msk.f32.gmra.mrb[26].mxu1 %vm498_vm1, %v460_v12  ;;  %v431_v12 = vld [vmem:[%s5814_s16 + $0x1f0] sm:$0xff] }
  0x5e   : > { %5423 = vmatprep.mubr.msk.f32.mxu1 %vm498_vm1, %v461_v14  ;;  %v493_v14 = vld [vmem:[%s5814_s16 + $0x3e0] sm:$0xff] }
  0x5f   : > { %5328 = vmatmul.mubr.msk.f32.gmra.mrb[28].mxu0 %vm498_vm1, %v398_v9  ;;  %v490_v9 = vld [vmem:[%s5814_s16 + $0x3c8] sm:$0xff] }
  0x60   : > { %5330 = vmatprep.mubr.msk.f32.mxu0 %vm498_vm1, %v399_v11  ;;  %v430_v11 = vld [vmem:[%s5814_s16 + $0x1e8] sm:$0xff] }
  0x61   : > { %5424 = vmatmul.mubr.msk.f32.gmra.mrb[28].mxu1 %vm498_vm1, %v462_v16  ;;  %v494_v16 = vld [vmem:[%s5814_s16 + $0x3e8] sm:$0xff] }
  0x62   : > { %5426 = vmatprep.mubr.msk.f32.mxu1 %vm498_vm1, %v463_v18  ;;  %v496_v18 = vld [vmem:[%s5814_s16 + $0x3f8] sm:$0xff] }
  0x63   : > { %5331 = vmatmul.mubr.msk.f32.gmra.mrb[30].mxu0 %vm498_vm1, %v400_v13  ;;  %v492_v13 = vld [vmem:[%s5814_s16 + $0x3d8] sm:$0xff] }
  0x64   : > { %5333 = vmatprep.mubr.msk.f32.mxu0 %vm498_vm1, %v401_v15  ;;  %v432_v15 = vld [vmem:[%s5814_s16 + $0x1f8] sm:$0xff] }
  0x65   : > { %5427 = vmatmul.mubr.msk.f32.gmra.mrb[30].mxu1 %vm498_vm1, %v464_v20  ;;  %v5579_v20 = vld [vmem:[%s7590_s5 + $0x8] sm:$0xff]  }
  0x66   : > { %5429 = vmatprep.mubr.msk.f32.mxu1 %vm498_vm1, %v465_v22 }
  0x67   : > { %5334 = vmatmul.mubr.msk.f32.gmra.mrb[32].mxu0 %vm498_vm1, %v402_v17  ;;  %v495_v17 = vld [vmem:[%s5814_s16 + $0x3f0] sm:$0xff] }
  0x68   : > { %5336 = vmatprep.mubr.msk.f32.mxu0 %vm498_vm1, %v403_v19  ;;  %v5578_v19 = vld [vmem:[%s7590_s5] sm:$0xff]  }
  0x69   : > { %5430 = vmatmul.mubr.msk.f32.gmra.mrb[32].mxu1 %vm498_vm1, %v466_v24  ;;  %3307 = vmatpush1.bf16.msra.mxu0 %v5578_v19  ;;  %v5580_v24 = vld [vmem:[%s7590_s5 + $0x10] sm:$0xff]  }
  0x6a   : > { %5432 = vmatprep.mubr.msk.f32.mxu1 %vm498_vm1, %v467_v26  ;;  %3308 = vmatprep.subr.bf16.mxu0 %v7614_v51 }
  0x6b   : > { %5337 = vmatmul.mubr.msk.f32.gmra.mrb[34].mxu0 %vm498_vm1, %v404_v21  ;;  %v1656_v21 = vlaneseq }
  0x6c   : > { %5339 = vmatprep.mubr.msk.f32.mxu0 %vm498_vm1, %v405_v23  ;;  %v1652_v23 = vld [vmem:[%s7587_s2] sm:$0x1] }
  0x6d   : > { %5433 = vmatmul.mubr.msk.f32.gmra.mrb[34].mxu1 %vm498_vm1, %v468_v28  ;;  %3309 = vmatpush1.bf16.msra.mxu0 %v5579_v20  ;;  %v6139_v22 = vshrl.u32 %v1656_v21, 7 }
  0x6e   : > { %5435 = vmatprep.mubr.msk.f32.mxu1 %vm498_vm1, %v469_v30  ;;  %3310 = vmatprep.subr.bf16.mxu0 %v7614_v51 }
  0x6f   : > { %5340 = vmatmul.mubr.msk.f32.gmra.mrb[36].mxu0 %vm498_vm1, %v406_v25  ;;  %v1654_v25 = vpack.i.b16 %v1652_v23, %v1652_v23  ;;  %v6148_v26 = vsub.s32 0, %v6139_v22 }
  0x70   : > { %5342 = vmatprep.mubr.msk.f32.mxu0 %vm498_vm1, %v407_v27 }
  0x71   : > { %5436 = vmatmul.mubr.msk.f32.gmra.mrb[36].mxu1 %vm498_vm1, %v470_v32  ;;  %3311 = vmatpush1.bf16.msra.mxu0 %v5580_v24  ;;  %v6152_v28 = vrot.slane %v1654_v25, %v6148_v26 }
  0x72   : > { %5438 = vmatprep.mubr.msk.f32.mxu1 %vm498_vm1, %v471_v34  ;;  %3312 = vmatprep.subr.bf16.mxu0 %v7614_v51 }
  0x73   : > { %5343 = vmatmul.mubr.msk.f32.gmra.mrb[38].mxu0 %vm498_vm1, %v408_v29 }
  0x74   : > { %5345 = vmatprep.mubr.msk.f32.mxu0 %vm498_vm1, %v409_v31  ;;  %v5581_v31 = vld [vmem:[%s7590_s5 + $0x18] sm:$0xff]  }
  0x75   : > { %5439 = vmatmul.mubr.msk.f32.gmra.mrb[38].mxu1 %vm498_vm1, %v472_v36  ;;  %3313 = vmatpush1.bf16.msra.mxu0 %v5581_v31  ;;  %v5588_v31 = vld [vmem:[%s7590_s5 + $0x50] sm:$0xff]  }
  0x76   : > { %5441 = vmatprep.mubr.msk.f32.mxu1 %vm498_vm1, %v473_v38  ;;  %3314 = vmatprep.subr.bf16.mxu0 %v7614_v51 }
  0x77   : > { %5346 = vmatmul.mubr.msk.f32.gmra.mrb[40].mxu0 %vm498_vm1, %v410_v33 }
  0x78   : > { %5348 = vmatprep.mubr.msk.f32.mxu0 %vm498_vm1, %v411_v35 }
  0x79   : > { %5442 = vmatmul.mubr.msk.f32.gmra.mrb[40].mxu1 %vm498_vm1, %v474_v40 }
  0x7a   : > { %5444 = vmatprep.mubr.msk.f32.mxu1 %vm498_vm1, %v475_v42 }
  0x7b   : > { %5349 = vmatmul.mubr.msk.f32.gmra.mrb[42].mxu0 %vm498_vm1, %v412_v37 }
  0x7c   : > { %5351 = vmatprep.mubr.msk.f32.mxu0 %vm498_vm1, %v413_v39 }
  0x7d   : > { %5445 = vmatmul.mubr.msk.f32.gmra.mrb[42].mxu1 %vm498_vm1, %v476_v44 }
  0x7e   : > { %5447 = vmatprep.mubr.msk.f32.mxu1 %vm498_vm1, %v477_v45  ;;  %v5582_v45 = vld [vmem:[%s7590_s5 + $0x20] sm:$0xff]  }
  0x7f   : > { %5352 = vmatmul.mubr.msk.f32.gmra.mrb[44].mxu0 %vm498_vm1, %v414_v41 }
  0x80   : > { %5354 = vmatprep.mubr.msk.f32.mxu0 %vm498_vm1, %v415_v43  ;;  %3315 = vmatpush1.bf16.msra.mxu0 %v5582_v45 }
  0x81   : > { %5448 = vmatmul.mubr.msk.f32.gmra.mrb[44].mxu1 %vm498_vm1, %v478_v48  ;;  %3316 = vmatprep.subr.bf16.mxu0 %v7614_v51 }
  0x82   : > { %5450 = vmatprep.mubr.msk.f32.mxu1 %vm498_vm1, %v479_v49 }
  0x83   : > { %5355 = vmatmul.mubr.msk.f32.gmra.mrb[46].mxu0 %vm498_vm1, %v416_v46 }
  0x84   : > { %5357 = vmatprep.mubr.msk.f32.mxu0 %vm498_vm1, %v417_v47 }
  0x85   : > { %5451 = vmatmul.mubr.msk.f32.gmra.mrb[46].mxu1 %vm498_vm1, %v480_v53 }
  0x86   : > { %5453 = vmatprep.mubr.msk.f32.mxu1 %vm498_vm1, %v481_v54 }
  0x87   : > { %5358 = vmatmul.mubr.msk.f32.gmra.mrb[48].mxu0 %vm498_vm1, %v418_v50 }
  0x88   : > { %5360 = vmatprep.mubr.msk.f32.mxu0 %vm498_vm1, %v419_v52 }
  0x89   : > { %5454 = vmatmul.mubr.msk.f32.gmra.mrb[48].mxu1 %vm498_vm1, %v482_v57 }
  0x8a   : > { %5456 = vmatprep.mubr.msk.f32.mxu1 %vm498_vm1, %v483_v58 }
  0x8b   : > { %5361 = vmatmul.mubr.msk.f32.gmra.mrb[50].mxu0 %vm498_vm1, %v420_v55 }
  0x8c   : > { %5363 = vmatprep.mubr.msk.f32.mxu0 %vm498_vm1, %v421_v56 }
  0x8d   : > { %5457 = vmatmul.mubr.msk.f32.gmra.mrb[50].mxu1 %vm498_vm1, %v484_v61 }
  0x8e   : > { %5459 = vmatprep.mubr.msk.f32.mxu1 %vm498_vm1, %v485_v62  ;;  %v5583_v62 = vld [vmem:[%s7590_s5 + $0x28] sm:$0xff]  }
  0x8f   : > { %5364 = vmatmul.mubr.msk.f32.gmra.mrb[52].mxu0 %vm498_vm1, %v422_v59 }
  0x90   : > { %5366 = vmatprep.mubr.msk.f32.mxu0 %vm498_vm1, %v423_v60  ;;  %3317 = vmatpush1.bf16.msra.mxu0 %v5583_v62 }
  0x91   : > { %5460 = vmatmul.mubr.msk.f32.gmra.mrb[52].mxu1 %vm498_vm1, %v486_v1  ;;  %3318 = vmatprep.subr.bf16.mxu0 %v7614_v51 }
  0x92   : > { %5462 = vmatprep.mubr.msk.f32.mxu1 %vm498_vm1, %v487_v2 }
  0x93   : > { %5367 = vmatmul.mubr.msk.f32.gmra.mrb[54].mxu0 %vm498_vm1, %v424_v63 }
  0x94   : > { %5369 = vmatprep.mubr.msk.f32.mxu0 %vm498_vm1, %v425_v0 }
  0x95   : > { %5463 = vmatmul.mubr.msk.f32.gmra.mrb[54].mxu1 %vm498_vm1, %v488_v5 }
  0x96   : > { %5465 = vmatprep.mubr.msk.f32.mxu1 %vm498_vm1, %v489_v6 }
  0x97   : > { %5370 = vmatmul.mubr.msk.f32.gmra.mrb[56].mxu0 %vm498_vm1, %v426_v3 }
  0x98   : > { %5372 = vmatprep.mubr.msk.f32.mxu0 %vm498_vm1, %v427_v4 }
  0x99   : > { %5466 = vmatmul.mubr.msk.f32.gmra.mrb[56].mxu1 %vm498_vm1, %v490_v9 }
  0x9a   : > { %5468 = vmatprep.mubr.msk.f32.mxu1 %vm498_vm1, %v491_v10 }
  0x9b   : > { %5373 = vmatmul.mubr.msk.f32.gmra.mrb[58].mxu0 %vm498_vm1, %v428_v7 }
  0x9c   : > { %5375 = vmatprep.mubr.msk.f32.mxu0 %vm498_vm1, %v429_v8 }
  0x9d   : > { %5469 = vmatmul.mubr.msk.f32.gmra.mrb[58].mxu1 %vm498_vm1, %v492_v13 }
  0x9e   : > { %5471 = vmatprep.mubr.msk.f32.mxu1 %vm498_vm1, %v493_v14  ;;  %v5584_v14 = vld [vmem:[%s7590_s5 + $0x30] sm:$0xff]  }
  0x9f   : > { %5376 = vmatmul.mubr.msk.f32.gmra.mrb[60].mxu0 %vm498_vm1, %v430_v11 }
  0xa0   : > { %5378 = vmatprep.mubr.msk.f32.mxu0 %vm498_vm1, %v431_v12  ;;  %3319 = vmatpush1.bf16.msra.mxu0 %v5584_v14 }
  0xa1   : > { %5472 = vmatmul.mubr.msk.f32.gmra.mrb[60].mxu1 %vm498_vm1, %v494_v16  ;;  %3320 = vmatprep.subr.bf16.mxu0 %v7614_v51 }
  0xa2   : > { %5474 = vmatprep.mubr.msk.f32.mxu1 %vm498_vm1, %v495_v17 }
  0xa3   : > { %5379 = vmatmul.mubr.msk.f32.gmra.mrb[62].mxu0 %vm498_vm1, %v432_v15 }
  0xa5   : > { %5475 = vmatmul.mubr.msk.f32.gmra.mrb[62].mxu1 %vm498_vm1, %v496_v18 }
  0xa6   : > { %1980 = vmatprep.mubr.bf16.mxu1 %v7614_v51 }
  0xfa   : > { %v5287_v27 = vpop.f32.mrb[0].mxu0 }
  0xfb   : > { %v949_v29 = vpop.f32.mrb[1].mxu0 }
  0xfc   : > { %v1588_v30 = vpack.c.bf16 %v5287_v27, %v949_v29  ;;  %v6159_v37 = vpop.f32.mrb[0].mxu1 }
  0xfd   : > { %v6162_v41 = vpop.f32.mrb[1].mxu1 }
  0xfe   : > { %v1660_v32 = vadd.bf16 %v6152_v28, %v1588_v30  ;;  %v5290_v33 = vpop.f32.mrb[2].mxu0 }
  0xff   : > { %v959_v34 = vpop.f32.mrb[3].mxu0 }
 0x100   : > { %v1724_v35 = vmul.bf16 1009007652, %v1660_v32  ;;  %v1589_v36 = vpack.c.bf16 %v5290_v33, %v959_v34  ;;  %v6170_v46 = vpop.f32.mrb[2].mxu1  ;;  %v5585_v33 = vld [vmem:[%s7590_s5 + $0x38] sm:$0xff]  }
 0x101   : > { %v6172_v49 = vpop.f32.mrb[3].mxu1  ;;  %3321 = vmatpush1.bf16.msra.mxu0 %v5585_v33 }
 0x102   : > { %v1788_v38 = vmax.bf16 %v1724_v35, %v1660_v32  ;;  %v1661_v39 = vadd.bf16 %v6152_v28, %v1589_v36  ;;  %v5293_v40 = vpop.f32.mrb[4].mxu0  ;;  %3322 = vmatprep.subr.bf16.mxu0 %v7614_v51 }
 0x103   : > { %v969_v42 = vpop.f32.mrb[5].mxu0 }
 0x104   : > { %1981 = vmatmul.mubr.bf16.vlgmr.msra.gmra.mrb[64].mxu1 %v1788_v38  ;;  %v1590_v44 = vpack.c.bf16 %v5293_v40, %v969_v42  ;;  %v1725_v47 = vmul.bf16 1009007652, %v1661_v39  ;;  %v6177_v54 = vpop.f32.mrb[4].mxu1 }
 0x105   : > { %1990 = vmatprep.mubr.bf16.mxu1 %v7614_v51  ;;  %v6180_v58 = vpop.f32.mrb[5].mxu1 }
 0x106   : > { %v5296_v48 = vpop.f32.mrb[6].mxu0  ;;  %v1662_v55 = vadd.bf16 %v6152_v28, %v1590_v44  ;;  %v1789_v56 = vmax.bf16 %v1725_v47, %v1661_v39 }
 0x107   : > { %v979_v50 = vpop.f32.mrb[7].mxu0 }
 0x108   : > { %v1591_v53 = vpack.c.bf16 %v5296_v48, %v979_v50  ;;  %v6188_v63 = vpop.f32.mrb[6].mxu1  ;;  %v1726_v0 = vmul.bf16 1009007652, %v1662_v55 }
 0x109   : > { %v6190_v2 = vpop.f32.mrb[7].mxu1 }
 0x10a   : > { %v5299_v57 = vpop.f32.mrb[8].mxu0  ;;  %v1663_v7 = vadd.bf16 %v6152_v28, %v1591_v53  ;;  %v1790_v8 = vmax.bf16 %v1726_v0, %v1662_v55 }
 0x10b   : > { %v989_v59 = vpop.f32.mrb[9].mxu0 }
 0x10c   : > { %1991 = vmatmul.mubr.bf16.gmra.mrb[68].mxu1 %v1789_v56  ;;  %v1592_v61 = vpack.c.bf16 %v5299_v57, %v989_v59  ;;  %v6195_v6 = vpop.f32.mrb[8].mxu1  ;;  %v1727_v16 = vmul.bf16 1009007652, %v1663_v7  ;;  %v5586_v57 = vld [vmem:[%s7590_s5 + $0x40] sm:$0xff]  }
 0x10d   : > { %2000 = vmatprep.mubr.bf16.mxu1 %v7614_v51  ;;  %v6198_v10 = vpop.f32.mrb[9].mxu1  ;;  %3323 = vmatpush1.bf16.msra.mxu0 %v5586_v57 }
 0x10e   : > { %v5302_v1 = vpop.f32.mrb[10].mxu0  ;;  %v1664_v24 = vadd.bf16 %v6152_v28, %v1592_v61  ;;  %v1791_v25 = vmax.bf16 %v1727_v16, %v1663_v7  ;;  %3324 = vmatprep.subr.bf16.mxu0 %v7614_v51 }
 0x10f   : > { %v999_v3 = vpop.f32.mrb[11].mxu0 }
 0x110   : > { %v1593_v5 = vpack.c.bf16 %v5302_v1, %v999_v3  ;;  %v6206_v15 = vpop.f32.mrb[10].mxu1  ;;  %v1728_v35 = vmul.bf16 1009007652, %v1664_v24 }
 0x111   : > { %v6210_v18 = vpop.f32.mrb[11].mxu1 }
 0x112   : > { %v5305_v9 = vpop.f32.mrb[12].mxu0  ;;  %v1665_v45 = vadd.bf16 %v6152_v28, %v1593_v5  ;;  %v1792_v47 = vmax.bf16 %v1728_v35, %v1664_v24  ;;  %v5587_v24 = vld [vmem:[%s7590_s5 + $0x48] sm:$0xff]  }
 0x113   : > { %v1009_v11 = vpop.f32.mrb[13].mxu0  ;;  %3325 = vmatpush1.bf16.msra.mxu0 %v5587_v24 }
 0x114   : > { %2001 = vmatmul.mubr.bf16.gmra.mrb[72].mxu1 %v1790_v8  ;;  %v1594_v13 = vpack.c.bf16 %v5305_v9, %v1009_v11  ;;  %v6219_v23 = vpop.f32.mrb[12].mxu1  ;;  %v1729_v61 = vmul.bf16 1009007652, %v1665_v45  ;;  %3326 = vmatprep.subr.bf16.mxu0 %v7614_v51 }
 0x115   : > { %2010 = vmatprep.mubr.bf16.mxu1 %v7614_v51  ;;  %v6224_v29 = vpop.f32.mrb[13].mxu1 }
 0x116   : > { %v6208_v17 = vpop.f32.mrb[14].mxu0  ;;  %v1666_v8 = vadd.bf16 %v6152_v28, %v1594_v13  ;;  %v1793_v9 = vmax.bf16 %v1729_v61, %v1665_v45 }
 0x117   : > { %v6212_v19 = vpop.f32.mrb[15].mxu0  ;;  %3327 = vmatpush1.bf16.msra.mxu0 %v5588_v31 }
 0x118   : > { %v1595_v21 = vpack.c.bf16 %v6208_v17, %v6212_v19  ;;  %v6236_v34 = vpop.f32.mrb[14].mxu1  ;;  %3328 = vmatprep.subr.bf16.mxu0 %v7614_v51 }
 0x119   : > { %v6240_v38 = vpop.f32.mrb[15].mxu1 }
 0x11a   : > { %v6222_v27 = vpop.f32.mrb[16].mxu0 }
 0x11b   : > { %v6226_v30 = vpop.f32.mrb[17].mxu0 }
 0x11c   : > { %2011 = vmatmul.mubr.bf16.gmra.mrb[76].mxu1 %v1791_v25  ;;  %v1596_v32 = vpack.c.bf16 %v6222_v27, %v6226_v30  ;;  %v6249_v44 = vpop.f32.mrb[16].mxu1  ;;  %v1730_v25 = vmul.bf16 1009007652, %v1666_v8  ;;  %v5589_v27 = vld [vmem:[%s7590_s5 + $0x58] sm:$0xff]  }
 0x11d   : > { %2020 = vmatprep.mubr.bf16.mxu1 %v7614_v51  ;;  %7643 = vst [vmem:[#allocation6_spill] sm:$0xff] %v6249_v44  ;;  %v6254_v50 = vpop.f32.mrb[17].mxu1  ;;  %3329 = vmatpush1.bf16.msra.mxu0 %v5589_v27 }
 0x11e   : > { %v6238_v36 = vpop.f32.mrb[18].mxu0  ;;  %7644 = vst [vmem:[#allocation7_spill] sm:$0xff] %v6254_v50  ;;  %v1794_v17 = vmax.bf16 %v1730_v25, %v1666_v8  ;;  %v1668_v60 = vadd.bf16 %v6152_v28, %v1596_v32  ;;  %3330 = vmatprep.subr.bf16.mxu0 %v7614_v51 }
 0x11f   : > { %v6242_v39 = vpop.f32.mrb[19].mxu0 }
 0x120   : > { %v1597_v42 = vpack.c.bf16 %v6238_v36, %v6242_v39  ;;  %v6266_v59 = vpop.f32.mrb[18].mxu1  ;;  %v1732_v32 = vmul.bf16 1009007652, %v1668_v60  ;;  %v5590_v36 = vld [vmem:[%s7590_s5 + $0x60] sm:$0xff]  }
 0x121   : > { %7645 = vst [vmem:[#allocation8_spill] sm:$0xff] %v6266_v59  ;;  %v6270_v0 = vpop.f32.mrb[19].mxu1  ;;  %3331 = vmatpush1.bf16.msra.mxu0 %v5590_v36 }
 0x122   : > { %v6252_v48 = vpop.f32.mrb[20].mxu0  ;;  %7646 = vst [vmem:[#allocation9_spill] sm:$0xff] %v6270_v0  ;;  %v1669_v19 = vadd.bf16 %v6152_v28, %v1597_v42  ;;  %v1796_v5 = vmax.bf16 %v1732_v32, %v1668_v60  ;;  %3332 = vmatprep.subr.bf16.mxu0 %v7614_v51 }
 0x123   : > { %v6256_v53 = vpop.f32.mrb[21].mxu0 }
 0x124   : > { %2021 = vmatmul.mubr.bf16.gmra.mrb[80].mxu1 %v1792_v47  ;;  %v6279_v7 = vpop.f32.mrb[20].mxu1  ;;  %v1733_v39 = vmul.bf16 1009007652, %v1669_v19 }
 0x125   : > { %2030 = vmatprep.mubr.bf16.mxu1 %v7614_v51  ;;  %7647 = vst [vmem:[#allocation10_spill] sm:$0xff] %v6279_v7  ;;  %v6284_v14 = vpop.f32.mrb[21].mxu1 }
 0x126   : > { %v6268_v62 = vpop.f32.mrb[22].mxu0  ;;  %7648 = vst [vmem:[#allocation11_spill] sm:$0xff] %v6284_v14 }
 0x127   : > { %v6272_v1 = vpop.f32.mrb[23].mxu0 }
 0x128   : > { %v6296_v13 = vpop.f32.mrb[22].mxu1 }
 0x129   : > { %7649 = vst [vmem:[#allocation12_spill] sm:$0xff] %v6296_v13  ;;  %v6300_v35 = vpop.f32.mrb[23].mxu1 }
 0x12a   : > { %v6282_v11 = vpop.f32.mrb[24].mxu0  ;;  %7650 = vst [vmem:[#allocation13_spill] sm:$0xff] %v6300_v35 }
 0x12b   : > { %v6286_v16 = vpop.f32.mrb[25].mxu0 }
 0x12c   : > { %2031 = vmatmul.mubr.bf16.gmra.mrb[84].mxu1 %v1793_v9  ;;  %v6309_v61 = vpop.f32.mrb[24].mxu1  ;;  %v1667_v9 = vadd.bf16 %v6152_v28, %v1595_v21 }
 0x12d   : > { %2040 = vmatprep.mubr.bf16.mxu1 %v7614_v51  ;;  %7651 = vst [vmem:[#allocation14_spill] sm:$0xff] %v6309_v61  ;;  %v6314_v55 = vpop.f32.mrb[25].mxu1 }
 0x12e   : > { %v6298_v33 = vpop.f32.mrb[26].mxu0  ;;  %7652 = vst [vmem:[#allocation15_spill] sm:$0xff] %v6314_v55  ;;  %v1731_v8 = vmul.bf16 1009007652, %v1667_v9 }
 0x12f   : > { %v6302_v45 = vpop.f32.mrb[27].mxu0 }
 0x130   : > { %v6326_v21 = vpop.f32.mrb[26].mxu1  ;;  %v1795_v52 = vmax.bf16 %v1731_v8, %v1667_v9 }
 0x131   : > { %7653 = vst [vmem:[#allocation16_spill] sm:$0xff] %v6326_v21  ;;  %v6330_v20 = vpop.f32.mrb[27].mxu1 }
 0x132   : > { %v6312_v3 = vpop.f32.mrb[28].mxu0  ;;  %7654 = vst [vmem:[#allocation17_spill] sm:$0xff] %v6330_v20 }
 0x133   : > { %v6316_v24 = vpop.f32.mrb[29].mxu0 }
 0x134   : > { %2041 = vmatmul.mubr.bf16.gmra.mrb[88].mxu1 %v1794_v17  ;;  %v6339_v4 = vpop.f32.mrb[28].mxu1 }
 0x135   : > { %2050 = vmatprep.mubr.bf16.mxu1 %v7614_v51  ;;  %7655 = vst [vmem:[#allocation18_spill] sm:$0xff] %v6339_v4  ;;  %v6347_v31 = vpop.f32.mrb[29].mxu1 }
 0x136   : > { %v6328_v25 = vpop.f32.mrb[30].mxu0  ;;  %7656 = vst [vmem:[#allocation19_spill] sm:$0xff] %v6347_v31 }
 0x137   : > { %v6332_v12 = vpop.f32.mrb[31].mxu0 }
 0x138   : > { %v6359_v30 = vpop.f32.mrb[30].mxu1 }
 0x139   : > { %7657 = vst [vmem:[#allocation20_spill] sm:$0xff] %v6359_v30  ;;  %v6363_v8 = vpop.f32.mrb[31].mxu1  ;;  %v1797_v30 = vmax.bf16 %v1733_v39, %v1669_v19 }
 0x13a   : > { %v6345_v43 = vpop.f32.mrb[32].mxu0  ;;  %7658 = vst [vmem:[#allocation21_spill] sm:$0xff] %v6363_v8 }
 0x13b   : > { %v6349_v47 = vpop.f32.mrb[33].mxu0 }
 0x13c   : > { %2051 = vmatmul.mubr.bf16.gmra.mrb[92].mxu1 %v1795_v52  ;;  %v6372_v40 = vpop.f32.mrb[32].mxu1 }
 0x13d   : > { %2060 = vmatprep.mubr.bf16.mxu1 %v7614_v51  ;;  %7659 = vst [vmem:[#allocation22_spill] sm:$0xff] %v6372_v40  ;;  %v6380_v27 = vpop.f32.mrb[33].mxu1 }
 0x13e   : > { %v6361_v9 = vpop.f32.mrb[34].mxu0  ;;  %7660 = vst [vmem:[#allocation23_spill] sm:$0xff] %v6380_v27  ;;  %v7664_v27 = vpack.c.bf16 %v6252_v48, %v6256_v53  ;;  %v5591_v48 = vld [vmem:[%s7590_s5 + $0x68] sm:$0xff]  }
 0x13f   : > { %v6365_v57 = vpop.f32.mrb[35].mxu0  ;;  %3333 = vmatpush1.bf16.msra.mxu0 %v5591_v48 }
 0x140   : > { %v6392_v60 = vpop.f32.mrb[34].mxu1  ;;  %v1670_v40 = vadd.bf16 %v6152_v28, %v7664_v27  ;;  %3334 = vmatprep.subr.bf16.mxu0 %v7614_v51 }
 0x141   : > { %7661 = vst [vmem:[#allocation24_spill] sm:$0xff] %v6392_v60  ;;  %v6396_v32 = vpop.f32.mrb[35].mxu1 }
 0x142   : > { %v6378_v56 = vpop.f32.mrb[36].mxu0  ;;  %7662 = vst [vmem:[#allocation25_spill] sm:$0xff] %v6396_v32  ;;  %v1734_v19 = vmul.bf16 1009007652, %v1670_v40 }
 0x143   : > { %v6382_v31 = vpop.f32.mrb[37].mxu0 }
 0x144   : > { %2061 = vmatmul.mubr.bf16.gmra.mrb[96].mxu1 %v1796_v5  ;;  %v6405_v17 = vpop.f32.mrb[36].mxu1  ;;  %v1798_v60 = vmax.bf16 %v1734_v19, %v1670_v40 }
 0x145   : > { %2070 = vmatprep.mubr.bf16.mxu1 %v7614_v51  ;;  %7663 = vst [vmem:[#allocation26_spill] sm:$0xff] %v6405_v17  ;;  %v6413_v36 = vpop.f32.mrb[37].mxu1 }
 0x146   : > { %v6394_v42 = vpop.f32.mrb[38].mxu0  ;;  %7665 = vst [vmem:[#allocation27_spill] sm:$0xff] %v6413_v36  ;;  %v7669_v36 = vpack.c.bf16 %v6268_v62, %v6272_v1  ;;  %v5592_v62 = vld [vmem:[%s7590_s5 + $0x70] sm:$0xff]  }
 0x147   : > { %v6398_v8 = vpop.f32.mrb[39].mxu0  ;;  %3335 = vmatpush1.bf16.msra.mxu0 %v5592_v62 }
 0x148   : > { %v6425_v53 = vpop.f32.mrb[38].mxu1  ;;  %v1671_v17 = vadd.bf16 %v6152_v28, %v7669_v36  ;;  %3336 = vmatprep.subr.bf16.mxu0 %v7614_v51 }
 0x149   : > { %7666 = vst [vmem:[#allocation28_spill] sm:$0xff] %v6425_v53  ;;  %v6429_v39 = vpop.f32.mrb[39].mxu1 }
 0x14a   : > { %v6411_v4 = vpop.f32.mrb[40].mxu0  ;;  %7667 = vst [vmem:[#allocation29_spill] sm:$0xff] %v6429_v39  ;;  %v1735_v1 = vmul.bf16 1009007652, %v1671_v17 }
 0x14b   : > { %v6415_v20 = vpop.f32.mrb[41].mxu0 }
 0x14c   : > { %2071 = vmatmul.mubr.bf16.gmra.mrb[100].mxu1 %v1797_v30  ;;  %v6438_v52 = vpop.f32.mrb[40].mxu1  ;;  %v1799_v55 = vmax.bf16 %v1735_v1, %v1671_v17 }
 0x14d   : > { %2080 = vmatprep.mubr.bf16.mxu1 %v7614_v51  ;;  %7668 = vst [vmem:[#allocation30_spill] sm:$0xff] %v6438_v52  ;;  %v6444_v21 = vpop.f32.mrb[41].mxu1  ;;  %v7674_v52 = vpack.c.bf16 %v6282_v11, %v6286_v16 }
 0x14e   : > { %v6427_v27 = vpop.f32.mrb[42].mxu0  ;;  %7670 = vst [vmem:[#allocation31_spill] sm:$0xff] %v6444_v21 }
 0x14f   : > { %v6431_v32 = vpop.f32.mrb[43].mxu0  ;;  %v1672_v53 = vadd.bf16 %v6152_v28, %v7674_v52 }
 0x150   : > { %v6458_v40 = vpop.f32.mrb[42].mxu1 }
 0x151   : > { %7671 = vst [vmem:[#allocation32_spill] sm:$0xff] %v6458_v40  ;;  %v6460_v36 = vpop.f32.mrb[43].mxu1  ;;  %v1736_v11 = vmul.bf16 1009007652, %v1672_v53 }
 0x152   : > { %v6446_v48 = vpop.f32.mrb[44].mxu0  ;;  %7672 = vst [vmem:[#allocation33_spill] sm:$0xff] %v6460_v36 }
 0x153   : > { %v6450_v39 = vpop.f32.mrb[45].mxu0 }
 0x154   : > { %2081 = vmatmul.mubr.bf16.gmra.mrb[104].mxu1 %v1798_v60  ;;  %v6471_v21 = vpop.f32.mrb[44].mxu1  ;;  %v7685_v60 = vpack.c.bf16 %v6312_v3, %v6316_v24 }
 0x155   : > { %2090 = vmatprep.mubr.bf16.mxu1 %v7614_v51  ;;  %7673 = vst [vmem:[#allocation34_spill] sm:$0xff] %v6471_v21  ;;  %v6477_v61 = vpop.f32.mrb[45].mxu1  ;;  %v1800_v21 = vmax.bf16 %v1736_v11, %v1672_v53 }
 0x156   : > { %v6462_v19 = vpop.f32.mrb[46].mxu0  ;;  %7675 = vst [vmem:[#allocation35_spill] sm:$0xff] %v6477_v61 }
 0x157   : > { %v6466_v30 = vpop.f32.mrb[47].mxu0 }
 0x158   : > { %v6488_v40 = vpop.f32.mrb[46].mxu1 }
 0x159   : > { %7676 = vst [vmem:[#allocation36_spill] sm:$0xff] %v6488_v40  ;;  %v6490_v16 = vpop.f32.mrb[47].mxu1 }
 0x15a   : > { %v6479_v62 = vpop.f32.mrb[48].mxu0  ;;  %7677 = vst [vmem:[#allocation37_spill] sm:$0xff] %v6490_v16 }
 0x15b   : > { %v6483_v36 = vpop.f32.mrb[49].mxu0 }
 0x15c   : > { %2091 = vmatmul.mubr.bf16.gmra.mrb[108].mxu1 %v1799_v55  ;;  %v5593_v55 = vld [vmem:[%s7590_s5 + $0x78] sm:$0xff]   ;;  %v6503_v5 = vpop.f32.mrb[48].mxu1 }
 0x15d   : > { %2100 = vmatprep.mubr.bf16.mxu1 %v7614_v51  ;;  %7678 = vst [vmem:[#allocation38_spill] sm:$0xff] %v6503_v5  ;;  %3337 = vmatpush1.bf16.msra.mxu0 %v5593_v55  ;;  %v7679_v51 = vpack.c.bf16 %v6298_v33, %v6302_v45  ;;  %v6509_v35 = vpop.f32.mrb[49].mxu1  ;;  %v7681_v55 = vmov 0  }
 0x15e   : > { %v6492_v17 = vpop.f32.mrb[50].mxu0  ;;  %7680 = vst [vmem:[#allocation39_spill] sm:$0xff] %v6509_v35  ;;  %v1674_v35 = vadd.bf16 %v6152_v28, %v7685_v60 }
 0x15f   : > { %v6496_v1 = vpop.f32.mrb[51].mxu0  ;;  %v1673_v61 = vadd.bf16 %v6152_v28, %v7679_v51 }
 0x160   : > { %v6520_v13 = vpop.f32.mrb[50].mxu1  ;;  %v1738_v3 = vmul.bf16 1009007652, %v1674_v35 }
 0x161   : > { %7682 = vst [vmem:[#allocation40_spill] sm:$0xff] %v6520_v13  ;;  %v1737_v33 = vmul.bf16 1009007652, %v1673_v61  ;;  %v6522_v51 = vpop.f32.mrb[51].mxu1 }
 0x162   : > { %v6511_v52 = vpop.f32.mrb[52].mxu0  ;;  %7683 = vst [vmem:[#allocation41_spill] sm:$0xff] %v6522_v51 }
 0x163   : > { %v6515_v40 = vpop.f32.mrb[53].mxu0  ;;  %v1801_v5 = vmax.bf16 %v1737_v33, %v1673_v61 }
 0x164   : > { %2101 = vmatmul.mubr.bf16.gmra.mrb[112].mxu1 %v1800_v21  ;;  %v6532_v16 = vpop.f32.mrb[52].mxu1  ;;  %v7690_v21 = vpack.c.bf16 %v6328_v25, %v6332_v12 }
 0x165   : > { %2110 = vmatprep.mubr.bf16.mxu1 %v7681_v55  ;;  %7684 = vst [vmem:[#allocation42_spill] sm:$0xff] %v6532_v16  ;;  %v6538_v14 = vpop.f32.mrb[53].mxu1  ;;  %v1802_v16 = vmax.bf16 %v1738_v3, %v1674_v35 }
 0x166   : > { %v6524_v45 = vpop.f32.mrb[54].mxu0  ;;  %7686 = vst [vmem:[#allocation43_spill] sm:$0xff] %v6538_v14  ;;  %v1675_v14 = vadd.bf16 %v6152_v28, %v7690_v21 }
 0x167   : > { %v6528_v11 = vpop.f32.mrb[55].mxu0 }
 0x168   : > { %v6549_v13 = vpop.f32.mrb[54].mxu1  ;;  %v1739_v12 = vmul.bf16 1009007652, %v1675_v14 }
 0x169   : > { %7687 = vst [vmem:[#allocation44_spill] sm:$0xff] %v6549_v13  ;;  %v6551_v24 = vpop.f32.mrb[55].mxu1 }
 0x16a   : > { %v6540_v7 = vpop.f32.mrb[56].mxu0  ;;  %7688 = vst [vmem:[#allocation45_spill] sm:$0xff] %v6551_v24 }
 0x16b   : > { %v6544_v51 = vpop.f32.mrb[57].mxu0 }
 0x16c   : > { %2111 = vmatmul.mubr.bf16.gmra.mrb[116].mxu1 %v1801_v5  ;;  %v6561_v53 = vpop.f32.mrb[56].mxu1  ;;  %v7694_v5 = vpack.c.bf16 %v6345_v43, %v6349_v47  ;;  %v7695_v43 = vpack.c.bf16 %v6361_v9, %v6365_v57  ;;  %v7697_v57 = vpack.c.bf16 %v6394_v42, %v6398_v8  ;;  %v7699_v8 = vpack.c.bf16 %v6427_v27, %v6431_v32 }
 0x16d   : > { %2120 = vmatprep.mubr.bf16.mxu1 %v7681_v55  ;;  %7689 = vst [vmem:[#allocation46_spill] sm:$0xff] %v6561_v53  ;;  %v6567_v0 = vpop.f32.mrb[57].mxu1  ;;  %v1803_v53 = vmax.bf16 %v1739_v12, %v1675_v14  ;;  %v7701_v32 = vpack.c.bf16 %v6462_v19, %v6466_v30  ;;  %v7703_v30 = vpack.c.bf16 %v6492_v17, %v6496_v1  ;;  %v5132_v17 = vld.sshfl [vmem:[%s7589_s4] sm:$0x11 pattern:$0x75316420] }
 0x16e   : > { %v6553_v61 = vpop.f32.mrb[58].mxu0  ;;  %7691 = vst [vmem:[#allocation47_spill] sm:$0xff] %v6567_v0  ;;  %v1676_v0 = vadd.bf16 %v6152_v28, %v7694_v5  ;;  %v1677_v14 = vadd.bf16 %v6152_v28, %v7695_v43  ;;  %v7696_v5 = vpack.c.bf16 %v6378_v56, %v6382_v31  ;;  %v1679_v9 = vadd.bf16 %v6152_v28, %v7697_v57 }
 0x16f   : > { %v6557_v33 = vpop.f32.mrb[59].mxu0  ;;  %v7698_v56 = vpack.c.bf16 %v6411_v4, %v6415_v20  ;;  %v1681_v42 = vadd.bf16 %v6152_v28, %v7699_v8  ;;  %v7700_v4 = vpack.c.bf16 %v6446_v48, %v6450_v39  ;;  %v1683_v27 = vadd.bf16 %v6152_v28, %v7701_v32 }
 0x170   : > { %v6578_v13 = vpop.f32.mrb[58].mxu1  ;;  %v1678_v12 = vadd.bf16 %v6152_v28, %v7696_v5  ;;  %v7702_v39 = vpack.c.bf16 %v6479_v62, %v6483_v36  ;;  %v1685_v19 = vadd.bf16 %v6152_v28, %v7703_v30  ;;  %v7704_v62 = vpack.c.bf16 %v6511_v52, %v6515_v40 }
 0x171   : > { %7692 = vst [vmem:[#allocation48_spill] sm:$0xff] %v6578_v13  ;;  %v6580_v25 = vpop.f32.mrb[59].mxu1  ;;  %v1680_v31 = vadd.bf16 %v6152_v28, %v7698_v56  ;;  %v1682_v20 = vadd.bf16 %v6152_v28, %v7700_v4  ;;  %v2758_v8 = vcombine.high %v5132_v17, %v5132_v17  ;;  %v7705_v4 = vpack.c.bf16 %v6524_v45, %v6528_v11 }
 0x172   : > { %v6569_v59 = vpop.f32.mrb[60].mxu0  ;;  %7693 = vst [vmem:[#allocation49_spill] sm:$0xff] %v6580_v25  ;;  %v1740_v25 = vmul.bf16 1009007652, %v1676_v0  ;;  %v1742_v13 = vmul.bf16 1009007652, %v1678_v12  ;;  %v1684_v48 = vadd.bf16 %v6152_v28, %v7702_v39  ;;  %v7706_v45 = vpack.c.bf16 %v6540_v7, %v6544_v51 }
 0x173   : > { %v6573_v24 = vpop.f32.mrb[61].mxu0  ;;  %v1687_v40 = vadd.bf16 %v6152_v28, %v7705_v4 }
 0x174   : > { %2121 = vmatmul.mubr.bf16.gmra.mrb[120].mxu1 %v1802_v16  ;;  %v6590_v60 = vpop.f32.mrb[60].mxu1  ;;  %v1804_v47 = vmax.bf16 %v1740_v25, %v1676_v0  ;;  %v1806_v0 = vmax.bf16 %v1742_v13, %v1678_v12  ;;  %v1743_v25 = vmul.bf16 1009007652, %v1679_v9  ;;  %v1747_v12 = vmul.bf16 1009007652, %v1683_v27 }
 0x175   : > { %2130 = vmatprep.mubr.bf16.mxu1 %v7681_v55  ;;  %v6596_v50 = vpop.f32.mrb[61].mxu1  ;;  %v1688_v11 = vadd.bf16 %v6152_v28, %v7706_v45 }
 0x176   : > { %v6582_v35 = vpop.f32.mrb[62].mxu0  ;;  %v1807_v43 = vmax.bf16 %v1743_v25, %v1679_v9  ;;  %v1811_v57 = vmax.bf16 %v1747_v12, %v1683_v27  ;;  %v1748_v9 = vmul.bf16 1009007652, %v1684_v48  ;;  %v5695_v25 = vmov 1966171168  }
 0x177   : > { %v6586_v3 = vpop.f32.mrb[63].mxu0  ;;  %v2760_v56 = vunpack.c.l.s4 %v5695_v25 }
 0x178   : > { %v6601_v21 = vpop.f32.mrb[62].mxu1 }
 0x179   : > { %v6603_v16 = vpop.f32.mrb[63].mxu1  ;;  %v2761_v36 = vunpack.c.0.s8 %v2760_v56  ;;  %v1752_v56 = vmul.bf16 1009007652, %v1688_v11 }
 0x17b   : > { %v2764_v1 = vsub.s32 %v2761_v36, %v6139_v22 }
 0x17c   : > { %2131 = vmatmul.mubr.bf16.gmra.mrb[124].mxu1 %v1803_v53  ;;  %v1741_v53 = vmul.bf16 1009007652, %v1677_v14 }
 0x17d   : > { %2140 = vmatprep.mubr.bf16.mxu1 %v7681_v55 }
 0x17e   : > { %v1805_v44 = vmax.bf16 %v1741_v53, %v1677_v14  ;;  %v1745_v14 = vmul.bf16 1009007652, %v1681_v42  ;;  %v1746_v53 = vmul.bf16 1009007652, %v1682_v20 }
 0x180   : > { %v1810_v5 = vmax.bf16 %v1746_v53, %v1682_v20  ;;  %v1751_v53 = vmul.bf16 1009007652, %v1687_v40 }
 0x184   : > { %2141 = vmatmul.mubr.bf16.gmra.mrb[128].mxu1 %v1804_v47  ;;  %v1809_v47 = vmax.bf16 %v1745_v14, %v1681_v42  ;;  %v2772_v14 = vrot.slane %v2758_v8, %v2764_v1  ;;  %v1816_v8 = vmax.bf16 %v1752_v56, %v1688_v11 }
 0x185   : > { %2150 = vmatprep.mubr.bf16.mxu1 %v7681_v55 }
 0x18c   : > { %2151 = vmatmul.mubr.bf16.gmra.mrb[132].mxu1 %v1805_v44  ;;  %v1744_v44 = vmul.bf16 1009007652, %v1680_v31 }
 0x18d   : > { %2160 = vmatprep.mubr.bf16.mxu1 %v7681_v55 }
 0x18e   : > { %v1808_v13 = vmax.bf16 %v1744_v44, %v1680_v31  ;;  %v1749_v31 = vmul.bf16 1009007652, %v1685_v19 }
 0x190   : > { %v1813_v44 = vmax.bf16 %v1749_v31, %v1685_v19 }
 0x194   : > { %2161 = vmatmul.mubr.bf16.gmra.mrb[136].mxu1 %v1806_v0  ;;  %v1812_v0 = vmax.bf16 %v1748_v9, %v1684_v48  ;;  %v1815_v9 = vmax.bf16 %v1751_v53, %v1687_v40  ;;  %v7708_v53 = vpack.c.bf16 %v6569_v59, %v6573_v24 }
 0x195   : > { %2170 = vmatprep.mubr.bf16.mxu1 %v7681_v55 }
 0x19c   : > { %2171 = vmatmul.mubr.bf16.gmra.mrb[140].mxu1 %v1807_v43  ;;  %v1686_v43 = vadd.bf16 %v6152_v28, %v7704_v62 }
 0x19d   : > { %2180 = vmatprep.mubr.bf16.mxu1 %v7681_v55 }
 0x19e   : > { %v1750_v42 = vmul.bf16 1009007652, %v1686_v43 }
 0x1a0   : > { %v1814_v52 = vmax.bf16 %v1750_v42, %v1686_v43  ;;  %v7707_v43 = vpack.c.bf16 %v6553_v61, %v6557_v33 }
 0x1a4   : > { %2181 = vmatmul.mubr.bf16.gmra.mrb[144].mxu1 %v1808_v13  ;;  %v2765_v13 = vrot.slane %v5132_v17, %v2764_v1 }
 0x1a5   : > { %2190 = vmatprep.mubr.bf16.mxu1 %v7681_v55 }
 0x1a6   : > { %v2774_v20 = vpack.i.b16 %v2765_v13, %v2765_v13 }
 0x1ac   : > { %2191 = vmatmul.mubr.bf16.gmra.mrb[148].mxu1 %v1809_v47  ;;  %v2781_v47 = vpack.i.b16 %v2772_v14, %v2772_v14 }
 0x1ad   : > { %2200 = vmatprep.mubr.bf16.mxu1 %v7681_v55 }
 0x1ae   : > { %v6670_v39 = vrot.slane %v2781_v47, %v6148_v26 }
 0x1b4   : > { %2201 = vmatmul.mubr.bf16.gmra.mrb[152].mxu1 %v1810_v5  ;;  %v6667_v5 = vrot.slane %v2774_v20, %v6148_v26 }
 0x1b5   : > { %2210 = vmatprep.mubr.bf16.mxu1 %v7681_v55 }
 0x1bc   : > { %2211 = vmatmul.mubr.bf16.gmra.mrb[156].mxu1 %v1811_v57 }
 0x1bd   : > { %2220 = vmatprep.mubr.bf16.mxu1 %v7681_v55 }
 0x1c4   : > { %2221 = vmatmul.mubr.bf16.gmra.mrb[160].mxu1 %v1812_v0 }
 0x1c5   : > { %2230 = vmatprep.mubr.bf16.mxu1 %v7681_v55 }
 0x1cc   : > { %2231 = vmatmul.mubr.bf16.gmra.mrb[164].mxu1 %v1813_v44  ;;  %v1689_v44 = vadd.bf16 %v6152_v28, %v7707_v43 }
 0x1cd   : > { %2240 = vmatprep.mubr.bf16.mxu1 %v7681_v55 }
 0x1ce   : > { %v1753_v40 = vmul.bf16 1009007652, %v1689_v44 }
 0x1d0   : > { %v1817_v45 = vmax.bf16 %v1753_v40, %v1689_v44 }
 0x1d4   : > { %2241 = vmatmul.mubr.bf16.gmra.mrb[168].mxu1 %v1814_v52 }
 0x1d5   : > { %2250 = vmatprep.mubr.bf16.mxu1 %v7681_v55 }
 0x1d7   : > { %v1982_v32 = vpop.f32.mrb[64].mxu1 }
 0x1d8   : > { %v1984_v27 = vpop.f32.mrb[65].mxu1 }
 0x1d9   : > { %v1986_v12 = vpop.f32.mrb[66].mxu1 }
 0x1da   : > { %v2621_v48 = vpack.c.bf16 %v1986_v12, %v1982_v32  ;;  %v1988_v57 = vpop.f32.mrb[67].mxu1  ;;  %v1690_v32 = vadd.bf16 %v6152_v28, %v7708_v53 }
 0x1db   : > { %v2622_v30 = vpack.c.bf16 %v1988_v57, %v1984_v27 }
 0x1dc   : > { %v2787_v19 = vadd.bf16 %v6667_v5, %v2621_v48  ;;  %2251 = vmatmul.mubr.bf16.gmra.mrb[172].mxu1 %v1815_v9 }
 0x1dd   : > { %v2788_v0 = vadd.bf16 %v6670_v39, %v2622_v30  ;;  %2260 = vmatprep.mubr.bf16.mxu1 %v7681_v55 }
 0x1de   : > { %v2915_v25 = vmul.bf16 1009007652, %v2787_v19 }
 0x1df   : > { %v2916_v26 = vmul.bf16 1009007652, %v2788_v0  ;;  %v1992_v31 = vpop.f32.mrb[68].mxu1 }
 0x1e0   : > { %v1994_v36 = vpop.f32.mrb[69].mxu1  ;;  %v3043_v51 = vmax.bf16 %v2915_v25, %v2787_v19  ;;  %v1754_v19 = vmul.bf16 1009007652, %v1690_v32 }
 0x1e1   : > { %v1996_v62 = vpop.f32.mrb[70].mxu1  ;;  %v3044_v7 = vmax.bf16 %v2916_v26, %v2788_v0  ;;  %v7709_v26 = vpack.c.bf16 %v6582_v35, %v6586_v3 }
 0x1e2   : > { %v2623_v17 = vpack.c.bf16 %v1996_v62, %v1992_v31  ;;  %v1998_v1 = vpop.f32.mrb[71].mxu1 }
 0x1e3   : > { %v2624_v42 = vpack.c.bf16 %v1998_v1, %v1994_v36  ;;  %3338 = vmatprep.mubr.bf16.mxu0 %v3044_v7  ;;  %v1691_v31 = vadd.bf16 %v6152_v28, %v7709_v26  ;;  %v1818_v7 = vmax.bf16 %v1754_v19, %v1690_v32 }
 0x1e4   : > { %v2789_v13 = vadd.bf16 %v6667_v5, %v2623_v17  ;;  %2261 = vmatmul.mubr.bf16.gmra.mrb[176].mxu1 %v1816_v8  ;;  %3339 = vmatmul.mubr.bf16.vlgmr.msra.gmra.mrb[64].mxu0 %v3043_v51 }
 0x1e5   : > { %v2790_v14 = vadd.bf16 %v6670_v39, %v2624_v42  ;;  %2270 = vmatprep.mubr.bf16.mxu1 %v7681_v55  ;;  %v1755_v8 = vmul.bf16 1009007652, %v1691_v31 }
 0x1e6   : > { %v2917_v4 = vmul.bf16 1009007652, %v2789_v13 }
 0x1e7   : > { %v2918_v52 = vmul.bf16 1009007652, %v2790_v14  ;;  %v2002_v20 = vpop.f32.mrb[72].mxu1 }
 0x1e8   : > { %v2004_v61 = vpop.f32.mrb[73].mxu1  ;;  %v3045_v11 = vmax.bf16 %v2917_v4, %v2789_v13  ;;  %v7710_v4 = vpack.c.bf16 %v6159_v37, %v6162_v41 }
 0x1e9   : > { %v2006_v33 = vpop.f32.mrb[74].mxu1  ;;  %v3046_v47 = vmax.bf16 %v2918_v52, %v2790_v14 }
 0x1ea   : > { %v2625_v27 = vpack.c.bf16 %v2006_v33, %v2002_v20  ;;  %v2008_v12 = vpop.f32.mrb[75].mxu1  ;;  %v1692_v40 = vadd.bf16 %v6152_v28, %v7710_v4 }
 0x1eb   : > { %v2626_v48 = vpack.c.bf16 %v2008_v12, %v2004_v61  ;;  %3346 = vmatprep.mubr.bf16.mxu0 %v3046_v47  ;;  %v1819_v61 = vmax.bf16 %v1755_v8, %v1691_v31 }
 0x1ec   : > { %v2791_v57 = vadd.bf16 %v6667_v5, %v2625_v27  ;;  %2271 = vmatmul.mubr.bf16.gmra.mrb[180].mxu1 %v1817_v45  ;;  %3347 = vmatmul.mubr.bf16.gmra.mrb[68].mxu0 %v3045_v11  ;;  %v1756_v12 = vmul.bf16 1009007652, %v1692_v40 }
 0x1ed   : > { %v2792_v9 = vadd.bf16 %v6670_v39, %v2626_v48  ;;  %2280 = vmatprep.mubr.bf16.mxu1 %v7681_v55 }
 0x1ee   : > { %v2919_v30 = vmul.bf16 1009007652, %v2791_v57 }
 0x1ef   : > { %v2920_v0 = vmul.bf16 1009007652, %v2792_v9  ;;  %v2012_v59 = vpop.f32.mrb[76].mxu1 }
 0x1f0   : > { %v2014_v24 = vpop.f32.mrb[77].mxu1  ;;  %v3047_v51 = vmax.bf16 %v2919_v30, %v2791_v57  ;;  %v7711_v57 = vpack.c.bf16 %v6170_v46, %v6172_v49 }
 0x1f1   : > { %v2016_v25 = vpop.f32.mrb[78].mxu1  ;;  %v3048_v56 = vmax.bf16 %v2920_v0, %v2792_v9  ;;  %v1820_v0 = vmax.bf16 %v1756_v12, %v1692_v40 }
 0x1f2   : > { %v2627_v36 = vpack.c.bf16 %v2016_v25, %v2012_v59  ;;  %v2018_v62 = vpop.f32.mrb[79].mxu1  ;;  %v1693_v9 = vadd.bf16 %v6152_v28, %v7711_v57 }
 0x1f3   : > { %v2628_v43 = vpack.c.bf16 %v2018_v62, %v2014_v24  ;;  %3354 = vmatprep.mubr.bf16.mxu0 %v3048_v56 }
 0x1f4   : > { %v2793_v44 = vadd.bf16 %v6667_v5, %v2627_v36  ;;  %2281 = vmatmul.mubr.bf16.gmra.mrb[184].mxu1 %v1818_v7  ;;  %3355 = vmatmul.mubr.bf16.gmra.mrb[72].mxu0 %v3047_v51  ;;  %v1757_v31 = vmul.bf16 1009007652, %v1693_v9  ;;  %v7712_v51 = vpack.c.bf16 %v6177_v54, %v6180_v58 }
 0x1f5   : > { %v2794_v17 = vadd.bf16 %v6670_v39, %v2628_v43  ;;  %2290 = vmatprep.mubr.bf16.mxu1 %v7681_v55 }
 0x1f6   : > { %v2921_v1 = vmul.bf16 1009007652, %v2793_v44  ;;  %v1694_v43 = vadd.bf16 %v6152_v28, %v7712_v51 }
 0x1f7   : > { %v2922_v42 = vmul.bf16 1009007652, %v2794_v17  ;;  %v2022_v35 = vpop.f32.mrb[80].mxu1 }
 0x1f8   : > { %v2024_v3 = vpop.f32.mrb[81].mxu1  ;;  %v3049_v33 = vmax.bf16 %v2921_v1, %v2793_v44  ;;  %v1821_v1 = vmax.bf16 %v1757_v31, %v1693_v9  ;;  %v7714_v9 = vpack.c.bf16 %v6195_v6, %v6198_v10 }
 0x1f9   : > { %v2026_v13 = vpop.f32.mrb[82].mxu1  ;;  %v3050_v14 = vmax.bf16 %v2922_v42, %v2794_v17 }
 0x1fa   : > { %v2629_v52 = vpack.c.bf16 %v2026_v13, %v2022_v35  ;;  %v2028_v20 = vpop.f32.mrb[83].mxu1 }
 0x1fb   : > { %v2630_v47 = vpack.c.bf16 %v2028_v20, %v2024_v3  ;;  %3362 = vmatprep.mubr.bf16.mxu0 %v3050_v14  ;;  %v1758_v14 = vmul.bf16 1009007652, %v1694_v43  ;;  %v7713_v20 = vpack.c.bf16 %v6188_v63, %v6190_v2 }
 0x1fc   : > { %v2795_v53 = vadd.bf16 %v6667_v5, %v2629_v52  ;;  %2291 = vmatmul.mubr.bf16.gmra.mrb[188].mxu1 %v1819_v61  ;;  %3363 = vmatmul.mubr.bf16.gmra.mrb[76].mxu0 %v3049_v33 }
 0x1fd   : > { %v2796_v32 = vadd.bf16 %v6670_v39, %v2630_v47  ;;  %2300 = vmatprep.mubr.bf16.mxu1 %v7681_v55  ;;  %v1695_v61 = vadd.bf16 %v6152_v28, %v7713_v20 }
 0x1fe   : > { %v2923_v27 = vmul.bf16 1009007652, %v2795_v53 }
 0x1ff   : > { %v2924_v45 = vmul.bf16 1009007652, %v2796_v32  ;;  %v2032_v37 = vpop.f32.mrb[84].mxu1 }
 0x200   : > { %v2034_v41 = vpop.f32.mrb[85].mxu1  ;;  %v3051_v59 = vmax.bf16 %v2923_v27, %v2795_v53  ;;  %v1822_v53 = vmax.bf16 %v1758_v14, %v1694_v43 }
 0x201   : > { %v2036_v11 = vpop.f32.mrb[86].mxu1  ;;  %v3052_v48 = vmax.bf16 %v2924_v45, %v2796_v32 }
 0x202   : > { %v2631_v30 = vpack.c.bf16 %v2036_v11, %v2032_v37  ;;  %v2038_v19 = vpop.f32.mrb[87].mxu1 }
 0x203   : > { %v2632_v24 = vpack.c.bf16 %v2038_v19, %v2034_v41  ;;  %3370 = vmatprep.mubr.bf16.mxu0 %v3052_v48  ;;  %v1759_v41 = vmul.bf16 1009007652, %v1695_v61 }
 0x204   : > { %v2797_v25 = vadd.bf16 %v6667_v5, %v2631_v30  ;;  %2301 = vmatmul.mubr.bf16.gmra.mrb[192].mxu1 %v1820_v0  ;;  %3371 = vmatmul.mubr.bf16.gmra.mrb[80].mxu0 %v3051_v59  ;;  %v1696_v30 = vadd.bf16 %v6152_v28, %v7714_v9 }
 0x205   : > { %v2798_v56 = vadd.bf16 %v6670_v39, %v2632_v24  ;;  %2310 = vmatprep.mubr.bf16.mxu1 %v7681_v55  ;;  %v1823_v59 = vmax.bf16 %v1759_v41, %v1695_v61 }
 0x206   : > { %v2925_v26 = vmul.bf16 1009007652, %v2797_v25 }
 0x207   : > { %v2926_v36 = vmul.bf16 1009007652, %v2798_v56  ;;  %v2042_v46 = vpop.f32.mrb[88].mxu1 }
 0x208   : > { %v2044_v49 = vpop.f32.mrb[89].mxu1  ;;  %v3053_v8 = vmax.bf16 %v2925_v26, %v2797_v25 }
 0x209   : > { %v2046_v62 = vpop.f32.mrb[90].mxu1  ;;  %v3054_v7 = vmax.bf16 %v2926_v36, %v2798_v56  ;;  %v1760_v36 = vmul.bf16 1009007652, %v1696_v30 }
 0x20a   : > { %v2633_v44 = vpack.c.bf16 %v2046_v62, %v2042_v46  ;;  %v2048_v17 = vpop.f32.mrb[91].mxu1 }
 0x20b   : > { %v2634_v42 = vpack.c.bf16 %v2048_v17, %v2044_v49  ;;  %3378 = vmatprep.mubr.bf16.mxu0 %v3054_v7  ;;  %v7715_v7 = vpack.c.bf16 %v6206_v15, %v6210_v18  ;;  %v1824_v17 = vmax.bf16 %v1760_v36, %v1696_v30  ;;  %v7719_v36 = vld [vmem:[#allocation7_spill] sm:$0xff] }
 0x20c   : > { %v2799_v35 = vadd.bf16 %v6667_v5, %v2633_v44  ;;  %2311 = vmatmul.mubr.bf16.gmra.mrb[196].mxu1 %v1821_v1  ;;  %3379 = vmatmul.mubr.bf16.gmra.mrb[84].mxu0 %v3053_v8 }
 0x20d   : > { %v2800_v3 = vadd.bf16 %v6670_v39, %v2634_v42  ;;  %2320 = vmatprep.mubr.bf16.mxu1 %v7681_v55  ;;  %v1697_v51 = vadd.bf16 %v6152_v28, %v7715_v7 }
 0x20e   : > { %v2927_v13 = vmul.bf16 1009007652, %v2799_v35 }
 0x20f   : > { %v2928_v4 = vmul.bf16 1009007652, %v2800_v3  ;;  %v2052_v54 = vpop.f32.mrb[92].mxu1 }
 0x210   : > { %v2054_v58 = vpop.f32.mrb[93].mxu1  ;;  %v3055_v32 = vmax.bf16 %v2927_v13, %v2799_v35  ;;  %v1761_v13 = vmul.bf16 1009007652, %v1697_v51 }
 0x211   : > { %v2056_v40 = vpop.f32.mrb[94].mxu1  ;;  %v3056_v52 = vmax.bf16 %v2928_v4, %v2800_v3 }
 0x212   : > { %v2635_v33 = vpack.c.bf16 %v2056_v40, %v2052_v54  ;;  %v2058_v47 = vpop.f32.mrb[95].mxu1  ;;  %v1825_v61 = vmax.bf16 %v1761_v13, %v1697_v51 }
 0x213   : > { %v2636_v27 = vpack.c.bf16 %v2058_v47, %v2054_v58  ;;  %3386 = vmatprep.mubr.bf16.mxu0 %v3056_v52  ;;  %v7716_v58 = vpack.c.bf16 %v6219_v23, %v6224_v29 }
 0x214   : > { %v2801_v12 = vadd.bf16 %v6667_v5, %v2635_v33  ;;  %2321 = vmatmul.mubr.bf16.gmra.mrb[200].mxu1 %v1822_v53  ;;  %3387 = vmatmul.mubr.bf16.gmra.mrb[88].mxu0 %v3055_v32 }
 0x215   : > { %v2802_v45 = vadd.bf16 %v6670_v39, %v2636_v27  ;;  %2330 = vmatprep.mubr.bf16.mxu1 %v7681_v55  ;;  %v1698_v40 = vadd.bf16 %v6152_v28, %v7716_v58 }
 0x216   : > { %v2929_v37 = vmul.bf16 1009007652, %v2801_v12 }
 0x217   : > { %v2930_v11 = vmul.bf16 1009007652, %v2802_v45  ;;  %v2062_v63 = vpop.f32.mrb[96].mxu1 }
 0x218   : > { %v2064_v2 = vpop.f32.mrb[97].mxu1  ;;  %v3057_v24 = vmax.bf16 %v2929_v37, %v2801_v12  ;;  %v1762_v12 = vmul.bf16 1009007652, %v1698_v40 }
 0x219   : > { %v2066_v48 = vpop.f32.mrb[98].mxu1  ;;  %v3058_v57 = vmax.bf16 %v2930_v11, %v2802_v45  ;;  %v7717_v11 = vpack.c.bf16 %v6236_v34, %v6240_v38 }
 0x21a   : > { %v2637_v19 = vpack.c.bf16 %v2066_v48, %v2062_v63  ;;  %v2068_v0 = vpop.f32.mrb[99].mxu1 }
 0x21b   : > { %v2638_v25 = vpack.c.bf16 %v2068_v0, %v2064_v2  ;;  %3394 = vmatprep.mubr.bf16.mxu0 %v3058_v57  ;;  %v1699_v63 = vadd.bf16 %v6152_v28, %v7717_v11  ;;  %v1826_v57 = vmax.bf16 %v1762_v12, %v1698_v40 }
 0x21c   : > { %v2803_v56 = vadd.bf16 %v6667_v5, %v2637_v19  ;;  %2331 = vmatmul.mubr.bf16.gmra.mrb[204].mxu1 %v1823_v59  ;;  %3395 = vmatmul.mubr.bf16.gmra.mrb[92].mxu0 %v3057_v24 }
 0x21d   : > { %v2804_v26 = vadd.bf16 %v6670_v39, %v2638_v25  ;;  %2340 = vmatprep.mubr.bf16.mxu1 %v7681_v55  ;;  %v1763_v24 = vmul.bf16 1009007652, %v1699_v63 }
 0x21e   : > { %v2931_v31 = vmul.bf16 1009007652, %v2803_v56 }
 0x21f   : > { %v2932_v46 = vmul.bf16 1009007652, %v2804_v26  ;;  %v2072_v6 = vpop.f32.mrb[100].mxu1 }
 0x220   : > { %v2074_v10 = vpop.f32.mrb[101].mxu1  ;;  %v3059_v1 = vmax.bf16 %v2931_v31, %v2803_v56  ;;  %v7718_v31 = vld [vmem:[#allocation6_spill] sm:$0xff] }
 0x221   : > { %v2076_v49 = vpop.f32.mrb[102].mxu1  ;;  %v3060_v62 = vmax.bf16 %v2932_v46, %v2804_v26  ;;  %v7720_v46 = vpack.c.bf16 %v7718_v31, %v7719_v36  ;;  %v7728_v31 = vld [vmem:[#allocation13_spill] sm:$0xff] }
 0x222   : > { %v2639_v43 = vpack.c.bf16 %v2076_v49, %v2072_v6  ;;  %v2078_v44 = vpop.f32.mrb[103].mxu1 }
 0x223   : > { %v2640_v8 = vpack.c.bf16 %v2078_v44, %v2074_v10  ;;  %3402 = vmatprep.mubr.bf16.mxu0 %v3060_v62  ;;  %v1700_v6 = vadd.bf16 %v6152_v28, %v7720_v46  ;;  %v1827_v62 = vmax.bf16 %v1763_v24, %v1699_v63 }
 0x224   : > { %v2805_v42 = vadd.bf16 %v6667_v5, %v2639_v43  ;;  %2341 = vmatmul.mubr.bf16.gmra.mrb[208].mxu1 %v1824_v17  ;;  %3403 = vmatmul.mubr.bf16.gmra.mrb[96].mxu0 %v3059_v1 }
 0x225   : > { %v2806_v35 = vadd.bf16 %v6670_v39, %v2640_v8  ;;  %2350 = vmatprep.mubr.bf16.mxu1 %v7681_v55  ;;  %v1764_v1 = vmul.bf16 1009007652, %v1700_v6 }
 0x226   : > { %v2933_v3 = vmul.bf16 1009007652, %v2805_v42 }
 0x227   : > { %v2934_v14 = vmul.bf16 1009007652, %v2806_v35  ;;  %v2082_v15 = vpop.f32.mrb[104].mxu1  ;;  %v1828_v40 = vmax.bf16 %v1764_v1, %v1700_v6 }
 0x228   : > { %v2084_v18 = vpop.f32.mrb[105].mxu1  ;;  %v3061_v33 = vmax.bf16 %v2933_v3, %v2805_v42 }
 0x229   : > { %v2086_v4 = vpop.f32.mrb[106].mxu1  ;;  %v3062_v54 = vmax.bf16 %v2934_v14, %v2806_v35  ;;  %v7721_v14 = vld [vmem:[#allocation8_spill] sm:$0xff] }
 0x22a   : > { %v2641_v52 = vpack.c.bf16 %v2086_v4, %v2082_v15  ;;  %v2088_v20 = vpop.f32.mrb[107].mxu1  ;;  %v7722_v15 = vld [vmem:[#allocation9_spill] sm:$0xff] }
 0x22b   : > { %v2642_v47 = vpack.c.bf16 %v2088_v20, %v2084_v18  ;;  %3410 = vmatprep.mubr.bf16.mxu0 %v3062_v54  ;;  %v7723_v18 = vpack.c.bf16 %v7721_v14, %v7722_v15  ;;  %v7731_v14 = vld [vmem:[#allocation15_spill] sm:$0xff] }
 0x22c   : > { %v2807_v53 = vadd.bf16 %v6667_v5, %v2641_v52  ;;  %2351 = vmatmul.mubr.bf16.gmra.mrb[212].mxu1 %v1825_v61  ;;  %3411 = vmatmul.mubr.bf16.gmra.mrb[100].mxu0 %v3061_v33 }
 0x22d   : > { %v2808_v32 = vadd.bf16 %v6670_v39, %v2642_v47  ;;  %2360 = vmatprep.mubr.bf16.mxu1 %v7681_v55  ;;  %v1701_v4 = vadd.bf16 %v6152_v28, %v7723_v18 }
 0x22e   : > { %v2935_v27 = vmul.bf16 1009007652, %v2807_v53 }
 0x22f   : > { %v2936_v45 = vmul.bf16 1009007652, %v2808_v32  ;;  %v2092_v23 = vpop.f32.mrb[108].mxu1 }
 0x230   : > { %v2094_v29 = vpop.f32.mrb[109].mxu1  ;;  %v3063_v9 = vmax.bf16 %v2935_v27, %v2807_v53  ;;  %v1765_v53 = vmul.bf16 1009007652, %v1701_v4 }
 0x231   : > { %v2096_v37 = vpop.f32.mrb[110].mxu1  ;;  %v3064_v41 = vmax.bf16 %v2936_v45, %v2808_v32 }
 0x232   : > { %v2643_v2 = vpack.c.bf16 %v2096_v37, %v2092_v23  ;;  %v2098_v48 = vpop.f32.mrb[111].mxu1  ;;  %v7725_v37 = vld [vmem:[#allocation11_spill] sm:$0xff] }
 0x233   : > { %v2644_v30 = vpack.c.bf16 %v2098_v48, %v2094_v29  ;;  %3418 = vmatprep.mubr.bf16.mxu0 %v3064_v41  ;;  %v7724_v29 = vld [vmem:[#allocation10_spill] sm:$0xff]  ;;  %v1829_v48 = vmax.bf16 %v1765_v53, %v1701_v4 }
 0x234   : > { %v2809_v19 = vadd.bf16 %v6667_v5, %v2643_v2  ;;  %2361 = vmatmul.mubr.bf16.gmra.mrb[216].mxu1 %v1826_v57  ;;  %3419 = vmatmul.mubr.bf16.gmra.mrb[104].mxu0 %v3063_v9  ;;  %v7726_v41 = vpack.c.bf16 %v7724_v29, %v7725_v37  ;;  %v7734_v29 = vld [vmem:[#allocation17_spill] sm:$0xff] }
 0x235   : > { %v2810_v0 = vadd.bf16 %v6670_v39, %v2644_v30  ;;  %2370 = vmatprep.mubr.bf16.mxu1 %v7681_v55 }
 0x236   : > { %v2937_v59 = vmul.bf16 1009007652, %v2809_v19  ;;  %v1702_v11 = vadd.bf16 %v6152_v28, %v7726_v41 }
 0x237   : > { %v2938_v25 = vmul.bf16 1009007652, %v2810_v0  ;;  %v2102_v34 = vpop.f32.mrb[112].mxu1 }
 0x238   : > { %v2104_v38 = vpop.f32.mrb[113].mxu1  ;;  %v3065_v7 = vmax.bf16 %v2937_v59, %v2809_v19  ;;  %v1766_v59 = vmul.bf16 1009007652, %v1702_v11 }
 0x239   : > { %v2106_v56 = vpop.f32.mrb[114].mxu1  ;;  %v3066_v26 = vmax.bf16 %v2938_v25, %v2810_v0 }
 0x23a   : > { %v2645_v10 = vpack.c.bf16 %v2106_v56, %v2102_v34  ;;  %v2108_v49 = vpop.f32.mrb[115].mxu1 }
 0x23b   : > { %v2646_v51 = vpack.c.bf16 %v2108_v49, %v2104_v38  ;;  %3426 = vmatprep.mubr.bf16.mxu0 %v3066_v26  ;;  %v7727_v26 = vld [vmem:[#allocation12_spill] sm:$0xff]  ;;  %v1830_v49 = vmax.bf16 %v1766_v59, %v1702_v11 }
 0x23c   : > { %v2811_v43 = vadd.bf16 %v6667_v5, %v2645_v10  ;;  %2371 = vmatmul.mubr.bf16.gmra.mrb[220].mxu1 %v1827_v62  ;;  %3427 = vmatmul.mubr.bf16.gmra.mrb[108].mxu0 %v3065_v7  ;;  %v7729_v36 = vpack.c.bf16 %v7727_v26, %v7728_v31  ;;  %v7737_v26 = vld [vmem:[#allocation19_spill] sm:$0xff] }
 0x23d   : > { %v2812_v44 = vadd.bf16 %v6670_v39, %v2646_v51  ;;  %2380 = vmatprep.mubr.bf16.mxu1 %v7681_v55 }
 0x23e   : > { %v2939_v17 = vmul.bf16 1009007652, %v2811_v43  ;;  %v1703_v46 = vadd.bf16 %v6152_v28, %v7729_v36 }
 0x23f   : > { %v2940_v8 = vmul.bf16 1009007652, %v2812_v44  ;;  %v2112_v42 = vpop.f32.mrb[116].mxu1 }
 0x240   : > { %v2114_v35 = vpop.f32.mrb[117].mxu1  ;;  %v3067_v52 = vmax.bf16 %v2939_v17, %v2811_v43  ;;  %v1767_v17 = vmul.bf16 1009007652, %v1703_v46 }
 0x241   : > { %v2116_v3 = vpop.f32.mrb[118].mxu1  ;;  %v3068_v13 = vmax.bf16 %v2940_v8, %v2812_v44 }
 0x242   : > { %v2647_v54 = vpack.c.bf16 %v2116_v3, %v2112_v42  ;;  %v2118_v58 = vpop.f32.mrb[119].mxu1 }
 0x243   : > { %v2648_v20 = vpack.c.bf16 %v2118_v58, %v2114_v35  ;;  %3434 = vmatprep.mubr.bf16.mxu0 %v3068_v13  ;;  %v7730_v13 = vld [vmem:[#allocation14_spill] sm:$0xff]  ;;  %v1831_v58 = vmax.bf16 %v1767_v17, %v1703_v46 }
 0x244   : > { %v2813_v61 = vadd.bf16 %v6667_v5, %v2647_v54  ;;  %2381 = vmatmul.mubr.bf16.gmra.mrb[224].mxu1 %v1828_v40  ;;  %3435 = vmatmul.mubr.bf16.gmra.mrb[112].mxu0 %v3067_v52  ;;  %v7732_v15 = vpack.c.bf16 %v7730_v13, %v7731_v14  ;;  %v7740_v13 = vld [vmem:[#allocation21_spill] sm:$0xff] }
 0x245   : > { %v2814_v33 = vadd.bf16 %v6670_v39, %v2648_v20  ;;  %2390 = vmatprep.mubr.bf16.mxu1 %v7681_v55 }
 0x246   : > { %v2941_v47 = vmul.bf16 1009007652, %v2813_v61  ;;  %v1704_v18 = vadd.bf16 %v6152_v28, %v7732_v15 }
 0x247   : > { %v2942_v32 = vmul.bf16 1009007652, %v2814_v33  ;;  %v2122_v27 = vpop.f32.mrb[120].mxu1 }
 0x248   : > { %v2124_v12 = vpop.f32.mrb[121].mxu1  ;;  %v3069_v57 = vmax.bf16 %v2941_v47, %v2813_v61  ;;  %v1768_v47 = vmul.bf16 1009007652, %v1704_v18 }
 0x249   : > { %v2126_v45 = vpop.f32.mrb[122].mxu1  ;;  %v3070_v23 = vmax.bf16 %v2942_v32, %v2814_v33 }
 0x24a   : > { %v2649_v63 = vpack.c.bf16 %v2126_v45, %v2122_v27  ;;  %v2128_v2 = vpop.f32.mrb[123].mxu1 }
 0x24b   : > { %v2650_v9 = vpack.c.bf16 %v2128_v2, %v2124_v12  ;;  %3442 = vmatprep.mubr.bf16.mxu0 %v3070_v23  ;;  %v7733_v23 = vld [vmem:[#allocation16_spill] sm:$0xff]  ;;  %v1832_v2 = vmax.bf16 %v1768_v47, %v1704_v18 }
 0x24c   : > { %v2815_v30 = vadd.bf16 %v6667_v5, %v2649_v63  ;;  %2391 = vmatmul.mubr.bf16.gmra.mrb[228].mxu1 %v1829_v48  ;;  %3443 = vmatmul.mubr.bf16.gmra.mrb[116].mxu0 %v3069_v57  ;;  %v7735_v37 = vpack.c.bf16 %v7733_v23, %v7734_v29  ;;  %v7743_v23 = vld [vmem:[#allocation23_spill] sm:$0xff] }
 0x24d   : > { %v2816_v19 = vadd.bf16 %v6670_v39, %v2650_v9  ;;  %2400 = vmatprep.mubr.bf16.mxu1 %v7681_v55 }
 0x24e   : > { %v2943_v0 = vmul.bf16 1009007652, %v2815_v30  ;;  %v1705_v41 = vadd.bf16 %v6152_v28, %v7735_v37 }
 0x24f   : > { %v2944_v24 = vmul.bf16 1009007652, %v2816_v19  ;;  %v2132_v25 = vpop.f32.mrb[124].mxu1 }
 0x250   : > { %v2134_v34 = vpop.f32.mrb[125].mxu1  ;;  %v3071_v62 = vmax.bf16 %v2943_v0, %v2815_v30  ;;  %v1769_v0 = vmul.bf16 1009007652, %v1705_v41 }
 0x251   : > { %v2136_v38 = vpop.f32.mrb[126].mxu1  ;;  %v3072_v56 = vmax.bf16 %v2944_v24, %v2816_v19 }
 0x252   : > { %v2651_v6 = vpack.c.bf16 %v2136_v38, %v2132_v25  ;;  %v2138_v10 = vpop.f32.mrb[127].mxu1 }
 0x253   : > { %v2652_v7 = vpack.c.bf16 %v2138_v10, %v2134_v34  ;;  %3450 = vmatprep.mubr.bf16.mxu0 %v3072_v56  ;;  %v7736_v56 = vld [vmem:[#allocation18_spill] sm:$0xff]  ;;  %v1833_v10 = vmax.bf16 %v1769_v0, %v1705_v41 }
 0x254   : > { %v2817_v51 = vadd.bf16 %v6667_v5, %v2651_v6  ;;  %2401 = vmatmul.mubr.bf16.gmra.mrb[232].mxu1 %v1830_v49  ;;  %3451 = vmatmul.mubr.bf16.gmra.mrb[120].mxu0 %v3071_v62  ;;  %v7738_v31 = vpack.c.bf16 %v7736_v56, %v7737_v26  ;;  %v7745_v56 = vld [vmem:[#allocation24_spill] sm:$0xff]  ;;  %v7746_v26 = vld [vmem:[#allocation25_spill] sm:$0xff] }
 0x255   : > { %v2818_v43 = vadd.bf16 %v6670_v39, %v2652_v7  ;;  %2410 = vmatprep.mubr.bf16.mxu1 %v7681_v55 }
 0x256   : > { %v2945_v44 = vmul.bf16 1009007652, %v2817_v51  ;;  %v1706_v36 = vadd.bf16 %v6152_v28, %v7738_v31  ;;  %v7747_v31 = vpack.c.bf16 %v7745_v56, %v7746_v26  ;;  %v7755_v56 = vld [vmem:[#allocation31_spill] sm:$0xff] }
 0x257   : > { %v2946_v1 = vmul.bf16 1009007652, %v2818_v43  ;;  %v2142_v8 = vpop.f32.mrb[128].mxu1 }
 0x258   : > { %v2144_v42 = vpop.f32.mrb[129].mxu1  ;;  %v3073_v40 = vmax.bf16 %v2945_v44, %v2817_v51  ;;  %v1770_v44 = vmul.bf16 1009007652, %v1706_v36 }
 0x259   : > { %v2146_v35 = vpop.f32.mrb[130].mxu1  ;;  %v3074_v3 = vmax.bf16 %v2946_v1, %v2818_v43 }
 0x25a   : > { %v2653_v4 = vpack.c.bf16 %v2146_v35, %v2142_v8  ;;  %v2148_v54 = vpop.f32.mrb[131].mxu1 }
 0x25b   : > { %v2654_v52 = vpack.c.bf16 %v2148_v54, %v2144_v42  ;;  %3458 = vmatprep.mubr.bf16.mxu0 %v3074_v3  ;;  %v7739_v3 = vld [vmem:[#allocation20_spill] sm:$0xff]  ;;  %v1834_v54 = vmax.bf16 %v1770_v44, %v1706_v36  ;;  %v1709_v36 = vadd.bf16 %v6152_v28, %v7747_v31 }
 0x25c   : > { %v2819_v20 = vadd.bf16 %v6667_v5, %v2653_v4  ;;  %2411 = vmatmul.mubr.bf16.gmra.mrb[236].mxu1 %v1831_v58  ;;  %3459 = vmatmul.mubr.bf16.gmra.mrb[124].mxu0 %v3073_v40  ;;  %v7741_v14 = vpack.c.bf16 %v7739_v3, %v7740_v13  ;;  %v7748_v3 = vld [vmem:[#allocation26_spill] sm:$0xff]  ;;  %v7749_v13 = vld [vmem:[#allocation27_spill] sm:$0xff] }
 0x25d   : > { %v2820_v61 = vadd.bf16 %v6670_v39, %v2654_v52  ;;  %2420 = vmatprep.mubr.bf16.mxu1 %v7681_v55 }
 0x25e   : > { %v2947_v33 = vmul.bf16 1009007652, %v2819_v20  ;;  %v1707_v15 = vadd.bf16 %v6152_v28, %v7741_v14  ;;  %v7750_v14 = vpack.c.bf16 %v7748_v3, %v7749_v13  ;;  %v7758_v3 = vld [vmem:[#allocation33_spill] sm:$0xff] }
 0x25f   : > { %v2948_v53 = vmul.bf16 1009007652, %v2820_v61  ;;  %v2152_v32 = vpop.f32.mrb[132].mxu1 }
 0x260   : > { %v2154_v27 = vpop.f32.mrb[133].mxu1  ;;  %v3075_v48 = vmax.bf16 %v2947_v33, %v2819_v20  ;;  %v1771_v33 = vmul.bf16 1009007652, %v1707_v15 }
 0x261   : > { %v2156_v12 = vpop.f32.mrb[134].mxu1  ;;  %v3076_v45 = vmax.bf16 %v2948_v53, %v2820_v61 }
 0x262   : > { %v2655_v11 = vpack.c.bf16 %v2156_v12, %v2152_v32  ;;  %v2158_v63 = vpop.f32.mrb[135].mxu1 }
 0x263   : > { %v2656_v57 = vpack.c.bf16 %v2158_v63, %v2154_v27  ;;  %3466 = vmatprep.mubr.bf16.mxu0 %v3076_v45  ;;  %v7742_v45 = vld [vmem:[#allocation22_spill] sm:$0xff]  ;;  %v1835_v63 = vmax.bf16 %v1771_v33, %v1707_v15  ;;  %v1710_v15 = vadd.bf16 %v6152_v28, %v7750_v14 }
 0x264   : > { %v2821_v9 = vadd.bf16 %v6667_v5, %v2655_v11  ;;  %2421 = vmatmul.mubr.bf16.gmra.mrb[240].mxu1 %v1832_v2  ;;  %3467 = vmatmul.mubr.bf16.gmra.mrb[128].mxu0 %v3075_v48  ;;  %v7744_v29 = vpack.c.bf16 %v7742_v45, %v7743_v23  ;;  %v7751_v45 = vld [vmem:[#allocation28_spill] sm:$0xff]  ;;  %v7752_v23 = vld [vmem:[#allocation29_spill] sm:$0xff] }
 0x265   : > { %v2822_v30 = vadd.bf16 %v6670_v39, %v2656_v57  ;;  %2430 = vmatprep.mubr.bf16.mxu1 %v7681_v55 }
 0x266   : > { %v2949_v19 = vmul.bf16 1009007652, %v2821_v9  ;;  %v1708_v37 = vadd.bf16 %v6152_v28, %v7744_v29  ;;  %v7753_v29 = vpack.c.bf16 %v7751_v45, %v7752_v23  ;;  %v7761_v45 = vld [vmem:[#allocation35_spill] sm:$0xff] }
 0x267   : > { %v2950_v59 = vmul.bf16 1009007652, %v2822_v30  ;;  %v2162_v24 = vpop.f32.mrb[136].mxu1 }
 0x268   : > { %v2164_v25 = vpop.f32.mrb[137].mxu1  ;;  %v3077_v49 = vmax.bf16 %v2949_v19, %v2821_v9 }
 0x269   : > { %v2166_v34 = vpop.f32.mrb[138].mxu1  ;;  %v3078_v38 = vmax.bf16 %v2950_v59, %v2822_v30  ;;  %v1772_v30 = vmul.bf16 1009007652, %v1708_v37 }
 0x26a   : > { %v2657_v46 = vpack.c.bf16 %v2166_v34, %v2162_v24  ;;  %v2168_v6 = vpop.f32.mrb[139].mxu1 }
 0x26b   : > { %v2658_v62 = vpack.c.bf16 %v2168_v6, %v2164_v25  ;;  %3474 = vmatprep.mubr.bf16.mxu0 %v3078_v38  ;;  %v1836_v38 = vmax.bf16 %v1772_v30, %v1708_v37  ;;  %v1711_v37 = vadd.bf16 %v6152_v28, %v7753_v29 }
 0x26c   : > { %v2823_v7 = vadd.bf16 %v6667_v5, %v2657_v46  ;;  %2431 = vmatmul.mubr.bf16.gmra.mrb[244].mxu1 %v1833_v10  ;;  %3475 = vmatmul.mubr.bf16.gmra.mrb[132].mxu0 %v3077_v49 }
 0x26d   : > { %v2824_v51 = vadd.bf16 %v6670_v39, %v2658_v62  ;;  %2440 = vmatprep.mubr.bf16.mxu1 %v7681_v55 }
 0x26e   : > { %v2951_v43 = vmul.bf16 1009007652, %v2823_v7 }
 0x26f   : > { %v2952_v17 = vmul.bf16 1009007652, %v2824_v51  ;;  %v2172_v1 = vpop.f32.mrb[140].mxu1 }
 0x270   : > { %v2174_v8 = vpop.f32.mrb[141].mxu1  ;;  %v3079_v58 = vmax.bf16 %v2951_v43, %v2823_v7 }
 0x271   : > { %v2176_v42 = vpop.f32.mrb[142].mxu1  ;;  %v3080_v35 = vmax.bf16 %v2952_v17, %v2824_v51  ;;  %v1773_v51 = vmul.bf16 1009007652, %v1709_v36 }
 0x272   : > { %v2659_v18 = vpack.c.bf16 %v2176_v42, %v2172_v1  ;;  %v2178_v4 = vpop.f32.mrb[143].mxu1 }
 0x273   : > { %v2660_v40 = vpack.c.bf16 %v2178_v4, %v2174_v8  ;;  %3482 = vmatprep.mubr.bf16.mxu0 %v3080_v35  ;;  %v1837_v35 = vmax.bf16 %v1773_v51, %v1709_v36 }
 0x274   : > { %v2825_v52 = vadd.bf16 %v6667_v5, %v2659_v18  ;;  %2441 = vmatmul.mubr.bf16.gmra.mrb[248].mxu1 %v1834_v54  ;;  %3483 = vmatmul.mubr.bf16.gmra.mrb[136].mxu0 %v3079_v58 }
 0x275   : > { %v2826_v20 = vadd.bf16 %v6670_v39, %v2660_v40  ;;  %2450 = vmatprep.mubr.bf16.mxu1 %v7681_v55 }
 0x276   : > { %v2953_v61 = vmul.bf16 1009007652, %v2825_v52 }
 0x277   : > { %v2954_v47 = vmul.bf16 1009007652, %v2826_v20  ;;  %v2182_v53 = vpop.f32.mrb[144].mxu1 }
 0x278   : > { %v2184_v32 = vpop.f32.mrb[145].mxu1  ;;  %v3081_v2 = vmax.bf16 %v2953_v61, %v2825_v52 }
 0x279   : > { %v2186_v27 = vpop.f32.mrb[146].mxu1  ;;  %v3082_v12 = vmax.bf16 %v2954_v47, %v2826_v20  ;;  %v1774_v20 = vmul.bf16 1009007652, %v1710_v15 }
 0x27a   : > { %v2661_v41 = vpack.c.bf16 %v2186_v27, %v2182_v53  ;;  %v2188_v11 = vpop.f32.mrb[147].mxu1 }
 0x27b   : > { %v2662_v48 = vpack.c.bf16 %v2188_v11, %v2184_v32  ;;  %3490 = vmatprep.mubr.bf16.mxu0 %v3082_v12  ;;  %v1838_v12 = vmax.bf16 %v1774_v20, %v1710_v15 }
 0x27c   : > { %v2827_v57 = vadd.bf16 %v6667_v5, %v2661_v41  ;;  %2451 = vmatmul.mubr.bf16.gmra.mrb[252].mxu1 %v1835_v63  ;;  %3491 = vmatmul.mubr.bf16.gmra.mrb[140].mxu0 %v3081_v2 }
 0x27d   : > { %v2828_v9 = vadd.bf16 %v6670_v39, %v2662_v48  ;;  %2460 = vmatprep.mubr.bf16.mxu1 %v7681_v55 }
 0x27e   : > { %v2955_v19 = vmul.bf16 1009007652, %v2827_v57 }
 0x27f   : > { %v2956_v0 = vmul.bf16 1009007652, %v2828_v9  ;;  %v2192_v59 = vpop.f32.mrb[148].mxu1 }
 0x280   : > { %v2194_v24 = vpop.f32.mrb[149].mxu1  ;;  %v3083_v10 = vmax.bf16 %v2955_v19, %v2827_v57 }
 0x281   : > { %v2196_v25 = vpop.f32.mrb[150].mxu1  ;;  %v3084_v34 = vmax.bf16 %v2956_v0, %v2828_v9  ;;  %v1775_v9 = vmul.bf16 1009007652, %v1711_v37 }
 0x282   : > { %v2663_v46 = vpack.c.bf16 %v2196_v25, %v2192_v59  ;;  %v2198_v6 = vpop.f32.mrb[151].mxu1 }
 0x283   : > { %v2664_v49 = vpack.c.bf16 %v2198_v6, %v2194_v24  ;;  %3498 = vmatprep.mubr.bf16.mxu0 %v3084_v34  ;;  %v1839_v34 = vmax.bf16 %v1775_v9, %v1711_v37 }
 0x284   : > { %v2829_v62 = vadd.bf16 %v6667_v5, %v2663_v46  ;;  %2461 = vmatmul.mubr.bf16.gmra.mrb[0].mxu1 %v1836_v38  ;;  %3499 = vmatmul.mubr.bf16.gmra.mrb[144].mxu0 %v3083_v10  ;;  %v7754_v38 = vld [vmem:[#allocation30_spill] sm:$0xff] }
 0x285   : > { %v2830_v7 = vadd.bf16 %v6670_v39, %v2664_v49  ;;  %2470 = vmatprep.mubr.bf16.mxu1 %v7681_v55  ;;  %v7756_v26 = vpack.c.bf16 %v7754_v38, %v7755_v56  ;;  %v7764_v38 = vld [vmem:[#allocation37_spill] sm:$0xff] }
 0x286   : > { %v2957_v43 = vmul.bf16 1009007652, %v2829_v62 }
 0x287   : > { %v2958_v44 = vmul.bf16 1009007652, %v2830_v7  ;;  %v2202_v17 = vpop.f32.mrb[152].mxu1  ;;  %v1712_v31 = vadd.bf16 %v6152_v28, %v7756_v26 }
 0x288   : > { %v2204_v1 = vpop.f32.mrb[153].mxu1  ;;  %v3085_v54 = vmax.bf16 %v2957_v43, %v2829_v62 }
 0x289   : > { %v2206_v8 = vpop.f32.mrb[154].mxu1  ;;  %v3086_v42 = vmax.bf16 %v2958_v44, %v2830_v7  ;;  %v1776_v7 = vmul.bf16 1009007652, %v1712_v31 }
 0x28a   : > { %v2665_v18 = vpack.c.bf16 %v2206_v8, %v2202_v17  ;;  %v2208_v4 = vpop.f32.mrb[155].mxu1 }
 0x28b   : > { %v2666_v58 = vpack.c.bf16 %v2208_v4, %v2204_v1  ;;  %3506 = vmatprep.mubr.bf16.mxu0 %v3086_v42  ;;  %v1840_v42 = vmax.bf16 %v1776_v7, %v1712_v31 }
 0x28c   : > { %v2831_v40 = vadd.bf16 %v6667_v5, %v2665_v18  ;;  %2471 = vmatmul.mubr.bf16.gmra.mrb[4].mxu1 %v1837_v35  ;;  %3507 = vmatmul.mubr.bf16.gmra.mrb[148].mxu0 %v3085_v54  ;;  %v7757_v35 = vld [vmem:[#allocation32_spill] sm:$0xff] }
 0x28d   : > { %v2832_v52 = vadd.bf16 %v6670_v39, %v2666_v58  ;;  %2480 = vmatprep.mubr.bf16.mxu1 %v7681_v55  ;;  %v7759_v13 = vpack.c.bf16 %v7757_v35, %v7758_v3  ;;  %v3857_v3 = vadd.s32 16, %v6139_v22 }
 0x28e   : > { %v2959_v61 = vmul.bf16 1009007652, %v2831_v40 }
 0x28f   : > { %v2960_v33 = vmul.bf16 1009007652, %v2832_v52  ;;  %v2212_v47 = vpop.f32.mrb[156].mxu1  ;;  %v1713_v14 = vadd.bf16 %v6152_v28, %v7759_v13  ;;  %v6875_v13 = vstv %s5150_s21  ;;  %s4904_s21 = sshll.u32 %s5818_s12, 4  ;;  %s7531_s21 = int_to_ptr.vmem [resolvable:$true] %s4904_s21 }
 0x290   : > { %v2214_v53 = vpop.f32.mrb[157].mxu1  ;;  %v3087_v63 = vmax.bf16 %v2959_v61, %v2831_v40  ;;  %s5597_s16 = scalar_lea.vmem %s7531_s21, 16  ;;  %p5604_p6 = scmp.lt.s32.totalorder %s7531_s21, %s5602_s10 }
 0x291   : > { %v2216_v32 = vpop.f32.mrb[158].mxu1  ;;  %v3088_v27 = vmax.bf16 %v2960_v33, %v2832_v52  ;;  %v1777_v52 = vmul.bf16 1009007652, %v1713_v14  ;;  %p5598_p2 = scmp.ne.s32.totalorder %s7531_s21, %s5597_s16  ;;  %p5605_p7 = scmp.lt.s32.totalorder %s5603_s15, %s5597_s16 }
 0x292   : > { %v2667_v41 = vpack.c.bf16 %v2216_v32, %v2212_v47  ;;  %v2218_v11 = vpop.f32.mrb[159].mxu1 }
 0x293   : > { %v2668_v2 = vpack.c.bf16 %v2218_v11, %v2214_v53  ;;  %3514 = vmatprep.mubr.bf16.mxu0 %v3088_v27  ;;  %v1841_v27 = vmax.bf16 %v1777_v52, %v1713_v14  ;;  %p5599_p4 = pnand %p5598_p2, %p5786_p3  ;;  %p5606_p8 = por %p5605_p7, %p5604_p6 }
 0x294   : > { %v2833_v48 = vadd.bf16 %v6667_v5, %v2667_v41  ;;  %2481 = vmatmul.mubr.bf16.gmra.mrb[8].mxu1 %v1838_v12  ;;  %3515 = vmatmul.mubr.bf16.gmra.mrb[152].mxu0 %v3087_v63  ;;  %v7760_v12 = vld [vmem:[#allocation34_spill] sm:$0xff] }
 0x295   : > { %v2834_v57 = vadd.bf16 %v6670_v39, %v2668_v2  ;;  %2490 = vmatprep.mubr.bf16.mxu1 %v7681_v55  ;;  %v7762_v23 = vpack.c.bf16 %v7760_v12, %v7761_v45  ;;  %p5600_p5 = pneg %p5599_p4 }
 0x296   : > { %v2961_v30 = vmul.bf16 1009007652, %v2833_v48 }
 0x297   : > { %v2962_v19 = vmul.bf16 1009007652, %v2834_v57  ;;  %v2222_v0 = vpop.f32.mrb[160].mxu1  ;;  %v1714_v29 = vadd.bf16 %v6152_v28, %v7762_v23  ;;  %v6886_v23 = vld [vmem:[%s7591_s6] ss:$0 sm:$0xff]  ;;  %p5607_p10 = pnand %p5606_p8, %p5600_p5 }
 0x298   : > { %v2224_v59 = vpop.f32.mrb[161].mxu1  ;;  %v3089_v6 = vmax.bf16 %v2961_v30, %v2833_v48 }
 0x299   : > { %v2226_v24 = vpop.f32.mrb[162].mxu1  ;;  %v3090_v25 = vmax.bf16 %v2962_v19, %v2834_v57  ;;  %v1778_v57 = vmul.bf16 1009007652, %v1714_v29 }
 0x29a   : > { %v2669_v36 = vpack.c.bf16 %v2226_v24, %v2222_v0  ;;  %v2228_v46 = vpop.f32.mrb[163].mxu1 }
 0x29b   : > { %v2670_v10 = vpack.c.bf16 %v2228_v46, %v2224_v59  ;;  %3522 = vmatprep.mubr.bf16.mxu0 %v3090_v25  ;;  %v1842_v25 = vmax.bf16 %v1778_v57, %v1714_v29 }
 0x29c   : > { %v2835_v49 = vadd.bf16 %v6667_v5, %v2669_v36  ;;  %2491 = vmatmul.mubr.bf16.gmra.mrb[12].mxu1 %v1839_v34  ;;  %3523 = vmatmul.mubr.bf16.gmra.mrb[156].mxu0 %v3089_v6  ;;  %v7763_v34 = vld [vmem:[#allocation36_spill] sm:$0xff] }
 0x29d   : > { %v2836_v62 = vadd.bf16 %v6670_v39, %v2670_v10  ;;  %2500 = vmatprep.mubr.bf16.mxu1 %v7681_v55  ;;  %v7765_v56 = vpack.c.bf16 %v7763_v34, %v7764_v38 }
 0x29e   : > { %v2963_v51 = vmul.bf16 1009007652, %v2835_v49 }
 0x29f   : > { %v2964_v43 = vmul.bf16 1009007652, %v2836_v62  ;;  %v2232_v44 = vpop.f32.mrb[164].mxu1  ;;  %v1715_v26 = vadd.bf16 %v6152_v28, %v7765_v56 }
 0x2a0   : > { %v2234_v17 = vpop.f32.mrb[165].mxu1  ;;  %v3091_v4 = vmax.bf16 %v2963_v51, %v2835_v49 }
 0x2a1   : > { %v2236_v1 = vpop.f32.mrb[166].mxu1  ;;  %v3092_v8 = vmax.bf16 %v2964_v43, %v2836_v62  ;;  %v3856_v62 = vadd.s32 8, %v6139_v22  ;;  %v1779_v7 = vmul.bf16 1009007652, %v1715_v26  ;;  %v7766_v43 = vld [vmem:[#allocation38_spill] sm:$0xff] }
 0x2a2   : > { %v2671_v15 = vpack.c.bf16 %v2236_v1, %v2232_v44  ;;  %v2238_v18 = vpop.f32.mrb[167].mxu1  ;;  %v7767_v44 = vld [vmem:[#allocation39_spill] sm:$0xff] }
 0x2a3   : > { %v2672_v54 = vpack.c.bf16 %v2238_v18, %v2234_v17  ;;  %3530 = vmatprep.mubr.bf16.mxu0 %v3092_v8  ;;  %v7768_v17 = vpack.c.bf16 %v7766_v43, %v7767_v44  ;;  %v1843_v52 = vmax.bf16 %v1779_v7, %v1715_v26 }
 0x2a4   : > { %v2837_v58 = vadd.bf16 %v6667_v5, %v2671_v15  ;;  %2501 = vmatmul.mubr.bf16.gmra.mrb[16].mxu1 %v1840_v42  ;;  %3531 = vmatmul.mubr.bf16.gmra.mrb[160].mxu0 %v3091_v4 }
 0x2a5   : > { %v2838_v40 = vadd.bf16 %v6670_v39, %v2672_v54  ;;  %2510 = vmatprep.mubr.bf16.mxu1 %v7681_v55  ;;  %v1716_v1 = vadd.bf16 %v6152_v28, %v7768_v17  ;;  %v3985_v54 = vadd.s32 %v6875_v13, %v3856_v62 }
 0x2a6   : > { %v2965_v20 = vmul.bf16 1009007652, %v2837_v58 }
 0x2a7   : > { %v2966_v61 = vmul.bf16 1009007652, %v2838_v40  ;;  %v2242_v33 = vpop.f32.mrb[168].mxu1  ;;  %vm4113_vm2 = vcmp.lt.s32.totalorder %v3985_v54, 2500  ;;  %v3861_v54 = vadd.s32 48, %v6139_v22 }
 0x2a8   : > { %v2244_v47 = vpop.f32.mrb[169].mxu1  ;;  %v3093_v11 = vmax.bf16 %v2965_v20, %v2837_v58 }
 0x2a9   : > { %v2246_v53 = vpop.f32.mrb[170].mxu1  ;;  %v3094_v32 = vmax.bf16 %v2966_v61, %v2838_v40  ;;  %v3858_v40 = vadd.s32 24, %v6139_v22 }
 0x2aa   : > { %v2673_v37 = vpack.c.bf16 %v2246_v53, %v2242_v33  ;;  %v2248_v41 = vpop.f32.mrb[171].mxu1  ;;  %v1780_v53 = vmul.bf16 1009007652, %v1716_v1 }
 0x2ab   : > { %v2674_v63 = vpack.c.bf16 %v2248_v41, %v2244_v47  ;;  %3538 = vmatprep.mubr.bf16.mxu0 %v3094_v32  ;;  %v7769_v32 = vld [vmem:[#allocation40_spill] sm:$0xff]  ;;  %v3984_v41 = vadd.s32 %v6875_v13, %v6139_v22 }
 0x2ac   : > { %v2839_v2 = vadd.bf16 %v6667_v5, %v2673_v37  ;;  %2511 = vmatmul.mubr.bf16.gmra.mrb[20].mxu1 %v1841_v27  ;;  %3539 = vmatmul.mubr.bf16.gmra.mrb[164].mxu0 %v3093_v11  ;;  %v7770_v27 = vld [vmem:[#allocation41_spill] sm:$0xff]  ;;  %v3986_v37 = vadd.s32 %v6875_v13, %v3857_v3 }
 0x2ad   : > { %v2840_v48 = vadd.bf16 %v6670_v39, %v2674_v63  ;;  %2520 = vmatprep.mubr.bf16.mxu1 %v7681_v55  ;;  %v7771_v12 = vpack.c.bf16 %v7769_v32, %v7770_v27  ;;  %vm4112_vm4 = vcmp.lt.s32.totalorder %v3984_v41, 2500 }
 0x2ae   : > { %v2967_v9 = vmul.bf16 1009007652, %v2839_v2  ;;  %vm4114_vm3 = vcmp.lt.s32.totalorder %v3986_v37, 2500 }
 0x2af   : > { %v2968_v30 = vmul.bf16 1009007652, %v2840_v48  ;;  %v2252_v19 = vpop.f32.mrb[172].mxu1  ;;  %v1717_v45 = vadd.bf16 %v6152_v28, %v7771_v12 }
 0x2b0   : > { %v2254_v0 = vpop.f32.mrb[173].mxu1  ;;  %v3095_v46 = vmax.bf16 %v2967_v9, %v2839_v2  ;;  %v1844_v9 = vmax.bf16 %v1780_v53, %v1716_v1 }
 0x2b1   : > { %v2256_v59 = vpop.f32.mrb[174].mxu1  ;;  %v3096_v24 = vmax.bf16 %v2968_v30, %v2840_v48  ;;  %v3987_v48 = vadd.s32 %v6875_v13, %v3858_v40 }
 0x2b2   : > { %v2675_v31 = vpack.c.bf16 %v2256_v59, %v2252_v19  ;;  %v2258_v36 = vpop.f32.mrb[175].mxu1  ;;  %v3859_v59 = vadd.s32 32, %v6139_v22 }
 0x2b3   : > { %v2676_v6 = vpack.c.bf16 %v2258_v36, %v2254_v0  ;;  %3546 = vmatprep.mubr.bf16.mxu0 %v3096_v24  ;;  %v1781_v24 = vmul.bf16 1009007652, %v1717_v45  ;;  %vm4115_vm6 = vcmp.lt.s32.totalorder %v3987_v48, 2500  ;;  %v3990_v48 = vadd.s32 %v6875_v13, %v3861_v54 }
 0x2b4   : > { %v2841_v10 = vadd.bf16 %v6667_v5, %v2675_v31  ;;  %2521 = vmatmul.mubr.bf16.gmra.mrb[24].mxu1 %v1842_v25  ;;  %3547 = vmatmul.mubr.bf16.gmra.mrb[168].mxu0 %v3095_v46  ;;  %v3860_v46 = vadd.s32 40, %v6139_v22  ;;  %v3988_v1 = vadd.s32 %v6875_v13, %v3859_v59 }
 0x2b5   : > { %v2842_v49 = vadd.bf16 %v6670_v39, %v2676_v6  ;;  %2530 = vmatprep.mubr.bf16.mxu1 %v7681_v55  ;;  %vm4118_vm9 = vcmp.lt.s32.totalorder %v3990_v48, 2500 }
 0x2b6   : > { %v2969_v51 = vmul.bf16 1009007652, %v2841_v10  ;;  %vm4116_vm7 = vcmp.lt.s32.totalorder %v3988_v1, 2500 }
 0x2b7   : > { %v2970_v8 = vmul.bf16 1009007652, %v2842_v49  ;;  %v2262_v42 = vpop.f32.mrb[176].mxu1  ;;  %v3340_v35 = vpop.f32.mrb[64].mxu0 }
 0x2b8   : > { %v2264_v14 = vpop.f32.mrb[177].mxu1  ;;  %v3342_v15 = vpop.f32.mrb[65].mxu0  ;;  %v3097_v47 = vmax.bf16 %v2969_v51, %v2841_v10 }
 0x2b9   : > { %v2266_v18 = vpop.f32.mrb[178].mxu1  ;;  %v3343_v4 = vpop.f32.mrb[66].mxu0  ;;  %v3098_v58 = vmax.bf16 %v2970_v8, %v2842_v49  ;;  %v3341_v8 = vadd.f32 %v6886_v23, %v3340_v35 }
 0x2ba   : > { %v2677_v20 = vpack.c.bf16 %v2266_v18, %v2262_v42  ;;  %v2268_v61 = vpop.f32.mrb[179].mxu1  ;;  %v3345_v33 = vpop.f32.mrb[67].mxu0  ;;  %v3344_v63 = vadd.f32 %v6886_v23, %v3343_v4  ;;  %v3989_v4 = vadd.s32 %v6875_v13, %v3860_v46 }
 0x2bb   : > { %v2678_v29 = vpack.c.bf16 %v2268_v61, %v2264_v14  ;;  %3554 = vmatprep.mubr.bf16.mxu0 %v3098_v58  ;;  %v1845_v61 = vmax.bf16 %v1781_v24, %v1717_v45  ;;  %v7772_v33 = vld [vmem:[#allocation42_spill] sm:$0xff]  ;;  %v4496_v27 = vsel %vm4112_vm4, %v3341_v8, -inf }
 0x2bc   : > { %v2843_v11 = vadd.bf16 %v6667_v5, %v2677_v20  ;;  %2531 = vmatmul.mubr.bf16.gmra.mrb[28].mxu1 %v1843_v52  ;;  %3555 = vmatmul.mubr.bf16.gmra.mrb[172].mxu0 %v3097_v47  ;;  %v4497_v25 = vsel %vm4113_vm2, %v3344_v63, -inf  ;;  %v7773_v47 = vld [vmem:[#allocation43_spill] sm:$0xff]  ;;  %vm4117_vm8 = vcmp.lt.s32.totalorder %v3989_v4, 2500  ;;  %v4625_v59 = vsel %vm4624_vm5, %v4496_v27, -inf }
 0x2bd   : > { %v2844_v2 = vadd.bf16 %v6670_v39, %v2678_v29  ;;  %2540 = vmatprep.mubr.bf16.mxu1 %v7681_v55  ;;  %v4626_v43 = vsel %vm4624_vm5, %v4497_v25, -inf  ;;  %v7774_v53 = vpack.c.bf16 %v7772_v33, %v7773_v47 }
 0x2be   : > { %v2971_v57 = vmul.bf16 1009007652, %v2843_v11 }
 0x2bf   : > { %v2972_v30 = vmul.bf16 1009007652, %v2844_v2  ;;  %v2272_v19 = vpop.f32.mrb[180].mxu1  ;;  %v3348_v0 = vpop.f32.mrb[68].mxu0  ;;  %v1718_v32 = vadd.bf16 %v6152_v28, %v7774_v53 }
 0x2c0   : > { %v3349_v34 = vadd.f32 %v6886_v23, %v3348_v0  ;;  %v2274_v38 = vpop.f32.mrb[181].mxu1  ;;  %v3350_v56 = vpop.f32.mrb[69].mxu0  ;;  %v3099_v51 = vmax.bf16 %v2971_v57, %v2843_v11  ;;  %v3862_v57 = vadd.s32 56, %v6139_v22 }
 0x2c1   : > { %v2276_v26 = vpop.f32.mrb[182].mxu1  ;;  %v3351_v31 = vpop.f32.mrb[70].mxu0  ;;  %v3100_v36 = vmax.bf16 %v2972_v30, %v2844_v2 }
 0x2c2   : > { %v4498_v6 = vsel %vm4114_vm3, %v3349_v34, -inf  ;;  %v2679_v10 = vpack.c.bf16 %v2276_v26, %v2272_v19  ;;  %v3352_v49 = vadd.f32 %v6886_v23, %v3351_v31  ;;  %v2278_v62 = vpop.f32.mrb[183].mxu1  ;;  %v3353_v7 = vpop.f32.mrb[71].mxu0  ;;  %v1782_v34 = vmul.bf16 1009007652, %v1718_v32 }
 0x2c3   : > { %v4627_v44 = vsel %vm4624_vm5, %v4498_v6, -inf  ;;  %v2680_v17 = vpack.c.bf16 %v2278_v62, %v2274_v38  ;;  %3562 = vmatprep.mubr.bf16.mxu0 %v3100_v36  ;;  %v3991_v36 = vadd.s32 %v6875_v13, %v3862_v57 }
 0x2c4   : > { %v4632_v42 = vmax.f32 %v4626_v43, %v4627_v44  ;;  %v2845_v3 = vadd.bf16 %v6667_v5, %v2679_v10  ;;  %v4499_v14 = vsel %vm4115_vm6, %v3352_v49, -inf  ;;  %2541 = vmatmul.mubr.bf16.gmra.mrb[32].mxu1 %v1844_v9  ;;  %3563 = vmatmul.mubr.bf16.gmra.mrb[176].mxu0 %v3099_v51  ;;  %v3863_v51 = vadd.s32 64, %v6139_v22 }
 0x2c5   : > { %v4628_v15 = vsel %vm4624_vm5, %v4499_v14, -inf  ;;  %v2846_v18 = vadd.bf16 %v6670_v39, %v2680_v17  ;;  %2550 = vmatprep.mubr.bf16.mxu1 %v7681_v55  ;;  %v1846_v43 = vmax.bf16 %v1782_v34, %v1718_v32  ;;  %vm4119_vm10 = vcmp.lt.s32.totalorder %v3991_v36, 2500 }
 0x2c6   : > { %v2973_v58 = vmul.bf16 1009007652, %v2845_v3  ;;  %v4634_v40 = vmax.f32 %v4628_v15, %v4632_v42  ;;  %v7775_v42 = vld [vmem:[#allocation44_spill] sm:$0xff]  ;;  %v3992_v32 = vadd.s32 %v6875_v13, %v3863_v51 }
 0x2c7   : > { %v2974_v35 = vmul.bf16 1009007652, %v2846_v18  ;;  %v2282_v52 = vpop.f32.mrb[184].mxu1  ;;  %v3356_v20 = vpop.f32.mrb[72].mxu0 }
 0x2c8   : > { %v3357_v12 = vadd.f32 %v6886_v23, %v3356_v20  ;;  %v2284_v29 = vpop.f32.mrb[185].mxu1  ;;  %v3358_v37 = vpop.f32.mrb[73].mxu0  ;;  %v3101_v41 = vmax.bf16 %v2973_v58, %v2845_v3  ;;  %v7776_v3 = vld [vmem:[#allocation45_spill] sm:$0xff]  ;;  %v3864_v58 = vadd.s32 72, %v6139_v22  ;;  %vm4120_vm11 = vcmp.lt.s32.totalorder %v3992_v32, 2500 }
 0x2c9   : > { %v2286_v11 = vpop.f32.mrb[186].mxu1  ;;  %v3359_v63 = vpop.f32.mrb[74].mxu0  ;;  %v3102_v2 = vmax.bf16 %v2974_v35, %v2846_v18  ;;  %v7777_v14 = vpack.c.bf16 %v7775_v42, %v7776_v3  ;;  %v7782_v32 = vld [vmem:[#allocation49_spill] sm:$0xff] }
 0x2ca   : > { %v4500_v45 = vsel %vm4116_vm7, %v3357_v12, -inf  ;;  %v2681_v9 = vpack.c.bf16 %v2286_v11, %v2282_v52  ;;  %v3360_v30 = vadd.f32 %v6886_v23, %v3359_v63  ;;  %v2288_v19 = vpop.f32.mrb[187].mxu1  ;;  %v3361_v0 = vpop.f32.mrb[75].mxu0 }
 0x2cb   : > { %v4629_v24 = vsel %vm4624_vm5, %v4500_v45, -inf  ;;  %v2682_v25 = vpack.c.bf16 %v2288_v19, %v2284_v29  ;;  %3570 = vmatprep.mubr.bf16.mxu0 %v3102_v2  ;;  %v1719_v15 = vadd.bf16 %v6152_v28, %v7777_v14  ;;  %v3993_v2 = vadd.s32 %v6875_v13, %v3864_v58  ;;  %v7778_v0 = vld [vmem:[#allocation46_spill] sm:$0xff] }
 0x2cc   : > { %v4630_v38 = vmax.f32 %v4625_v59, %v4629_v24  ;;  %v2847_v56 = vadd.bf16 %v6667_v5, %v2681_v9  ;;  %v4501_v26 = vsel %vm4117_vm8, %v3360_v30, -inf  ;;  %2551 = vmatmul.mubr.bf16.gmra.mrb[36].mxu1 %v1845_v61  ;;  %3571 = vmatmul.mubr.bf16.gmra.mrb[180].mxu0 %v3101_v41  ;;  %v3865_v19 = vadd.s32 80, %v6139_v22  ;;  %v7779_v41 = vld [vmem:[#allocation47_spill] sm:$0xff] }
 0x2cd   : > { %v2848_v31 = vadd.bf16 %v6670_v39, %v2682_v25  ;;  %2560 = vmatprep.mubr.bf16.mxu1 %v7681_v55  ;;  %v4631_v10 = vsel %vm4624_vm5, %v4501_v26, -inf  ;;  %v1783_v37 = vmul.bf16 1009007652, %v1719_v15  ;;  %v7780_v59 = vpack.c.bf16 %v7778_v0, %v7779_v41 }
 0x2ce   : > { %v4636_v46 = vmax.f32 %v4630_v38, %v4634_v40  ;;  %v2975_v6 = vmul.bf16 1009007652, %v2847_v56  ;;  %vm4121_vm12 = vcmp.lt.s32.totalorder %v3993_v2, 2500 }
 0x2cf   : > { %v2976_v49 = vmul.bf16 1009007652, %v2848_v31  ;;  %v2292_v62 = vpop.f32.mrb[188].mxu1  ;;  %v3364_v7 = vpop.f32.mrb[76].mxu0  ;;  %v1720_v24 = vadd.bf16 %v6152_v28, %v7780_v59 }
 0x2d0   : > { %v4638_v44 = vmax.f32 %v4631_v10, %v4636_v46  ;;  %v3365_v17 = vadd.f32 %v6886_v23, %v3364_v7  ;;  %v2294_v1 = vpop.f32.mrb[189].mxu1  ;;  %v3366_v8 = vpop.f32.mrb[77].mxu0  ;;  %v3103_v33 = vmax.bf16 %v2975_v6, %v2847_v56  ;;  %v1847_v56 = vmax.bf16 %v1783_v37, %v1719_v15 }
 0x2d1   : > { %v2296_v18 = vpop.f32.mrb[190].mxu1  ;;  %v3367_v4 = vpop.f32.mrb[78].mxu0  ;;  %v3104_v54 = vmax.bf16 %v2976_v49, %v2848_v31  ;;  %v3866_v46 = vadd.s32 88, %v6139_v22 }
 0x2d2   : > { %v4502_v40 = vsel %vm4118_vm9, %v3365_v17, -inf  ;;  %v2683_v35 = vpack.c.bf16 %v2296_v18, %v2292_v62  ;;  %v3368_v52 = vadd.f32 %v6886_v23, %v3367_v4  ;;  %v2298_v20 = vpop.f32.mrb[191].mxu1  ;;  %v3369_v61 = vpop.f32.mrb[79].mxu0  ;;  %v3994_v17 = vadd.s32 %v6875_v13, %v3865_v19 }
 0x2d3   : > { %v4633_v47 = vsel %vm4624_vm5, %v4502_v40, -inf  ;;  %v2684_v53 = vpack.c.bf16 %v2298_v20, %v2294_v1  ;;  %3578 = vmatprep.mubr.bf16.mxu0 %v3104_v54  ;;  %v1784_v1 = vmul.bf16 1009007652, %v1720_v24  ;;  %v3995_v18 = vadd.s32 %v6875_v13, %v3866_v46 }
 0x2d4   : > { %v4640_v27 = vmax.f32 %v4633_v47, %v4638_v44  ;;  %v2849_v12 = vadd.bf16 %v6667_v5, %v2683_v35  ;;  %v4503_v29 = vsel %vm4119_vm10, %v3368_v52, -inf  ;;  %2561 = vmatmul.mubr.bf16.gmra.mrb[40].mxu1 %v1846_v43  ;;  %3579 = vmatmul.mubr.bf16.gmra.mrb[184].mxu0 %v3103_v33  ;;  %vm4122_vm13 = vcmp.lt.s32.totalorder %v3994_v17, 2500 }
 0x2d5   : > { %v4635_v11 = vsel %vm4624_vm5, %v4503_v29, -inf  ;;  %v2850_v63 = vadd.bf16 %v6670_v39, %v2684_v53  ;;  %2570 = vmatprep.mubr.bf16.mxu1 %v7681_v55  ;;  %v3867_v52 = vadd.s32 96, %v6139_v22  ;;  %v1848_v20 = vmax.bf16 %v1784_v1, %v1720_v24  ;;  %v7781_v53 = vld [vmem:[#allocation48_spill] sm:$0xff] }
 0x2d6   : > { %v2977_v48 = vmul.bf16 1009007652, %v2849_v12  ;;  %v4642_v57 = vmax.f32 %v4635_v11, %v4640_v27  ;;  %v7783_v27 = vpack.c.bf16 %v7781_v53, %v7782_v32  ;;  %vm4123_vm14 = vcmp.lt.s32.totalorder %v3995_v18, 2500 }
 0x2d7   : > { %v2978_v45 = vmul.bf16 1009007652, %v2850_v63  ;;  %v2302_v9 = vpop.f32.mrb[192].mxu1  ;;  %v3372_v30 = vpop.f32.mrb[80].mxu0  ;;  %v3996_v41 = vadd.s32 %v6875_v13, %v3867_v52 }
 0x2d8   : > { %v3373_v25 = vadd.f32 %v6886_v23, %v3372_v30  ;;  %v2304_v34 = vpop.f32.mrb[193].mxu1  ;;  %v3374_v38 = vpop.f32.mrb[81].mxu0  ;;  %v3105_v51 = vmax.bf16 %v2977_v48, %v2849_v12  ;;  %v1721_v12 = vadd.bf16 %v6152_v28, %v7783_v27 }
 0x2d9   : > { %v2306_v26 = vpop.f32.mrb[194].mxu1  ;;  %v3375_v31 = vpop.f32.mrb[82].mxu0  ;;  %v3106_v36 = vmax.bf16 %v2978_v45, %v2850_v63  ;;  %v3868_v63 = vadd.s32 104, %v6139_v22  ;;  %vm4124_vm15 = vcmp.lt.s32.totalorder %v3996_v41, 2500  ;;  %v3872_v41 = vadd.s32 136, %v6139_v22 }
 0x2da   : > { %v4504_v6 = vsel %vm4120_vm11, %v3373_v25, -inf  ;;  %v2685_v10 = vpack.c.bf16 %v2306_v26, %v2302_v9  ;;  %v3376_v49 = vadd.f32 %v6886_v23, %v3375_v31  ;;  %v2308_v62 = vpop.f32.mrb[195].mxu1  ;;  %v3377_v7 = vpop.f32.mrb[83].mxu0 }
 0x2db   : > { %v4637_v43 = vsel %vm4624_vm5, %v4504_v6, -inf  ;;  %v2686_v44 = vpack.c.bf16 %v2308_v62, %v2304_v34  ;;  %3586 = vmatprep.mubr.bf16.mxu0 %v3106_v36  ;;  %v1785_v34 = vmul.bf16 1009007652, %v1721_v12  ;;  %v3997_v26 = vadd.s32 %v6875_v13, %v3868_v63 }
 0x2dc   : > { %v4644_v8 = vmax.f32 %v4637_v43, %v4642_v57  ;;  %v2851_v42 = vadd.bf16 %v6667_v5, %v2685_v10  ;;  %v4505_v3 = vsel %vm4121_vm12, %v3376_v49, -inf  ;;  %2571 = vmatmul.mubr.bf16.gmra.mrb[44].mxu1 %v1847_v56  ;;  %3587 = vmatmul.mubr.bf16.gmra.mrb[188].mxu0 %v3105_v51  ;;  %v3869_v49 = vadd.s32 112, %v6139_v22 }
 0x2dd   : > { %v4639_v14 = vsel %vm4624_vm5, %v4505_v3, -inf  ;;  %v2852_v15 = vadd.bf16 %v6670_v39, %v2686_v44  ;;  %2580 = vmatprep.mubr.bf16.mxu1 %v7681_v55  ;;  %v7784_v62 = vpack.c.bf16 %v6590_v60, %v6596_v50  ;;  %v1849_v17 = vmax.bf16 %v1785_v34, %v1721_v12 }
 0x2de   : > { %v2979_v4 = vmul.bf16 1009007652, %v2851_v42  ;;  %v4646_v54 = vmax.f32 %v4639_v14, %v4644_v8  ;;  %vm4125_vm0 = vcmp.lt.s32.totalorder %v3997_v26, 2500  ;;  %v3870_v3 = vadd.s32 120, %v6139_v22 }
 0x2df   : > { %v2980_v58 = vmul.bf16 1009007652, %v2852_v15  ;;  %v2312_v40 = vpop.f32.mrb[196].mxu1  ;;  %v3380_v35 = vpop.f32.mrb[84].mxu0  ;;  %v1722_v7 = vadd.bf16 %v6152_v28, %v7784_v62 }
 0x2e0   : > { %v3381_v61 = vadd.f32 %v6886_v23, %v3380_v35  ;;  %v2314_v33 = vpop.f32.mrb[197].mxu1  ;;  %v3382_v47 = vpop.f32.mrb[85].mxu0  ;;  %v3107_v30 = vmax.bf16 %v2979_v4, %v2851_v42  ;;  %v3999_v53 = vadd.s32 %v6875_v13, %v3870_v3 }
 0x2e1   : > { %v2316_v29 = vpop.f32.mrb[198].mxu1  ;;  %v3383_v37 = vpop.f32.mrb[86].mxu0  ;;  %v3108_v11 = vmax.bf16 %v2980_v58, %v2852_v15  ;;  %v1786_v35 = vmul.bf16 1009007652, %v1722_v7 }
 0x2e2   : > { %v4506_v2 = vsel %vm4122_vm13, %v3381_v61, -inf  ;;  %v2687_v48 = vpack.c.bf16 %v2316_v29, %v2312_v40  ;;  %v3384_v57 = vadd.f32 %v6886_v23, %v3383_v37  ;;  %v2318_v45 = vpop.f32.mrb[199].mxu1  ;;  %v3385_v9 = vpop.f32.mrb[87].mxu0  ;;  %v3998_v40 = vadd.s32 %v6875_v13, %v3869_v49 }
 0x2e3   : > { %v4641_v19 = vsel %vm4624_vm5, %v4506_v2, -inf  ;;  %v2688_v0 = vpack.c.bf16 %v2318_v45, %v2314_v33  ;;  %3594 = vmatprep.mubr.bf16.mxu0 %v3108_v11  ;;  %v3871_v11 = vadd.s32 128, %v6139_v22  ;;  %v1850_v63 = vmax.bf16 %v1786_v35, %v1722_v7 }
 0x2e4   : > { %v4648_v59 = vmax.f32 %v4641_v19, %v4646_v54  ;;  %v2853_v24 = vadd.bf16 %v6667_v5, %v2687_v48  ;;  %v4507_v25 = vsel %vm4123_vm14, %v3384_v57, -inf  ;;  %2581 = vmatmul.mubr.bf16.gmra.mrb[48].mxu1 %v1848_v20  ;;  %3595 = vmatmul.mubr.bf16.gmra.mrb[192].mxu0 %v3107_v30  ;;  %vm4126_vm1 = vcmp.lt.s32.totalorder %v3998_v40, 2500 }
 0x2e5   : > { %v4643_v38 = vsel %vm4624_vm5, %v4507_v25, -inf  ;;  %v2854_v56 = vadd.bf16 %v6670_v39, %v2688_v0  ;;  %2590 = vmatprep.mubr.bf16.mxu1 %v7681_v55  ;;  %v7785_v45 = vpack.c.bf16 %v6601_v21, %v6603_v16  ;;  %vm4127_vm2 = vcmp.lt.s32.totalorder %v3999_v53, 2500 }
 0x2e6   : > { %v2981_v31 = vmul.bf16 1009007652, %v2853_v24  ;;  %v4650_v36 = vmax.f32 %v4643_v38, %v4648_v59  ;;  %v4000_v21 = vadd.s32 %v6875_v13, %v3871_v11  ;;  %v4001_v49 = vadd.s32 %v6875_v13, %v3872_v41 }
 0x2e7   : > { %v2982_v46 = vmul.bf16 1009007652, %v2854_v56  ;;  %v2322_v6 = vpop.f32.mrb[200].mxu1  ;;  %v3388_v10 = vpop.f32.mrb[88].mxu0  ;;  %v1723_v9 = vadd.bf16 %v6152_v28, %v7785_v45 }
 0x2e8   : > { %v3389_v51 = vadd.f32 %v6886_v23, %v3388_v10  ;;  %v2324_v43 = vpop.f32.mrb[201].mxu1  ;;  %v3390_v44 = vpop.f32.mrb[89].mxu0  ;;  %v3109_v50 = vmax.bf16 %v2981_v31, %v2853_v24  ;;  %vm4128_vm3 = vcmp.lt.s32.totalorder %v4000_v21, 2500  ;;  %vm4129_vm4 = vcmp.lt.s32.totalorder %v4001_v49, 2500 }
 0x2e9   : > { %v2326_v1 = vpop.f32.mrb[202].mxu1  ;;  %v3391_v8 = vpop.f32.mrb[90].mxu0  ;;  %v3110_v42 = vmax.bf16 %v2982_v46, %v2854_v56  ;;  %v1787_v46 = vmul.bf16 1009007652, %v1723_v9 }
 0x2ea   : > { %v4508_v14 = vsel %vm4124_vm15, %v3389_v51, -inf  ;;  %v2689_v15 = vpack.c.bf16 %v2326_v1, %v2322_v6  ;;  %v3392_v18 = vadd.f32 %v6886_v23, %v3391_v8  ;;  %v2328_v4 = vpop.f32.mrb[203].mxu1  ;;  %v3393_v54 = vpop.f32.mrb[91].mxu0 }
 0x2eb   : > { %v4645_v60 = vsel %vm4624_vm5, %v4508_v14, -inf  ;;  %v2690_v58 = vpack.c.bf16 %v2328_v4, %v2324_v43  ;;  %3602 = vmatprep.mubr.bf16.mxu0 %v3110_v42  ;;  %v1851_v3 = vmax.bf16 %v1787_v46, %v1723_v9  ;;  %v3874_v4 = vadd.s32 152, %v6139_v22 }
 0x2ec   : > { %v4652_v52 = vmax.f32 %v4645_v60, %v4650_v36  ;;  %v2855_v20 = vadd.bf16 %v6667_v5, %v2689_v15  ;;  %v4509_v61 = vsel %vm4125_vm0, %v3392_v18, -inf  ;;  %2591 = vmatmul.mubr.bf16.gmra.mrb[52].mxu1 %v1849_v17  ;;  %3603 = vmatmul.mubr.bf16.gmra.mrb[196].mxu0 %v3109_v50  ;;  %v3873_v17 = vadd.s32 144, %v6139_v22 }
 0x2ed   : > { %v4647_v33 = vsel %vm4624_vm5, %v4509_v61, -inf  ;;  %v2856_v47 = vadd.bf16 %v6670_v39, %v2690_v58  ;;  %2600 = vmatprep.mubr.bf16.mxu1 %v7681_v55 }
 0x2ee   : > { %v2983_v32 = vmul.bf16 1009007652, %v2855_v20  ;;  %v4654_v27 = vmax.f32 %v4647_v33, %v4652_v52 }
 0x2ef   : > { %v2984_v12 = vmul.bf16 1009007652, %v2856_v47  ;;  %v2332_v29 = vpop.f32.mrb[204].mxu1  ;;  %v3396_v37 = vpop.f32.mrb[92].mxu0 }
 0x2f0   : > { %v3397_v2 = vadd.f32 %v6886_v23, %v3396_v37  ;;  %v2334_v48 = vpop.f32.mrb[205].mxu1  ;;  %v3398_v57 = vpop.f32.mrb[93].mxu0  ;;  %v3111_v56 = vmax.bf16 %v2983_v32, %v2855_v20  ;;  %v4002_v20 = vadd.s32 %v6875_v13, %v3873_v17 }
 0x2f1   : > { %v2336_v30 = vpop.f32.mrb[206].mxu1  ;;  %v3399_v19 = vpop.f32.mrb[94].mxu0  ;;  %v3112_v0 = vmax.bf16 %v2984_v12, %v2856_v47 }
 0x2f2   : > { %v4510_v59 = vsel %vm4126_vm1, %v3397_v2, -inf  ;;  %v2691_v24 = vpack.c.bf16 %v2336_v30, %v2332_v29  ;;  %v3400_v25 = vadd.f32 %v6886_v23, %v3399_v19  ;;  %v2338_v34 = vpop.f32.mrb[207].mxu1  ;;  %v3401_v38 = vpop.f32.mrb[95].mxu0  ;;  %vm4130_vm6 = vcmp.lt.s32.totalorder %v4002_v20, 2500 }
 0x2f3   : > { %v4649_v26 = vsel %vm4624_vm5, %v4510_v59, -inf  ;;  %v2692_v31 = vpack.c.bf16 %v2338_v34, %v2334_v48  ;;  %3610 = vmatprep.mubr.bf16.mxu0 %v3112_v0  ;;  %v3875_v2 = vadd.s32 160, %v6139_v22  ;;  %v3876_v0 = vadd.s32 168, %v6139_v22 }
 0x2f4   : > { %v4656_v28 = vmax.f32 %v4649_v26, %v4654_v27  ;;  %v2857_v16 = vadd.bf16 %v6667_v5, %v2691_v24  ;;  %v4511_v36 = vsel %vm4127_vm2, %v3400_v25, -inf  ;;  %2601 = vmatmul.mubr.bf16.gmra.mrb[56].mxu1 %v1850_v63  ;;  %3611 = vmatmul.mubr.bf16.gmra.mrb[200].mxu0 %v3111_v56  ;;  %v4003_v27 = vadd.s32 %v6875_v13, %v3874_v4 }
 0x2f5   : > { %v4651_v6 = vsel %vm4624_vm5, %v4511_v36, -inf  ;;  %v2858_v10 = vadd.bf16 %v6670_v39, %v2692_v31  ;;  %2610 = vmatprep.mubr.bf16.mxu1 %v7681_v55  ;;  %v4004_v31 = vadd.s32 %v6875_v13, %v3875_v2 }
 0x2f6   : > { %v2985_v62 = vmul.bf16 1009007652, %v2857_v16  ;;  %v4658_v7 = vmax.f32 %v4651_v6, %v4656_v28  ;;  %vm4131_vm7 = vcmp.lt.s32.totalorder %v4003_v27, 2500  ;;  %v4005_v6 = vadd.s32 %v6875_v13, %v3876_v0 }
 0x2f7   : > { %v2986_v51 = vmul.bf16 1009007652, %v2858_v10  ;;  %v2342_v43 = vpop.f32.mrb[208].mxu1  ;;  %v3404_v44 = vpop.f32.mrb[96].mxu0  ;;  %vm4132_vm8 = vcmp.lt.s32.totalorder %v4004_v31, 2500 }
 0x2f8   : > { %v3405_v1 = vadd.f32 %v6886_v23, %v3404_v44  ;;  %v2344_v8 = vpop.f32.mrb[209].mxu1  ;;  %v3406_v42 = vpop.f32.mrb[97].mxu0  ;;  %v3113_v40 = vmax.bf16 %v2985_v62, %v2857_v16  ;;  %vm4133_vm9 = vcmp.lt.s32.totalorder %v4005_v6, 2500 }
 0x2f9   : > { %v2346_v14 = vpop.f32.mrb[210].mxu1  ;;  %v3407_v15 = vpop.f32.mrb[98].mxu0  ;;  %v3114_v18 = vmax.bf16 %v2986_v51, %v2858_v10 }
 0x2fa   : > { %v4512_v55 = vsel %vm4128_vm3, %v3405_v1, -inf  ;;  %v2693_v54 = vpack.c.bf16 %v2346_v14, %v2342_v43  ;;  %v3408_v50 = vadd.f32 %v6886_v23, %v3407_v15  ;;  %v2348_v60 = vpop.f32.mrb[211].mxu1  ;;  %v3409_v58 = vpop.f32.mrb[99].mxu0  ;;  %v3877_v43 = vadd.s32 176, %v6139_v22 }
 0x2fb   : > { %v4653_v35 = vsel %vm4624_vm5, %v4512_v55, -inf  ;;  %v2694_v52 = vpack.c.bf16 %v2348_v60, %v2344_v8  ;;  %3618 = vmatprep.mubr.bf16.mxu0 %v3114_v18  ;;  %v3878_v14 = vadd.s32 184, %v6139_v22 }
 0x2fc   : > { %v4660_v61 = vmax.f32 %v4653_v35, %v4658_v7  ;;  %v2859_v33 = vadd.bf16 %v6667_v5, %v2693_v54  ;;  %v4513_v47 = vsel %vm4129_vm4, %v3408_v50, -inf  ;;  %2611 = vmatmul.mubr.bf16.gmra.mrb[60].mxu1 %v1851_v3  ;;  %3619 = vmatmul.mubr.bf16.gmra.mrb[204].mxu0 %v3113_v40  ;;  %v4006_v40 = vadd.s32 %v6875_v13, %v3877_v43 }
 0x2fd   : > { %v4655_v53 = vsel %vm4624_vm5, %v4513_v47, -inf  ;;  %v2860_v32 = vadd.bf16 %v6670_v39, %v2694_v52  ;;  %v4007_v47 = vadd.s32 %v6875_v13, %v3878_v14 }
 0x2fe   : > { %v2987_v12 = vmul.bf16 1009007652, %v2859_v33  ;;  %v4662_v29 = vmax.f32 %v4655_v53, %v4660_v61  ;;  %vm4134_vm10 = vcmp.lt.s32.totalorder %v4006_v40, 2500 }
 0x2ff   : > { %v2988_v37 = vmul.bf16 1009007652, %v2860_v32  ;;  %v2352_v11 = vpop.f32.mrb[212].mxu1  ;;  %v3412_v63 = vpop.f32.mrb[100].mxu0  ;;  %vm4135_vm11 = vcmp.lt.s32.totalorder %v4007_v47, 2500 }
 0x300   : > { %v3413_v48 = vadd.f32 %v6886_v23, %v3412_v63  ;;  %v2354_v57 = vpop.f32.mrb[213].mxu1  ;;  %v3414_v45 = vpop.f32.mrb[101].mxu0  ;;  %v3115_v38 = vmax.bf16 %v2987_v12, %v2859_v33 }
 0x301   : > { %v2356_v9 = vpop.f32.mrb[214].mxu1  ;;  %v3415_v30 = vpop.f32.mrb[102].mxu0  ;;  %v3116_v19 = vmax.bf16 %v2988_v37, %v2860_v32  ;;  %v3879_v37 = vadd.s32 192, %v6139_v22 }
 0x302   : > { %v4514_v41 = vsel %vm4130_vm6, %v3413_v48, -inf  ;;  %v2695_v59 = vpack.c.bf16 %v2356_v9, %v2352_v11  ;;  %v3416_v24 = vadd.f32 %v6886_v23, %v3415_v30  ;;  %v2358_v25 = vpop.f32.mrb[215].mxu1  ;;  %v3417_v34 = vpop.f32.mrb[103].mxu0  ;;  %v3880_v9 = vadd.s32 200, %v6139_v22 }
 0x303   : > { %v4657_v56 = vsel %vm4624_vm5, %v4514_v41, -inf  ;;  %v2696_v26 = vpack.c.bf16 %v2358_v25, %v2354_v57  ;;  %3626 = vmatprep.mubr.bf16.mxu0 %v3116_v19 }
 0x304   : > { %v4664_v21 = vmax.f32 %v4657_v56, %v4662_v29  ;;  %v2861_v28 = vadd.bf16 %v6667_v5, %v2695_v59  ;;  %v4515_v16 = vsel %vm4131_vm7, %v3416_v24, -inf  ;;  %3627 = vmatmul.mubr.bf16.gmra.mrb[208].mxu0 %v3115_v38  ;;  %v4008_v38 = vadd.s32 %v6875_v13, %v3879_v37 }
 0x305   : > { %v4659_v36 = vsel %vm4624_vm5, %v4515_v16, -inf  ;;  %v2862_v46 = vadd.bf16 %v6670_v39, %v2696_v26  ;;  %v4009_v16 = vadd.s32 %v6875_v13, %v3880_v9 }
 0x306   : > { %v2989_v10 = vmul.bf16 1009007652, %v2861_v28  ;;  %v4666_v49 = vmax.f32 %v4659_v36, %v4664_v21  ;;  %vm4136_vm12 = vcmp.lt.s32.totalorder %v4008_v38, 2500 }
 0x307   : > { %v2990_v62 = vmul.bf16 1009007652, %v2862_v46  ;;  %v2362_v7 = vpop.f32.mrb[216].mxu1  ;;  %v3420_v51 = vpop.f32.mrb[104].mxu0  ;;  %vm4137_vm13 = vcmp.lt.s32.totalorder %v4009_v16, 2500 }
 0x308   : > { %v3421_v44 = vadd.f32 %v6886_v23, %v3420_v51  ;;  %v2364_v17 = vpop.f32.mrb[217].mxu1  ;;  %v3422_v1 = vpop.f32.mrb[105].mxu0  ;;  %v3117_v50 = vmax.bf16 %v2989_v10, %v2861_v28 }
 0x309   : > { %v2366_v8 = vpop.f32.mrb[218].mxu1  ;;  %v3423_v42 = vpop.f32.mrb[106].mxu0  ;;  %v3118_v3 = vmax.bf16 %v2990_v62, %v2862_v46  ;;  %v3881_v62 = vadd.s32 208, %v6139_v22 }
 0x30a   : > { %v4516_v15 = vsel %vm4132_vm8, %v3421_v44, -inf  ;;  %v2697_v18 = vpack.c.bf16 %v2366_v8, %v2362_v7  ;;  %v3424_v4 = vadd.f32 %v6886_v23, %v3423_v42  ;;  %v2368_v55 = vpop.f32.mrb[219].mxu1  ;;  %v3425_v54 = vpop.f32.mrb[107].mxu0  ;;  %v3882_v8 = vadd.s32 216, %v6139_v22 }
 0x30b   : > { %v4661_v60 = vsel %vm4624_vm5, %v4516_v15, -inf  ;;  %v2698_v58 = vpack.c.bf16 %v2368_v55, %v2364_v17  ;;  %3634 = vmatprep.mubr.bf16.mxu0 %v3118_v3 }
 0x30c   : > { %v4668_v35 = vmax.f32 %v4661_v60, %v4666_v49  ;;  %v2863_v52 = vadd.bf16 %v6667_v5, %v2697_v18  ;;  %v4517_v20 = vsel %vm4133_vm9, %v3424_v4, -inf  ;;  %3635 = vmatmul.mubr.bf16.gmra.mrb[212].mxu0 %v3117_v50  ;;  %v4010_v50 = vadd.s32 %v6875_v13, %v3881_v62 }
 0x30d   : > { %v4663_v61 = vsel %vm4624_vm5, %v4517_v20, -inf  ;;  %v2864_v33 = vadd.bf16 %v6670_v39, %v2698_v58  ;;  %v4011_v20 = vadd.s32 %v6875_v13, %v3882_v8 }
 0x30e   : > { %v2991_v53 = vmul.bf16 1009007652, %v2863_v52  ;;  %v4670_v32 = vmax.f32 %v4663_v61, %v4668_v35  ;;  %vm4138_vm14 = vcmp.lt.s32.totalorder %v4010_v50, 2500 }
 0x30f   : > { %v2992_v27 = vmul.bf16 1009007652, %v2864_v33  ;;  %v2372_v12 = vpop.f32.mrb[220].mxu1  ;;  %v3428_v29 = vpop.f32.mrb[108].mxu0  ;;  %vm4139_vm15 = vcmp.lt.s32.totalorder %v4011_v20, 2500 }
 0x310   : > { %v3429_v11 = vadd.f32 %v6886_v23, %v3428_v29  ;;  %v2374_v63 = vpop.f32.mrb[221].mxu1  ;;  %v3430_v2 = vpop.f32.mrb[109].mxu0  ;;  %v3119_v24 = vmax.bf16 %v2991_v53, %v2863_v52 }
 0x311   : > { %v2376_v48 = vpop.f32.mrb[222].mxu1  ;;  %v3431_v57 = vpop.f32.mrb[110].mxu0  ;;  %v3120_v45 = vmax.bf16 %v2992_v27, %v2864_v33  ;;  %v3883_v27 = vadd.s32 224, %v6139_v22 }
 0x312   : > { %v4518_v30 = vsel %vm4134_vm10, %v3429_v11, -inf  ;;  %v2699_v19 = vpack.c.bf16 %v2376_v48, %v2372_v12  ;;  %v3432_v0 = vadd.f32 %v6886_v23, %v3431_v57  ;;  %v2378_v41 = vpop.f32.mrb[223].mxu1  ;;  %v3433_v59 = vpop.f32.mrb[111].mxu0  ;;  %v3884_v48 = vadd.s32 232, %v6139_v22 }
 0x313   : > { %v4665_v25 = vsel %vm4624_vm5, %v4518_v30, -inf  ;;  %v2700_v34 = vpack.c.bf16 %v2378_v41, %v2374_v63  ;;  %3642 = vmatprep.mubr.bf16.mxu0 %v3120_v45 }
 0x314   : > { %v4672_v56 = vmax.f32 %v4665_v25, %v4670_v32  ;;  %v2865_v26 = vadd.bf16 %v6667_v5, %v2699_v19  ;;  %v4519_v31 = vsel %vm4135_vm11, %v3432_v0, -inf  ;;  %3643 = vmatmul.mubr.bf16.gmra.mrb[216].mxu0 %v3119_v24  ;;  %v4012_v24 = vadd.s32 %v6875_v13, %v3883_v27 }
 0x315   : > { %v4667_v21 = vsel %vm4624_vm5, %v4519_v31, -inf  ;;  %v2866_v28 = vadd.bf16 %v6670_v39, %v2700_v34  ;;  %v4013_v31 = vadd.s32 %v6875_v13, %v3884_v48  ;;  %v7082_v48 = vld [vmem:[%s7591_s6] ss:$0 sm:$0xff] }
 0x316   : > { %v2993_v36 = vmul.bf16 1009007652, %v2865_v26  ;;  %v4674_v46 = vmax.f32 %v4667_v21, %v4672_v56  ;;  %vm4140_vm0 = vcmp.lt.s32.totalorder %v4012_v24, 2500 }
 0x317   : > { %v2994_v6 = vmul.bf16 1009007652, %v2866_v28  ;;  %v2382_v10 = vpop.f32.mrb[224].mxu1  ;;  %v3436_v49 = vpop.f32.mrb[112].mxu0  ;;  %vm4141_vm1 = vcmp.lt.s32.totalorder %v4013_v31, 2500 }
 0x318   : > { %v3437_v7 = vadd.f32 %v6886_v23, %v3436_v49  ;;  %v2384_v51 = vpop.f32.mrb[225].mxu1  ;;  %v3438_v43 = vpop.f32.mrb[113].mxu0  ;;  %v3121_v4 = vmax.bf16 %v2993_v36, %v2865_v26 }
 0x319   : > { %v2386_v44 = vpop.f32.mrb[226].mxu1  ;;  %v3439_v17 = vpop.f32.mrb[114].mxu0  ;;  %v3122_v1 = vmax.bf16 %v2994_v6, %v2866_v28  ;;  %v3885_v6 = vadd.s32 240, %v6139_v22 }
 0x31a   : > { %v4520_v42 = vsel %vm4136_vm12, %v3437_v7, -inf  ;;  %v2701_v3 = vpack.c.bf16 %v2386_v44, %v2382_v10  ;;  %v3440_v14 = vadd.f32 %v6886_v23, %v3439_v17  ;;  %v2388_v15 = vpop.f32.mrb[227].mxu1  ;;  %v3441_v18 = vpop.f32.mrb[115].mxu0  ;;  %v3886_v44 = vadd.s32 248, %v6139_v22 }
 0x31b   : > { %v4669_v55 = vsel %vm4624_vm5, %v4520_v42, -inf  ;;  %v2702_v54 = vpack.c.bf16 %v2388_v15, %v2384_v51  ;;  %3650 = vmatprep.mubr.bf16.mxu0 %v3122_v1 }
 0x31c   : > { %v4676_v60 = vmax.f32 %v4669_v55, %v4674_v46  ;;  %v2867_v58 = vadd.bf16 %v6667_v5, %v2701_v3  ;;  %v4521_v40 = vsel %vm4137_vm13, %v3440_v14, -inf  ;;  %3651 = vmatmul.mubr.bf16.gmra.mrb[220].mxu0 %v3121_v4  ;;  %v4014_v4 = vadd.s32 %v6875_v13, %v3885_v6 }
 0x31d   : > { %v4671_v35 = vsel %vm4624_vm5, %v4521_v40, -inf  ;;  %v2868_v52 = vadd.bf16 %v6670_v39, %v2702_v54  ;;  %v4015_v40 = vadd.s32 %v6875_v13, %v3886_v44 }
 0x31e   : > { %v2995_v61 = vmul.bf16 1009007652, %v2867_v58  ;;  %v4678_v33 = vmax.f32 %v4671_v35, %v4676_v60  ;;  %vm4142_vm2 = vcmp.lt.s32.totalorder %v4014_v4, 2500 }
 0x31f   : > { %v2996_v47 = vmul.bf16 1009007652, %v2868_v52  ;;  %v2392_v53 = vpop.f32.mrb[228].mxu1  ;;  %v3444_v32 = vpop.f32.mrb[116].mxu0  ;;  %vm4143_vm3 = vcmp.lt.s32.totalorder %v4015_v40, 2500 }
 0x320   : > { %v3445_v12 = vadd.f32 %v6886_v23, %v3444_v32  ;;  %v2394_v29 = vpop.f32.mrb[229].mxu1  ;;  %v3446_v37 = vpop.f32.mrb[117].mxu0  ;;  %v3123_v0 = vmax.bf16 %v2995_v61, %v2867_v58 }
 0x321   : > { %v2396_v11 = vpop.f32.mrb[230].mxu1  ;;  %v3447_v63 = vpop.f32.mrb[118].mxu0  ;;  %v3124_v2 = vmax.bf16 %v2996_v47, %v2868_v52  ;;  %v3887_v47 = vadd.s32 256, %v6139_v22 }
 0x322   : > { %v4522_v57 = vsel %vm4138_vm14, %v3445_v12, -inf  ;;  %v2703_v45 = vpack.c.bf16 %v2396_v11, %v2392_v53  ;;  %v3448_v9 = vadd.f32 %v6886_v23, %v3447_v63  ;;  %v2398_v30 = vpop.f32.mrb[231].mxu1  ;;  %v3449_v19 = vpop.f32.mrb[119].mxu0  ;;  %v3888_v11 = vadd.s32 264, %v6139_v22 }
 0x323   : > { %v4673_v41 = vsel %vm4624_vm5, %v4522_v57, -inf  ;;  %v2704_v59 = vpack.c.bf16 %v2398_v30, %v2394_v29  ;;  %3658 = vmatprep.mubr.bf16.mxu0 %v3124_v2 }
 0x324   : > { %v4680_v25 = vmax.f32 %v4673_v41, %v4678_v33  ;;  %v2869_v34 = vadd.bf16 %v6667_v5, %v2703_v45  ;;  %v4523_v38 = vsel %vm4139_vm15, %v3448_v9, -inf  ;;  %3659 = vmatmul.mubr.bf16.gmra.mrb[224].mxu0 %v3123_v0  ;;  %v4016_v0 = vadd.s32 %v6875_v13, %v3887_v47 }
 0x325   : > { %v4675_v56 = vsel %vm4624_vm5, %v4523_v38, -inf  ;;  %v2870_v26 = vadd.bf16 %v6670_v39, %v2704_v59  ;;  %v4017_v38 = vadd.s32 %v6875_v13, %v3888_v11 }
 0x326   : > { %v2997_v21 = vmul.bf16 1009007652, %v2869_v34  ;;  %v4682_v28 = vmax.f32 %v4675_v56, %v4680_v25  ;;  %vm4144_vm4 = vcmp.lt.s32.totalorder %v4016_v0, 2500 }
 0x327   : > { %v2998_v16 = vmul.bf16 1009007652, %v2870_v26  ;;  %v2402_v36 = vpop.f32.mrb[232].mxu1  ;;  %v3452_v46 = vpop.f32.mrb[120].mxu0  ;;  %vm4145_vm6 = vcmp.lt.s32.totalorder %v4017_v38, 2500 }
 0x328   : > { %v3453_v10 = vadd.f32 %v6886_v23, %v3452_v46  ;;  %v2404_v49 = vpop.f32.mrb[233].mxu1  ;;  %v3454_v62 = vpop.f32.mrb[121].mxu0  ;;  %v3125_v14 = vmax.bf16 %v2997_v21, %v2869_v34 }
 0x329   : > { %v2406_v7 = vpop.f32.mrb[234].mxu1  ;;  %v3455_v51 = vpop.f32.mrb[122].mxu0  ;;  %v3126_v43 = vmax.bf16 %v2998_v16, %v2870_v26  ;;  %v3889_v16 = vadd.s32 272, %v6139_v22 }
 0x32a   : > { %v4524_v17 = vsel %vm4140_vm0, %v3453_v10, -inf  ;;  %v2705_v1 = vpack.c.bf16 %v2406_v7, %v2402_v36  ;;  %v3456_v8 = vadd.f32 %v6886_v23, %v3455_v51  ;;  %v2408_v42 = vpop.f32.mrb[235].mxu1  ;;  %v3457_v3 = vpop.f32.mrb[123].mxu0  ;;  %v3890_v7 = vadd.s32 280, %v6139_v22 }
 0x32b   : > { %v4677_v15 = vsel %vm4624_vm5, %v4524_v17, -inf  ;;  %v2706_v18 = vpack.c.bf16 %v2408_v42, %v2404_v49  ;;  %3666 = vmatprep.mubr.bf16.mxu0 %v3126_v43 }
 0x32c   : > { %v4684_v55 = vmax.f32 %v4677_v15, %v4682_v28  ;;  %v2871_v54 = vadd.bf16 %v6667_v5, %v2705_v1  ;;  %v4525_v50 = vsel %vm4141_vm1, %v3456_v8, -inf  ;;  %3667 = vmatmul.mubr.bf16.gmra.mrb[228].mxu0 %v3125_v14  ;;  %v4018_v14 = vadd.s32 %v6875_v13, %v3889_v16 }
 0x32d   : > { %v4679_v60 = vsel %vm4624_vm5, %v4525_v50, -inf  ;;  %v2872_v58 = vadd.bf16 %v6670_v39, %v2706_v18  ;;  %v4019_v50 = vadd.s32 %v6875_v13, %v3890_v7 }
 0x32e   : > { %v2999_v35 = vmul.bf16 1009007652, %v2871_v54  ;;  %v4686_v52 = vmax.f32 %v4679_v60, %v4684_v55  ;;  %vm4146_vm7 = vcmp.lt.s32.totalorder %v4018_v14, 2500 }
 0x32f   : > { %v3000_v20 = vmul.bf16 1009007652, %v2872_v58  ;;  %v2412_v61 = vpop.f32.mrb[236].mxu1  ;;  %v3460_v33 = vpop.f32.mrb[124].mxu0  ;;  %vm4147_vm8 = vcmp.lt.s32.totalorder %v4019_v50, 2500 }
 0x330   : > { %v3461_v53 = vadd.f32 %v6886_v23, %v3460_v33  ;;  %v2414_v32 = vpop.f32.mrb[237].mxu1  ;;  %v3462_v27 = vpop.f32.mrb[125].mxu0  ;;  %v3127_v23 = vmax.bf16 %v2999_v35, %v2871_v54 }
 0x331   : > { %v2416_v12 = vpop.f32.mrb[238].mxu1  ;;  %v3463_v29 = vpop.f32.mrb[126].mxu0  ;;  %v3128_v37 = vmax.bf16 %v3000_v20, %v2872_v58  ;;  %v3891_v20 = vadd.s32 288, %v6139_v22 }
 0x332   : > { %v4526_v63 = vsel %vm4142_vm2, %v3461_v53, -inf  ;;  %v2707_v2 = vpack.c.bf16 %v2416_v12, %v2412_v61  ;;  %v3464_v57 = vadd.f32 %v7082_v48, %v3463_v29  ;;  %v2418_v45 = vpop.f32.mrb[239].mxu1  ;;  %v3465_v9 = vpop.f32.mrb[127].mxu0  ;;  %v3892_v12 = vadd.s32 296, %v6139_v22 }
 0x333   : > { %v4681_v30 = vsel %vm4624_vm5, %v4526_v63, -inf  ;;  %v2708_v19 = vpack.c.bf16 %v2418_v45, %v2414_v32  ;;  %3674 = vmatprep.mubr.bf16.mxu0 %v3128_v37 }
 0x334   : > { %v4688_v41 = vmax.f32 %v4681_v30, %v4686_v52  ;;  %v2873_v59 = vadd.bf16 %v6667_v5, %v2707_v2  ;;  %v4527_v24 = vsel %vm4143_vm3, %v3464_v57, -inf  ;;  %3675 = vmatmul.mubr.bf16.gmra.mrb[232].mxu0 %v3127_v23  ;;  %v4020_v23 = vadd.s32 %v6875_v13, %v3891_v20 }
 0x335   : > { %v4683_v25 = vsel %vm4624_vm5, %v4527_v24, -inf  ;;  %v2874_v34 = vadd.bf16 %v6670_v39, %v2708_v19  ;;  %v4021_v24 = vadd.s32 %v6875_v13, %v3892_v12 }
 0x336   : > { %v3001_v56 = vmul.bf16 1009007652, %v2873_v59  ;;  %v4690_v26 = vmax.f32 %v4683_v25, %v4688_v41  ;;  %vm4148_vm9 = vcmp.lt.s32.totalorder %v4020_v23, 2500 }
 0x337   : > { %v3002_v31 = vmul.bf16 1009007652, %v2874_v34  ;;  %v2422_v21 = vpop.f32.mrb[240].mxu1  ;;  %v3468_v28 = vpop.f32.mrb[128].mxu0  ;;  %vm4149_vm10 = vcmp.lt.s32.totalorder %v4021_v24, 2500 }
 0x338   : > { %v3469_v36 = vadd.f32 %v7082_v48, %v3468_v28  ;;  %v2424_v46 = vpop.f32.mrb[241].mxu1  ;;  %v3470_v6 = vpop.f32.mrb[129].mxu0  ;;  %v3129_v8 = vmax.bf16 %v3001_v56, %v2873_v59 }
 0x339   : > { %v2426_v10 = vpop.f32.mrb[242].mxu1  ;;  %v3471_v49 = vpop.f32.mrb[130].mxu0  ;;  %v3130_v62 = vmax.bf16 %v3002_v31, %v2874_v34  ;;  %v3893_v31 = vadd.s32 304, %v6139_v22 }
 0x33a   : > { %v4528_v51 = vsel %vm4144_vm4, %v3469_v36, -inf  ;;  %v2709_v43 = vpack.c.bf16 %v2426_v10, %v2422_v21  ;;  %v3472_v44 = vadd.f32 %v7082_v48, %v3471_v49  ;;  %v2428_v17 = vpop.f32.mrb[243].mxu1  ;;  %v3473_v1 = vpop.f32.mrb[131].mxu0  ;;  %v3894_v10 = vadd.s32 312, %v6139_v22 }
 0x33b   : > { %v4685_v42 = vsel %vm4624_vm5, %v4528_v51, -inf  ;;  %v2710_v3 = vpack.c.bf16 %v2428_v17, %v2424_v46  ;;  %3682 = vmatprep.mubr.bf16.mxu0 %v3130_v62 }
 0x33c   : > { %v4692_v15 = vmax.f32 %v4685_v42, %v4690_v26  ;;  %v2875_v18 = vadd.bf16 %v6667_v5, %v2709_v43  ;;  %v4529_v4 = vsel %vm4145_vm6, %v3472_v44, -inf  ;;  %3683 = vmatmul.mubr.bf16.gmra.mrb[236].mxu0 %v3129_v8  ;;  %v4022_v8 = vadd.s32 %v6875_v13, %v3893_v31 }
 0x33d   : > { %v4687_v55 = vsel %vm4624_vm5, %v4529_v4, -inf  ;;  %v2876_v54 = vadd.bf16 %v6670_v39, %v2710_v3  ;;  %v4023_v4 = vadd.s32 %v6875_v13, %v3894_v10 }
 0x33e   : > { %v3003_v60 = vmul.bf16 1009007652, %v2875_v18  ;;  %v4694_v58 = vmax.f32 %v4687_v55, %v4692_v15  ;;  %vm4150_vm11 = vcmp.lt.s32.totalorder %v4022_v8, 2500 }
 0x33f   : > { %v3004_v40 = vmul.bf16 1009007652, %v2876_v54  ;;  %v2432_v35 = vpop.f32.mrb[244].mxu1  ;;  %v3476_v52 = vpop.f32.mrb[132].mxu0  ;;  %vm4151_vm12 = vcmp.lt.s32.totalorder %v4023_v4, 2500 }
 0x340   : > { %v3477_v61 = vadd.f32 %v7082_v48, %v3476_v52  ;;  %v2434_v33 = vpop.f32.mrb[245].mxu1  ;;  %v3478_v47 = vpop.f32.mrb[133].mxu0  ;;  %v3131_v57 = vmax.bf16 %v3003_v60, %v2875_v18 }
 0x341   : > { %v2436_v53 = vpop.f32.mrb[246].mxu1  ;;  %v3479_v32 = vpop.f32.mrb[134].mxu0  ;;  %v3132_v27 = vmax.bf16 %v3004_v40, %v2876_v54  ;;  %v3895_v40 = vadd.s32 320, %v6139_v22 }
 0x342   : > { %v4530_v29 = vsel %vm4146_vm7, %v3477_v61, -inf  ;;  %v2711_v37 = vpack.c.bf16 %v2436_v53, %v2432_v35  ;;  %v3480_v11 = vadd.f32 %v7082_v48, %v3479_v32  ;;  %v2438_v63 = vpop.f32.mrb[247].mxu1  ;;  %v3481_v2 = vpop.f32.mrb[135].mxu0  ;;  %v3896_v53 = vadd.s32 328, %v6139_v22 }
 0x343   : > { %v4689_v45 = vsel %vm4624_vm5, %v4530_v29, -inf  ;;  %v2712_v9 = vpack.c.bf16 %v2438_v63, %v2434_v33  ;;  %3690 = vmatprep.mubr.bf16.mxu0 %v3132_v27 }
 0x344   : > { %v4696_v30 = vmax.f32 %v4689_v45, %v4694_v58  ;;  %v2877_v19 = vadd.bf16 %v6667_v5, %v2711_v37  ;;  %v4531_v0 = vsel %vm4147_vm8, %v3480_v11, -inf  ;;  %3691 = vmatmul.mubr.bf16.gmra.mrb[240].mxu0 %v3131_v57  ;;  %v4024_v57 = vadd.s32 %v6875_v13, %v3895_v40 }
 0x345   : > { %v4691_v41 = vsel %vm4624_vm5, %v4531_v0, -inf  ;;  %v2878_v59 = vadd.bf16 %v6670_v39, %v2712_v9  ;;  %v4025_v0 = vadd.s32 %v6875_v13, %v3896_v53 }
 0x346   : > { %v3005_v25 = vmul.bf16 1009007652, %v2877_v19  ;;  %v4698_v34 = vmax.f32 %v4691_v41, %v4696_v30  ;;  %vm4152_vm13 = vcmp.lt.s32.totalorder %v4024_v57, 2500 }
 0x347   : > { %v3006_v38 = vmul.bf16 1009007652, %v2878_v59  ;;  %v2442_v56 = vpop.f32.mrb[248].mxu1  ;;  %v3484_v26 = vpop.f32.mrb[136].mxu0  ;;  %vm4153_vm14 = vcmp.lt.s32.totalorder %v4025_v0, 2500 }
 0x348   : > { %v3485_v21 = vadd.f32 %v7082_v48, %v3484_v26  ;;  %v2444_v28 = vpop.f32.mrb[249].mxu1  ;;  %v3486_v16 = vpop.f32.mrb[137].mxu0  ;;  %v3133_v44 = vmax.bf16 %v3005_v25, %v2877_v19 }
 0x349   : > { %v2446_v36 = vpop.f32.mrb[250].mxu1  ;;  %v3487_v46 = vpop.f32.mrb[138].mxu0  ;;  %v3134_v6 = vmax.bf16 %v3006_v38, %v2878_v59  ;;  %v3897_v38 = vadd.s32 336, %v6139_v22 }
 0x34a   : > { %v4532_v49 = vsel %vm4148_vm9, %v3485_v21, -inf  ;;  %v2713_v62 = vpack.c.bf16 %v2446_v36, %v2442_v56  ;;  %v3488_v7 = vadd.f32 %v7082_v48, %v3487_v46  ;;  %v2448_v51 = vpop.f32.mrb[251].mxu1  ;;  %v3489_v43 = vpop.f32.mrb[139].mxu0  ;;  %v3898_v36 = vadd.s32 344, %v6139_v22 }
 0x34b   : > { %v4693_v17 = vsel %vm4624_vm5, %v4532_v49, -inf  ;;  %v2714_v1 = vpack.c.bf16 %v2448_v51, %v2444_v28  ;;  %3698 = vmatprep.mubr.bf16.mxu0 %v3134_v6 }
 0x34c   : > { %v4700_v42 = vmax.f32 %v4693_v17, %v4698_v34  ;;  %v2879_v3 = vadd.bf16 %v6667_v5, %v2713_v62  ;;  %v4533_v14 = vsel %vm4149_vm10, %v3488_v7, -inf  ;;  %3699 = vmatmul.mubr.bf16.gmra.mrb[244].mxu0 %v3133_v44  ;;  %v4026_v44 = vadd.s32 %v6875_v13, %v3897_v38 }
 0x34d   : > { %v4695_v15 = vsel %vm4624_vm5, %v4533_v14, -inf  ;;  %v2880_v18 = vadd.bf16 %v6670_v39, %v2714_v1  ;;  %v4027_v14 = vadd.s32 %v6875_v13, %v3898_v36 }
 0x34e   : > { %v3007_v55 = vmul.bf16 1009007652, %v2879_v3  ;;  %v4702_v54 = vmax.f32 %v4695_v15, %v4700_v42  ;;  %vm4154_vm15 = vcmp.lt.s32.totalorder %v4026_v44, 2500 }
 0x34f   : > { %v3008_v50 = vmul.bf16 1009007652, %v2880_v18  ;;  %v2452_v60 = vpop.f32.mrb[252].mxu1  ;;  %v3492_v58 = vpop.f32.mrb[140].mxu0  ;;  %vm4155_vm0 = vcmp.lt.s32.totalorder %v4027_v14, 2500 }
 0x350   : > { %v3493_v35 = vadd.f32 %v7082_v48, %v3492_v58  ;;  %v2454_v52 = vpop.f32.mrb[253].mxu1  ;;  %v3494_v20 = vpop.f32.mrb[141].mxu0  ;;  %v3135_v11 = vmax.bf16 %v3007_v55, %v2879_v3 }
 0x351   : > { %v2456_v61 = vpop.f32.mrb[254].mxu1  ;;  %v3495_v33 = vpop.f32.mrb[142].mxu0  ;;  %v3136_v47 = vmax.bf16 %v3008_v50, %v2880_v18  ;;  %v3899_v50 = vadd.s32 352, %v6139_v22 }
 0x352   : > { %v4534_v32 = vsel %vm4150_vm11, %v3493_v35, -inf  ;;  %v2715_v27 = vpack.c.bf16 %v2456_v61, %v2452_v60  ;;  %v3496_v12 = vadd.f32 %v7082_v48, %v3495_v33  ;;  %v2458_v29 = vpop.f32.mrb[255].mxu1  ;;  %v3497_v37 = vpop.f32.mrb[143].mxu0  ;;  %v3900_v61 = vadd.s32 360, %v6139_v22 }
 0x353   : > { %v4697_v63 = vsel %vm4624_vm5, %v4534_v32, -inf  ;;  %v2716_v2 = vpack.c.bf16 %v2458_v29, %v2454_v52  ;;  %3706 = vmatprep.mubr.bf16.mxu0 %v3136_v47 }
 0x354   : > { %v4704_v45 = vmax.f32 %v4697_v63, %v4702_v54  ;;  %v2881_v9 = vadd.bf16 %v6667_v5, %v2715_v27  ;;  %v4535_v23 = vsel %vm4151_vm12, %v3496_v12, -inf  ;;  %3707 = vmatmul.mubr.bf16.gmra.mrb[248].mxu0 %v3135_v11  ;;  %v4028_v11 = vadd.s32 %v6875_v13, %v3899_v50 }
 0x355   : > { %v4699_v30 = vsel %vm4624_vm5, %v4535_v23, -inf  ;;  %v2882_v19 = vadd.bf16 %v6670_v39, %v2716_v2  ;;  %v4029_v23 = vadd.s32 %v6875_v13, %v3900_v61 }
 0x356   : > { %v3009_v41 = vmul.bf16 1009007652, %v2881_v9  ;;  %v4706_v59 = vmax.f32 %v4699_v30, %v4704_v45  ;;  %vm4156_vm1 = vcmp.lt.s32.totalorder %v4028_v11, 2500 }
 0x357   : > { %v3010_v24 = vmul.bf16 1009007652, %v2882_v19  ;;  %v2462_v25 = vpop.f32.mrb[0].mxu1  ;;  %v3500_v34 = vpop.f32.mrb[144].mxu0  ;;  %vm4157_vm2 = vcmp.lt.s32.totalorder %v4029_v23, 2500 }
 0x358   : > { %v3501_v56 = vadd.f32 %v7082_v48, %v3500_v34  ;;  %v2464_v26 = vpop.f32.mrb[1].mxu1  ;;  %v3502_v31 = vpop.f32.mrb[145].mxu0  ;;  %v3137_v7 = vmax.bf16 %v3009_v41, %v2881_v9 }
 0x359   : > { %v2466_v21 = vpop.f32.mrb[2].mxu1  ;;  %v3503_v28 = vpop.f32.mrb[146].mxu0  ;;  %v3138_v16 = vmax.bf16 %v3010_v24, %v2882_v19  ;;  %v3901_v24 = vadd.s32 368, %v6139_v22 }
 0x35a   : > { %v4536_v46 = vsel %vm4152_vm13, %v3501_v56, -inf  ;;  %v2717_v6 = vpack.c.bf16 %v2466_v21, %v2462_v25  ;;  %v3504_v10 = vadd.f32 %v7082_v48, %v3503_v28  ;;  %v2468_v49 = vpop.f32.mrb[3].mxu1  ;;  %v3505_v62 = vpop.f32.mrb[147].mxu0  ;;  %v3902_v21 = vadd.s32 376, %v6139_v22 }
 0x35b   : > { %v4701_v51 = vsel %vm4624_vm5, %v4536_v46, -inf  ;;  %v2718_v43 = vpack.c.bf16 %v2468_v49, %v2464_v26  ;;  %3714 = vmatprep.mubr.bf16.mxu0 %v3138_v16 }
 0x35c   : > { %v4708_v17 = vmax.f32 %v4701_v51, %v4706_v59  ;;  %v2883_v1 = vadd.bf16 %v6667_v5, %v2717_v6  ;;  %v4537_v8 = vsel %vm4153_vm14, %v3504_v10, -inf  ;;  %3715 = vmatmul.mubr.bf16.gmra.mrb[252].mxu0 %v3137_v7  ;;  %v4030_v7 = vadd.s32 %v6875_v13, %v3901_v24 }
 0x35d   : > { %v4703_v42 = vsel %vm4624_vm5, %v4537_v8, -inf  ;;  %v2884_v3 = vadd.bf16 %v6670_v39, %v2718_v43  ;;  %v4031_v8 = vadd.s32 %v6875_v13, %v3902_v21 }
 0x35e   : > { %v3011_v15 = vmul.bf16 1009007652, %v2883_v1  ;;  %v4710_v18 = vmax.f32 %v4703_v42, %v4708_v17  ;;  %vm4158_vm3 = vcmp.lt.s32.totalorder %v4030_v7, 2500 }
 0x35f   : > { %v3012_v4 = vmul.bf16 1009007652, %v2884_v3  ;;  %v2472_v55 = vpop.f32.mrb[4].mxu1  ;;  %v3508_v54 = vpop.f32.mrb[148].mxu0  ;;  %vm4159_vm4 = vcmp.lt.s32.totalorder %v4031_v8, 2500 }
 0x360   : > { %v3509_v60 = vadd.f32 %v7082_v48, %v3508_v54  ;;  %v2474_v58 = vpop.f32.mrb[5].mxu1  ;;  %v3510_v40 = vpop.f32.mrb[149].mxu0  ;;  %v3139_v33 = vmax.bf16 %v3011_v15, %v2883_v1 }
 0x361   : > { %v2476_v35 = vpop.f32.mrb[6].mxu1  ;;  %v3511_v52 = vpop.f32.mrb[150].mxu0  ;;  %v3140_v20 = vmax.bf16 %v3012_v4, %v2884_v3  ;;  %v3903_v4 = vadd.s32 384, %v6139_v22 }
 0x362   : > { %v4538_v47 = vsel %vm4154_vm15, %v3509_v60, -inf  ;;  %v2719_v53 = vpack.c.bf16 %v2476_v35, %v2472_v55  ;;  %v3512_v32 = vadd.f32 %v7082_v48, %v3511_v52  ;;  %v2478_v27 = vpop.f32.mrb[7].mxu1  ;;  %v3513_v12 = vpop.f32.mrb[151].mxu0  ;;  %v3904_v35 = vadd.s32 392, %v6139_v22 }
 0x363   : > { %v4705_v29 = vsel %vm4624_vm5, %v4538_v47, -inf  ;;  %v2720_v37 = vpack.c.bf16 %v2478_v27, %v2474_v58  ;;  %3722 = vmatprep.mubr.bf16.mxu0 %v3140_v20  ;;  %v4032_v12 = vadd.s32 %v6875_v13, %v3903_v4 }
 0x364   : > { %v4712_v63 = vmax.f32 %v4705_v29, %v4710_v18  ;;  %v2885_v2 = vadd.bf16 %v6667_v5, %v2719_v53  ;;  %v4539_v57 = vsel %vm4155_vm0, %v3512_v32, -inf  ;;  %3723 = vmatmul.mubr.bf16.gmra.mrb[0].mxu0 %v3139_v33 }
 0x365   : > { %v4707_v45 = vsel %vm4624_vm5, %v4539_v57, -inf  ;;  %v2886_v9 = vadd.bf16 %v6670_v39, %v2720_v37  ;;  %v4033_v57 = vadd.s32 %v6875_v13, %v3904_v35  ;;  %vm4160_vm6 = vcmp.lt.s32.totalorder %v4032_v12, 2500 }
 0x366   : > { %v3013_v30 = vmul.bf16 1009007652, %v2885_v2  ;;  %v4714_v19 = vmax.f32 %v4707_v45, %v4712_v63 }
 0x367   : > { %v3014_v0 = vmul.bf16 1009007652, %v2886_v9  ;;  %v2482_v41 = vpop.f32.mrb[8].mxu1  ;;  %v3516_v59 = vpop.f32.mrb[152].mxu0  ;;  %vm4161_vm7 = vcmp.lt.s32.totalorder %v4033_v57, 2500 }
 0x368   : > { %v3517_v25 = vadd.f32 %v7082_v48, %v3516_v59  ;;  %v2484_v34 = vpop.f32.mrb[9].mxu1  ;;  %v3518_v38 = vpop.f32.mrb[153].mxu0  ;;  %v3141_v28 = vmax.bf16 %v3013_v30, %v2885_v2 }
 0x369   : > { %v2486_v56 = vpop.f32.mrb[10].mxu1  ;;  %v3519_v26 = vpop.f32.mrb[154].mxu0  ;;  %v3142_v31 = vmax.bf16 %v3014_v0, %v2886_v9  ;;  %v3905_v0 = vadd.s32 400, %v6139_v22 }
 0x36a   : > { %v4540_v16 = vsel %vm4156_vm1, %v3517_v25, -inf  ;;  %v2721_v36 = vpack.c.bf16 %v2486_v56, %v2482_v41  ;;  %v3520_v46 = vadd.f32 %v7082_v48, %v3519_v26  ;;  %v2488_v6 = vpop.f32.mrb[11].mxu1  ;;  %v3521_v10 = vpop.f32.mrb[155].mxu0  ;;  %v3906_v56 = vadd.s32 408, %v6139_v22 }
 0x36b   : > { %v4709_v49 = vsel %vm4624_vm5, %v4540_v16, -inf  ;;  %v2722_v62 = vpack.c.bf16 %v2488_v6, %v2484_v34  ;;  %3730 = vmatprep.mubr.bf16.mxu0 %v3142_v31  ;;  %v4034_v10 = vadd.s32 %v6875_v13, %v3905_v0 }
 0x36c   : > { %v4716_v51 = vmax.f32 %v4709_v49, %v4714_v19  ;;  %v2887_v43 = vadd.bf16 %v6667_v5, %v2721_v36  ;;  %v4541_v44 = vsel %vm4157_vm2, %v3520_v46, -inf  ;;  %3731 = vmatmul.mubr.bf16.gmra.mrb[4].mxu0 %v3141_v28 }
 0x36d   : > { %v4711_v17 = vsel %vm4624_vm5, %v4541_v44, -inf  ;;  %v2888_v1 = vadd.bf16 %v6670_v39, %v2722_v62  ;;  %v4035_v44 = vadd.s32 %v6875_v13, %v3906_v56  ;;  %vm4162_vm8 = vcmp.lt.s32.totalorder %v4034_v10, 2500 }
 0x36e   : > { %v3015_v42 = vmul.bf16 1009007652, %v2887_v43  ;;  %v4718_v3 = vmax.f32 %v4711_v17, %v4716_v51 }
 0x36f   : > { %v3016_v14 = vmul.bf16 1009007652, %v2888_v1  ;;  %v2492_v15 = vpop.f32.mrb[12].mxu1  ;;  %v3524_v18 = vpop.f32.mrb[156].mxu0  ;;  %vm4163_vm9 = vcmp.lt.s32.totalorder %v4035_v44, 2500 }
 0x370   : > { %v3525_v55 = vadd.f32 %v7082_v48, %v3524_v18  ;;  %v2494_v54 = vpop.f32.mrb[13].mxu1  ;;  %v3526_v50 = vpop.f32.mrb[157].mxu0  ;;  %v3143_v52 = vmax.bf16 %v3015_v42, %v2887_v43 }
 0x371   : > { %v2496_v60 = vpop.f32.mrb[14].mxu1  ;;  %v3527_v58 = vpop.f32.mrb[158].mxu0  ;;  %v3144_v40 = vmax.bf16 %v3016_v14, %v2888_v1  ;;  %v3907_v14 = vadd.s32 416, %v6139_v22 }
 0x372   : > { %v4542_v20 = vsel %vm4158_vm3, %v3525_v55, -inf  ;;  %v2723_v61 = vpack.c.bf16 %v2496_v60, %v2492_v15  ;;  %v3528_v33 = vadd.f32 %v7082_v48, %v3527_v58  ;;  %v2498_v47 = vpop.f32.mrb[15].mxu1  ;;  %v3529_v53 = vpop.f32.mrb[159].mxu0  ;;  %v3908_v60 = vadd.s32 424, %v6139_v22 }
 0x373   : > { %v4713_v32 = vsel %vm4624_vm5, %v4542_v20, -inf  ;;  %v2724_v27 = vpack.c.bf16 %v2498_v47, %v2494_v54  ;;  %3738 = vmatprep.mubr.bf16.mxu0 %v3144_v40  ;;  %v4036_v53 = vadd.s32 %v6875_v13, %v3907_v14 }
 0x374   : > { %v4720_v29 = vmax.f32 %v4713_v32, %v4718_v3  ;;  %v2889_v37 = vadd.bf16 %v6667_v5, %v2723_v61  ;;  %v4543_v11 = vsel %vm4159_vm4, %v3528_v33, -inf  ;;  %3739 = vmatmul.mubr.bf16.gmra.mrb[8].mxu0 %v3143_v52 }
 0x375   : > { %v4715_v63 = vsel %vm4624_vm5, %v4543_v11, -inf  ;;  %v2890_v2 = vadd.bf16 %v6670_v39, %v2724_v27  ;;  %v4037_v11 = vadd.s32 %v6875_v13, %v3908_v60  ;;  %vm4164_vm10 = vcmp.lt.s32.totalorder %v4036_v53, 2500 }
 0x376   : > { %v3017_v45 = vmul.bf16 1009007652, %v2889_v37  ;;  %v4722_v9 = vmax.f32 %v4715_v63, %v4720_v29 }
 0x377   : > { %v3018_v23 = vmul.bf16 1009007652, %v2890_v2  ;;  %v2502_v30 = vpop.f32.mrb[16].mxu1  ;;  %v3532_v19 = vpop.f32.mrb[160].mxu0  ;;  %vm4165_vm11 = vcmp.lt.s32.totalorder %v4037_v11, 2500 }
 0x378   : > { %v3533_v41 = vadd.f32 %v7082_v48, %v3532_v19  ;;  %v2504_v59 = vpop.f32.mrb[17].mxu1  ;;  %v3534_v24 = vpop.f32.mrb[161].mxu0  ;;  %v3145_v26 = vmax.bf16 %v3017_v45, %v2889_v37 }
 0x379   : > { %v2506_v25 = vpop.f32.mrb[18].mxu1  ;;  %v3535_v34 = vpop.f32.mrb[162].mxu0  ;;  %v3146_v38 = vmax.bf16 %v3018_v23, %v2890_v2  ;;  %v3909_v23 = vadd.s32 432, %v6139_v22 }
 0x37a   : > { %v4544_v31 = vsel %vm4160_vm6, %v3533_v41, -inf  ;;  %v2725_v21 = vpack.c.bf16 %v2506_v25, %v2502_v30  ;;  %v3536_v28 = vadd.f32 %v7082_v48, %v3535_v34  ;;  %v2508_v16 = vpop.f32.mrb[19].mxu1  ;;  %v3537_v36 = vpop.f32.mrb[163].mxu0  ;;  %v3910_v25 = vadd.s32 440, %v6139_v22 }
 0x37b   : > { %v4717_v46 = vsel %vm4624_vm5, %v4544_v31, -inf  ;;  %v2726_v6 = vpack.c.bf16 %v2508_v16, %v2504_v59  ;;  %3746 = vmatprep.mubr.bf16.mxu0 %v3146_v38  ;;  %v4038_v36 = vadd.s32 %v6875_v13, %v3909_v23 }
 0x37c   : > { %v4724_v49 = vmax.f32 %v4717_v46, %v4722_v9  ;;  %v2891_v62 = vadd.bf16 %v6667_v5, %v2725_v21  ;;  %v4545_v7 = vsel %vm4161_vm7, %v3536_v28, -inf  ;;  %3747 = vmatmul.mubr.bf16.gmra.mrb[12].mxu0 %v3145_v26 }
 0x37d   : > { %v4719_v51 = vsel %vm4624_vm5, %v4545_v7, -inf  ;;  %v2892_v43 = vadd.bf16 %v6670_v39, %v2726_v6  ;;  %v4039_v7 = vadd.s32 %v6875_v13, %v3910_v25  ;;  %vm4166_vm12 = vcmp.lt.s32.totalorder %v4038_v36, 2500 }
 0x37e   : > { %v3019_v17 = vmul.bf16 1009007652, %v2891_v62  ;;  %v4726_v1 = vmax.f32 %v4719_v51, %v4724_v49 }
 0x37f   : > { %v3020_v8 = vmul.bf16 1009007652, %v2892_v43  ;;  %v2512_v42 = vpop.f32.mrb[20].mxu1  ;;  %v3540_v3 = vpop.f32.mrb[164].mxu0  ;;  %vm4167_vm13 = vcmp.lt.s32.totalorder %v4039_v7, 2500 }
 0x380   : > { %v3541_v15 = vadd.f32 %v7082_v48, %v3540_v3  ;;  %v2514_v18 = vpop.f32.mrb[21].mxu1  ;;  %v3542_v4 = vpop.f32.mrb[165].mxu0  ;;  %v3147_v58 = vmax.bf16 %v3019_v17, %v2891_v62 }
 0x381   : > { %v2516_v55 = vpop.f32.mrb[22].mxu1  ;;  %v3543_v54 = vpop.f32.mrb[166].mxu0  ;;  %v3148_v50 = vmax.bf16 %v3020_v8, %v2892_v43  ;;  %v3911_v8 = vadd.s32 448, %v6139_v22 }
 0x382   : > { %v4546_v40 = vsel %vm4162_vm8, %v3541_v15, -inf  ;;  %v2727_v35 = vpack.c.bf16 %v2516_v55, %v2512_v42  ;;  %v3544_v52 = vadd.f32 %v7082_v48, %v3543_v54  ;;  %v2518_v20 = vpop.f32.mrb[23].mxu1  ;;  %v3545_v61 = vpop.f32.mrb[167].mxu0  ;;  %v3912_v55 = vadd.s32 456, %v6139_v22 }
 0x383   : > { %v4721_v33 = vsel %vm4624_vm5, %v4546_v40, -inf  ;;  %v2728_v47 = vpack.c.bf16 %v2518_v20, %v2514_v18  ;;  %3754 = vmatprep.mubr.bf16.mxu0 %v3148_v50  ;;  %v4040_v61 = vadd.s32 %v6875_v13, %v3911_v8 }
 0x384   : > { %v4728_v32 = vmax.f32 %v4721_v33, %v4726_v1  ;;  %v2893_v27 = vadd.bf16 %v6667_v5, %v2727_v35  ;;  %v4547_v12 = vsel %vm4163_vm9, %v3544_v52, -inf  ;;  %3755 = vmatmul.mubr.bf16.gmra.mrb[16].mxu0 %v3147_v58 }
 0x385   : > { %v4723_v29 = vsel %vm4624_vm5, %v4547_v12, -inf  ;;  %v2894_v37 = vadd.bf16 %v6670_v39, %v2728_v47  ;;  %v4041_v12 = vadd.s32 %v6875_v13, %v3912_v55  ;;  %vm4168_vm14 = vcmp.lt.s32.totalorder %v4040_v61, 2500 }
 0x386   : > { %v3021_v63 = vmul.bf16 1009007652, %v2893_v27  ;;  %v4730_v2 = vmax.f32 %v4723_v29, %v4728_v32 }
 0x387   : > { %v3022_v57 = vmul.bf16 1009007652, %v2894_v37  ;;  %v2522_v45 = vpop.f32.mrb[24].mxu1  ;;  %v3548_v9 = vpop.f32.mrb[168].mxu0  ;;  %vm4169_vm15 = vcmp.lt.s32.totalorder %v4041_v12, 2500 }
 0x388   : > { %v3549_v30 = vadd.f32 %v7082_v48, %v3548_v9  ;;  %v2524_v19 = vpop.f32.mrb[25].mxu1  ;;  %v3550_v0 = vpop.f32.mrb[169].mxu0  ;;  %v3149_v34 = vmax.bf16 %v3021_v63, %v2893_v27 }
 0x389   : > { %v2526_v41 = vpop.f32.mrb[26].mxu1  ;;  %v3551_v59 = vpop.f32.mrb[170].mxu0  ;;  %v3150_v24 = vmax.bf16 %v3022_v57, %v2894_v37  ;;  %v3913_v57 = vadd.s32 464, %v6139_v22 }
 0x38a   : > { %v4548_v38 = vsel %vm4164_vm10, %v3549_v30, -inf  ;;  %v2729_v56 = vpack.c.bf16 %v2526_v41, %v2522_v45  ;;  %v3552_v26 = vadd.f32 %v7082_v48, %v3551_v59  ;;  %v2528_v31 = vpop.f32.mrb[27].mxu1  ;;  %v3553_v21 = vpop.f32.mrb[171].mxu0  ;;  %v3914_v41 = vadd.s32 472, %v6139_v22 }
 0x38b   : > { %v4725_v28 = vsel %vm4624_vm5, %v4548_v38, -inf  ;;  %v2730_v16 = vpack.c.bf16 %v2528_v31, %v2524_v19  ;;  %3762 = vmatprep.mubr.bf16.mxu0 %v3150_v24  ;;  %v4042_v21 = vadd.s32 %v6875_v13, %v3913_v57 }
 0x38c   : > { %v4732_v46 = vmax.f32 %v4725_v28, %v4730_v2  ;;  %v2895_v6 = vadd.bf16 %v6667_v5, %v2729_v56  ;;  %v4549_v10 = vsel %vm4165_vm11, %v3552_v26, -inf  ;;  %3763 = vmatmul.mubr.bf16.gmra.mrb[20].mxu0 %v3149_v34 }
 0x38d   : > { %v4727_v49 = vsel %vm4624_vm5, %v4549_v10, -inf  ;;  %v2896_v62 = vadd.bf16 %v6670_v39, %v2730_v16  ;;  %v4043_v10 = vadd.s32 %v6875_v13, %v3914_v41  ;;  %vm4170_vm0 = vcmp.lt.s32.totalorder %v4042_v21, 2500 }
 0x38e   : > { %v3023_v51 = vmul.bf16 1009007652, %v2895_v6  ;;  %v4734_v43 = vmax.f32 %v4727_v49, %v4732_v46 }
 0x38f   : > { %v3024_v44 = vmul.bf16 1009007652, %v2896_v62  ;;  %v2532_v17 = vpop.f32.mrb[28].mxu1  ;;  %v3556_v1 = vpop.f32.mrb[172].mxu0  ;;  %vm4171_vm1 = vcmp.lt.s32.totalorder %v4043_v10, 2500 }
 0x390   : > { %v3557_v42 = vadd.f32 %v7082_v48, %v3556_v1  ;;  %v2534_v3 = vpop.f32.mrb[29].mxu1  ;;  %v3558_v14 = vpop.f32.mrb[173].mxu0  ;;  %v3151_v54 = vmax.bf16 %v3023_v51, %v2895_v6 }
 0x391   : > { %v2536_v15 = vpop.f32.mrb[30].mxu1  ;;  %v3559_v18 = vpop.f32.mrb[174].mxu0  ;;  %v3152_v4 = vmax.bf16 %v3024_v44, %v2896_v62  ;;  %v3915_v44 = vadd.s32 480, %v6139_v22 }
 0x392   : > { %v4550_v50 = vsel %vm4166_vm12, %v3557_v42, -inf  ;;  %v2731_v60 = vpack.c.bf16 %v2536_v15, %v2532_v17  ;;  %v3560_v58 = vadd.f32 %v7082_v48, %v3559_v18  ;;  %v2538_v40 = vpop.f32.mrb[31].mxu1  ;;  %v3561_v35 = vpop.f32.mrb[175].mxu0  ;;  %v3916_v15 = vadd.s32 488, %v6139_v22 }
 0x393   : > { %v4729_v52 = vsel %vm4624_vm5, %v4550_v50, -inf  ;;  %v2732_v20 = vpack.c.bf16 %v2538_v40, %v2534_v3  ;;  %3770 = vmatprep.mubr.bf16.mxu0 %v3152_v4  ;;  %v4044_v35 = vadd.s32 %v6875_v13, %v3915_v44 }
 0x394   : > { %v4736_v33 = vmax.f32 %v4729_v52, %v4734_v43  ;;  %v2897_v47 = vadd.bf16 %v6667_v5, %v2731_v60  ;;  %v4551_v53 = vsel %vm4167_vm13, %v3560_v58, -inf  ;;  %3771 = vmatmul.mubr.bf16.gmra.mrb[24].mxu0 %v3151_v54 }
 0x395   : > { %v4731_v32 = vsel %vm4624_vm5, %v4551_v53, -inf  ;;  %v2898_v27 = vadd.bf16 %v6670_v39, %v2732_v20  ;;  %v4045_v53 = vadd.s32 %v6875_v13, %v3916_v15  ;;  %vm4172_vm2 = vcmp.lt.s32.totalorder %v4044_v35, 2500 }
 0x396   : > { %v3025_v29 = vmul.bf16 1009007652, %v2897_v47  ;;  %v4738_v37 = vmax.f32 %v4731_v32, %v4736_v33 }
 0x397   : > { %v3026_v11 = vmul.bf16 1009007652, %v2898_v27  ;;  %v2542_v63 = vpop.f32.mrb[32].mxu1  ;;  %v3564_v2 = vpop.f32.mrb[176].mxu0  ;;  %vm4173_vm3 = vcmp.lt.s32.totalorder %v4045_v53, 2500 }
 0x398   : > { %v3565_v45 = vadd.f32 %v7082_v48, %v3564_v2  ;;  %v2544_v9 = vpop.f32.mrb[33].mxu1  ;;  %v3566_v23 = vpop.f32.mrb[177].mxu0  ;;  %v3153_v59 = vmax.bf16 %v3025_v29, %v2897_v47 }
 0x399   : > { %v2546_v30 = vpop.f32.mrb[34].mxu1  ;;  %v3567_v19 = vpop.f32.mrb[178].mxu0  ;;  %v3154_v0 = vmax.bf16 %v3026_v11, %v2898_v27  ;;  %v3917_v11 = vadd.s32 496, %v6139_v22 }
 0x39a   : > { %v4552_v24 = vsel %vm4168_vm14, %v3565_v45, -inf  ;;  %v2733_v25 = vpack.c.bf16 %v2546_v30, %v2542_v63  ;;  %v3568_v34 = vadd.f32 %v7082_v48, %v3567_v19  ;;  %v2548_v38 = vpop.f32.mrb[35].mxu1  ;;  %v3569_v56 = vpop.f32.mrb[179].mxu0  ;;  %v3918_v30 = vadd.s32 504, %v6139_v22 }
 0x39b   : > { %v4733_v26 = vsel %vm4624_vm5, %v4552_v24, -inf  ;;  %v2734_v31 = vpack.c.bf16 %v2548_v38, %v2544_v9  ;;  %3778 = vmatprep.mubr.bf16.mxu0 %v3154_v0  ;;  %v4046_v56 = vadd.s32 %v6875_v13, %v3917_v11 }
 0x39c   : > { %v4740_v28 = vmax.f32 %v4733_v26, %v4738_v37  ;;  %v2899_v16 = vadd.bf16 %v6667_v5, %v2733_v25  ;;  %v4553_v36 = vsel %vm4169_vm15, %v3568_v34, -inf  ;;  %3779 = vmatmul.mubr.bf16.gmra.mrb[28].mxu0 %v3153_v59 }
 0x39d   : > { %v4735_v46 = vsel %vm4624_vm5, %v4553_v36, -inf  ;;  %v2900_v6 = vadd.bf16 %v6670_v39, %v2734_v31  ;;  %v4047_v36 = vadd.s32 %v6875_v13, %v3918_v30  ;;  %vm4174_vm4 = vcmp.lt.s32.totalorder %v4046_v56, 2500 }
 0x39e   : > { %v3027_v49 = vmul.bf16 1009007652, %v2899_v16  ;;  %v4742_v62 = vmax.f32 %v4735_v46, %v4740_v28 }
 0x39f   : > { %v3028_v7 = vmul.bf16 1009007652, %v2900_v6  ;;  %v2552_v51 = vpop.f32.mrb[36].mxu1  ;;  %v3572_v43 = vpop.f32.mrb[180].mxu0  ;;  %vm4175_vm6 = vcmp.lt.s32.totalorder %v4047_v36, 2500 }
 0x3a0   : > { %v3573_v17 = vadd.f32 %v7082_v48, %v3572_v43  ;;  %v2554_v1 = vpop.f32.mrb[37].mxu1  ;;  %v3574_v8 = vpop.f32.mrb[181].mxu0  ;;  %v3155_v18 = vmax.bf16 %v3027_v49, %v2899_v16 }
 0x3a1   : > { %v2556_v42 = vpop.f32.mrb[38].mxu1  ;;  %v3575_v3 = vpop.f32.mrb[182].mxu0  ;;  %v3156_v14 = vmax.bf16 %v3028_v7, %v2900_v6  ;;  %v3919_v7 = vadd.s32 512, %v6139_v22 }
 0x3a2   : > { %v4554_v4 = vsel %vm4170_vm0, %v3573_v17, -inf  ;;  %v2735_v55 = vpack.c.bf16 %v2556_v42, %v2552_v51  ;;  %v3576_v54 = vadd.f32 %v7082_v48, %v3575_v3  ;;  %v2558_v50 = vpop.f32.mrb[39].mxu1  ;;  %v3577_v60 = vpop.f32.mrb[183].mxu0  ;;  %v3920_v42 = vadd.s32 520, %v6139_v22 }
 0x3a3   : > { %v4737_v58 = vsel %vm4624_vm5, %v4554_v4, -inf  ;;  %v2736_v40 = vpack.c.bf16 %v2558_v50, %v2554_v1  ;;  %3786 = vmatprep.mubr.bf16.mxu0 %v3156_v14  ;;  %v4048_v60 = vadd.s32 %v6875_v13, %v3919_v7 }
 0x3a4   : > { %v4744_v52 = vmax.f32 %v4737_v58, %v4742_v62  ;;  %v2901_v20 = vadd.bf16 %v6667_v5, %v2735_v55  ;;  %v4555_v61 = vsel %vm4171_vm1, %v3576_v54, -inf  ;;  %3787 = vmatmul.mubr.bf16.gmra.mrb[32].mxu0 %v3155_v18  ;;  %v7248_v18 = vld [vmem:[%s7591_s6] ss:$0 sm:$0xff] }
 0x3a5   : > { %v4739_v33 = vsel %vm4624_vm5, %v4555_v61, -inf  ;;  %v2902_v47 = vadd.bf16 %v6670_v39, %v2736_v40  ;;  %v4049_v61 = vadd.s32 %v6875_v13, %v3920_v42  ;;  %vm4176_vm7 = vcmp.lt.s32.totalorder %v4048_v60, 2500 }
 0x3a6   : > { %v3029_v32 = vmul.bf16 1009007652, %v2901_v20  ;;  %v4746_v27 = vmax.f32 %v4739_v33, %v4744_v52 }
 0x3a7   : > { %v3030_v12 = vmul.bf16 1009007652, %v2902_v47  ;;  %v2562_v29 = vpop.f32.mrb[40].mxu1  ;;  %v3580_v37 = vpop.f32.mrb[184].mxu0  ;;  %vm4177_vm8 = vcmp.lt.s32.totalorder %v4049_v61, 2500 }
 0x3a8   : > { %v3581_v63 = vadd.f32 %v7082_v48, %v3580_v37  ;;  %v2564_v2 = vpop.f32.mrb[41].mxu1  ;;  %v3582_v57 = vpop.f32.mrb[185].mxu0  ;;  %v3157_v19 = vmax.bf16 %v3029_v32, %v2901_v20 }
 0x3a9   : > { %v2566_v45 = vpop.f32.mrb[42].mxu1  ;;  %v3583_v9 = vpop.f32.mrb[186].mxu0  ;;  %v3158_v23 = vmax.bf16 %v3030_v12, %v2902_v47  ;;  %v3921_v12 = vadd.s32 528, %v6139_v22 }
 0x3aa   : > { %v4556_v0 = vsel %vm4172_vm2, %v3581_v63, -inf  ;;  %v2737_v41 = vpack.c.bf16 %v2566_v45, %v2562_v29  ;;  %v3584_v59 = vadd.f32 %v7082_v48, %v3583_v9  ;;  %v2568_v24 = vpop.f32.mrb[43].mxu1  ;;  %v3585_v25 = vpop.f32.mrb[187].mxu0  ;;  %v3922_v45 = vadd.s32 536, %v6139_v22 }
 0x3ab   : > { %v4741_v34 = vsel %vm4624_vm5, %v4556_v0, -inf  ;;  %v2738_v38 = vpack.c.bf16 %v2568_v24, %v2564_v2  ;;  %3794 = vmatprep.mubr.bf16.mxu0 %v3158_v23  ;;  %v4050_v25 = vadd.s32 %v6875_v13, %v3921_v12 }
 0x3ac   : > { %v4748_v26 = vmax.f32 %v4741_v34, %v4746_v27  ;;  %v2903_v31 = vadd.bf16 %v6667_v5, %v2737_v41  ;;  %v4557_v21 = vsel %vm4173_vm3, %v3584_v59, -inf  ;;  %3795 = vmatmul.mubr.bf16.gmra.mrb[36].mxu0 %v3157_v19 }
 0x3ad   : > { %v4743_v28 = vsel %vm4624_vm5, %v4557_v21, -inf  ;;  %v2904_v16 = vadd.bf16 %v6670_v39, %v2738_v38  ;;  %v4051_v21 = vadd.s32 %v6875_v13, %v3922_v45  ;;  %vm4178_vm9 = vcmp.lt.s32.totalorder %v4050_v25, 2500 }
 0x3ae   : > { %v3031_v46 = vmul.bf16 1009007652, %v2903_v31  ;;  %v4750_v6 = vmax.f32 %v4743_v28, %v4748_v26 }
 0x3af   : > { %v3032_v10 = vmul.bf16 1009007652, %v2904_v16  ;;  %v2572_v49 = vpop.f32.mrb[44].mxu1  ;;  %v3588_v62 = vpop.f32.mrb[188].mxu0  ;;  %vm4179_vm10 = vcmp.lt.s32.totalorder %v4051_v21, 2500 }
 0x3b0   : > { %v3589_v51 = vadd.f32 %v7082_v48, %v3588_v62  ;;  %v2574_v43 = vpop.f32.mrb[45].mxu1  ;;  %v3590_v44 = vpop.f32.mrb[189].mxu0  ;;  %v3159_v3 = vmax.bf16 %v3031_v46, %v2903_v31 }
 0x3b1   : > { %v2576_v17 = vpop.f32.mrb[46].mxu1  ;;  %v3591_v1 = vpop.f32.mrb[190].mxu0  ;;  %v3160_v8 = vmax.bf16 %v3032_v10, %v2904_v16  ;;  %v3923_v10 = vadd.s32 544, %v6139_v22 }
 0x3b2   : > { %v4558_v14 = vsel %vm4174_vm4, %v3589_v51, -inf  ;;  %v2739_v15 = vpack.c.bf16 %v2576_v17, %v2572_v49  ;;  %v3592_v4 = vadd.f32 %v7248_v18, %v3591_v1  ;;  %v2578_v55 = vpop.f32.mrb[47].mxu1  ;;  %v3593_v48 = vpop.f32.mrb[191].mxu0  ;;  %v3924_v17 = vadd.s32 552, %v6139_v22 }
 0x3b3   : > { %v4745_v54 = vsel %vm4624_vm5, %v4558_v14, -inf  ;;  %v2740_v50 = vpack.c.bf16 %v2578_v55, %v2574_v43  ;;  %3802 = vmatprep.mubr.bf16.mxu0 %v3160_v8  ;;  %v4052_v48 = vadd.s32 %v6875_v13, %v3923_v10 }
 0x3b4   : > { %v4752_v58 = vmax.f32 %v4745_v54, %v4750_v6  ;;  %v2905_v40 = vadd.bf16 %v6667_v5, %v2739_v15  ;;  %v4559_v35 = vsel %vm4175_vm6, %v3592_v4, -inf  ;;  %3803 = vmatmul.mubr.bf16.gmra.mrb[40].mxu0 %v3159_v3 }
 0x3b5   : > { %v4747_v52 = vsel %vm4624_vm5, %v4559_v35, -inf  ;;  %v2906_v20 = vadd.bf16 %v6670_v39, %v2740_v50  ;;  %v4053_v35 = vadd.s32 %v6875_v13, %v3924_v17  ;;  %vm4180_vm11 = vcmp.lt.s32.totalorder %v4052_v48, 2500 }
 0x3b6   : > { %v3033_v33 = vmul.bf16 1009007652, %v2905_v40  ;;  %v4754_v47 = vmax.f32 %v4747_v52, %v4752_v58 }
 0x3b7   : > { %v3034_v53 = vmul.bf16 1009007652, %v2906_v20  ;;  %v2582_v32 = vpop.f32.mrb[48].mxu1  ;;  %v3596_v27 = vpop.f32.mrb[192].mxu0  ;;  %vm4181_vm12 = vcmp.lt.s32.totalorder %v4053_v35, 2500 }
 0x3b8   : > { %v3597_v29 = vadd.f32 %v7248_v18, %v3596_v27  ;;  %v2584_v37 = vpop.f32.mrb[49].mxu1  ;;  %v3598_v11 = vpop.f32.mrb[193].mxu0  ;;  %v3161_v9 = vmax.bf16 %v3033_v33, %v2905_v40 }
 0x3b9   : > { %v2586_v63 = vpop.f32.mrb[50].mxu1  ;;  %v3599_v2 = vpop.f32.mrb[194].mxu0  ;;  %v3162_v57 = vmax.bf16 %v3034_v53, %v2906_v20  ;;  %v3925_v53 = vadd.s32 560, %v6139_v22 }
 0x3ba   : > { %v4560_v23 = vsel %vm4176_vm7, %v3597_v29, -inf  ;;  %v2741_v30 = vpack.c.bf16 %v2586_v63, %v2582_v32  ;;  %v3600_v19 = vadd.f32 %v7248_v18, %v3599_v2  ;;  %v2588_v0 = vpop.f32.mrb[51].mxu1  ;;  %v3601_v41 = vpop.f32.mrb[195].mxu0  ;;  %v3926_v63 = vadd.s32 568, %v6139_v22 }
 0x3bb   : > { %v4749_v59 = vsel %vm4624_vm5, %v4560_v23, -inf  ;;  %v2742_v24 = vpack.c.bf16 %v2588_v0, %v2584_v37  ;;  %3810 = vmatprep.mubr.bf16.mxu0 %v3162_v57  ;;  %v4054_v41 = vadd.s32 %v6875_v13, %v3925_v53  ;;  %v3930_v53 = vadd.s32 600, %v6139_v22 }
 0x3bc   : > { %v4756_v34 = vmax.f32 %v4749_v59, %v4754_v47  ;;  %v2907_v38 = vadd.bf16 %v6667_v5, %v2741_v30  ;;  %v4561_v56 = vsel %vm4177_vm8, %v3600_v19, -inf  ;;  %3811 = vmatmul.mubr.bf16.gmra.mrb[44].mxu0 %v3161_v9 }
 0x3bd   : > { %v4751_v26 = vsel %vm4624_vm5, %v4561_v56, -inf  ;;  %v2908_v31 = vadd.bf16 %v6670_v39, %v2742_v24  ;;  %v4055_v56 = vadd.s32 %v6875_v13, %v3926_v63  ;;  %vm4182_vm13 = vcmp.lt.s32.totalorder %v4054_v41, 2500 }
 0x3be   : > { %v3035_v28 = vmul.bf16 1009007652, %v2907_v38  ;;  %v4758_v16 = vmax.f32 %v4751_v26, %v4756_v34  ;;  %v3932_v41 = vadd.s32 616, %v6139_v22 }
 0x3bf   : > { %v3036_v36 = vmul.bf16 1009007652, %v2908_v31  ;;  %v2592_v46 = vpop.f32.mrb[52].mxu1  ;;  %v3604_v6 = vpop.f32.mrb[196].mxu0  ;;  %vm4183_vm14 = vcmp.lt.s32.totalorder %v4055_v56, 2500 }
 0x3c0   : > { %v3605_v49 = vadd.f32 %v7248_v18, %v3604_v6  ;;  %v2594_v62 = vpop.f32.mrb[53].mxu1  ;;  %v3606_v7 = vpop.f32.mrb[197].mxu0  ;;  %v3163_v1 = vmax.bf16 %v3035_v28, %v2907_v38 }
 0x3c1   : > { %v2596_v51 = vpop.f32.mrb[54].mxu1  ;;  %v3607_v43 = vpop.f32.mrb[198].mxu0  ;;  %v3164_v44 = vmax.bf16 %v3036_v36, %v2908_v31  ;;  %v3927_v36 = vadd.s32 576, %v6139_v22 }
 0x3c2   : > { %v4562_v8 = vsel %vm4178_vm9, %v3605_v49, -inf  ;;  %v2743_v42 = vpack.c.bf16 %v2596_v51, %v2592_v46  ;;  %v3608_v3 = vadd.f32 %v7248_v18, %v3607_v43  ;;  %v2598_v14 = vpop.f32.mrb[55].mxu1  ;;  %v3609_v15 = vpop.f32.mrb[199].mxu0  ;;  %v3928_v51 = vadd.s32 584, %v6139_v22 }
 0x3c3   : > { %v4753_v4 = vsel %vm4624_vm5, %v4562_v8, -inf  ;;  %v2744_v55 = vpack.c.bf16 %v2598_v14, %v2594_v62  ;;  %3818 = vmatprep.mubr.bf16.mxu0 %v3164_v44  ;;  %v4056_v15 = vadd.s32 %v6875_v13, %v3927_v36  ;;  %v3933_v36 = vadd.s32 624, %v6139_v22 }
 0x3c4   : > { %v4760_v54 = vmax.f32 %v4753_v4, %v4758_v16  ;;  %v2909_v50 = vadd.bf16 %v6667_v5, %v2743_v42  ;;  %v4563_v60 = vsel %vm4179_vm10, %v3608_v3, -inf  ;;  %3819 = vmatmul.mubr.bf16.gmra.mrb[48].mxu0 %v3163_v1 }
 0x3c5   : > { %v4755_v58 = vsel %vm4624_vm5, %v4563_v60, -inf  ;;  %v2910_v40 = vadd.bf16 %v6670_v39, %v2744_v55  ;;  %v4057_v60 = vadd.s32 %v6875_v13, %v3928_v51  ;;  %vm4184_vm15 = vcmp.lt.s32.totalorder %v4056_v15, 2500 }
 0x3c6   : > { %v3037_v52 = vmul.bf16 1009007652, %v2909_v50  ;;  %v4762_v20 = vmax.f32 %v4755_v58, %v4760_v54  ;;  %v3935_v15 = vadd.s32 640, %v6139_v22 }
 0x3c7   : > { %v3038_v61 = vmul.bf16 1009007652, %v2910_v40  ;;  %v2602_v33 = vpop.f32.mrb[56].mxu1  ;;  %v3612_v47 = vpop.f32.mrb[200].mxu0  ;;  %vm4185_vm0 = vcmp.lt.s32.totalorder %v4057_v60, 2500 }
 0x3c8   : > { %v3613_v32 = vadd.f32 %v7248_v18, %v3612_v47  ;;  %v2604_v27 = vpop.f32.mrb[57].mxu1  ;;  %v3614_v12 = vpop.f32.mrb[201].mxu0  ;;  %v3165_v2 = vmax.bf16 %v3037_v52, %v2909_v50 }
 0x3c9   : > { %v2606_v29 = vpop.f32.mrb[58].mxu1  ;;  %v3615_v37 = vpop.f32.mrb[202].mxu0  ;;  %v3166_v11 = vmax.bf16 %v3038_v61, %v2910_v40 }
 0x3ca   : > { %v4564_v57 = vsel %vm4180_vm11, %v3613_v32, -inf  ;;  %v2745_v45 = vpack.c.bf16 %v2606_v29, %v2602_v33  ;;  %v3616_v9 = vadd.f32 %v7248_v18, %v3615_v37  ;;  %v2608_v23 = vpop.f32.mrb[59].mxu1  ;;  %v3617_v30 = vpop.f32.mrb[203].mxu0 }
 0x3cb   : > { %v4757_v19 = vsel %vm4624_vm5, %v4564_v57, -inf  ;;  %v2746_v0 = vpack.c.bf16 %v2608_v23, %v2604_v27  ;;  %3826 = vmatprep.mubr.bf16.mxu0 %v3166_v11  ;;  %v4059_v57 = vadd.s32 %v6875_v13, %v3930_v53  ;;  %v3931_v23 = vadd.s32 608, %v6139_v22 }
 0x3cc   : > { %v4764_v59 = vmax.f32 %v4757_v19, %v4762_v20  ;;  %v2911_v24 = vadd.bf16 %v6667_v5, %v2745_v45  ;;  %v4565_v25 = vsel %vm4181_vm12, %v3616_v9, -inf  ;;  %3827 = vmatmul.mubr.bf16.gmra.mrb[52].mxu0 %v3165_v2  ;;  %v3929_v20 = vadd.s32 592, %v6139_v22 }
 0x3cd   : > { %v4759_v34 = vsel %vm4624_vm5, %v4565_v25, -inf  ;;  %v2912_v38 = vadd.bf16 %v6670_v39, %v2746_v0  ;;  %vm4187_vm2 = vcmp.lt.s32.totalorder %v4059_v57, 2500  ;;  %v3937_v53 = vadd.s32 656, %v6139_v22 }
 0x3ce   : > { %v3039_v26 = vmul.bf16 1009007652, %v2911_v24  ;;  %v4766_v31 = vmax.f32 %v4759_v34, %v4764_v59  ;;  %v4058_v37 = vadd.s32 %v6875_v13, %v3929_v20 }
 0x3cf   : > { %v3040_v21 = vmul.bf16 1009007652, %v2912_v38  ;;  %v2612_v28 = vpop.f32.mrb[60].mxu1  ;;  %v3620_v16 = vpop.f32.mrb[204].mxu0 }
 0x3d0   : > { %v3621_v46 = vadd.f32 %v7248_v18, %v3620_v16  ;;  %v2614_v6 = vpop.f32.mrb[61].mxu1  ;;  %v3622_v10 = vpop.f32.mrb[205].mxu0  ;;  %v3167_v43 = vmax.bf16 %v3039_v26, %v2911_v24  ;;  %vm4186_vm1 = vcmp.lt.s32.totalorder %v4058_v37, 2500 }
 0x3d1   : > { %v2616_v49 = vpop.f32.mrb[62].mxu1  ;;  %v3623_v62 = vpop.f32.mrb[206].mxu0  ;;  %v3168_v7 = vmax.bf16 %v3040_v21, %v2912_v38  ;;  %v4060_v38 = vadd.s32 %v6875_v13, %v3931_v23  ;;  %v4061_v21 = vadd.s32 %v6875_v13, %v3932_v41 }
 0x3d2   : > { %v4566_v44 = vsel %vm4182_vm13, %v3621_v46, -inf  ;;  %v2747_v17 = vpack.c.bf16 %v2616_v49, %v2612_v28  ;;  %v3624_v1 = vadd.f32 %v7248_v18, %v3623_v62  ;;  %v2618_v8 = vpop.f32.mrb[63].mxu1  ;;  %v3625_v42 = vpop.f32.mrb[207].mxu0  ;;  %v3934_v49 = vadd.s32 632, %v6139_v22 }
 0x3d3   : > { %v4761_v3 = vsel %vm4624_vm5, %v4566_v44, -inf  ;;  %v2748_v14 = vpack.c.bf16 %v2618_v8, %v2614_v6  ;;  %3834 = vmatprep.mubr.bf16.mxu0 %v3168_v7  ;;  %vm4188_vm3 = vcmp.lt.s32.totalorder %v4060_v38, 2500  ;;  %vm4189_vm4 = vcmp.lt.s32.totalorder %v4061_v21, 2500 }
 0x3d4   : > { %v4768_v4 = vmax.f32 %v4761_v3, %v4766_v31  ;;  %v2913_v55 = vadd.bf16 %v6667_v5, %v2747_v17  ;;  %v4567_v48 = vsel %vm4183_vm14, %v3624_v1, -inf  ;;  %3835 = vmatmul.mubr.bf16.gmra.mrb[56].mxu0 %v3167_v43  ;;  %v4062_v44 = vadd.s32 %v6875_v13, %v3933_v36 }
 0x3d5   : > { %v4763_v54 = vsel %vm4624_vm5, %v4567_v48, -inf  ;;  %v2914_v50 = vadd.bf16 %v6670_v39, %v2748_v14  ;;  %v4063_v42 = vadd.s32 %v6875_v13, %v3934_v49 }
 0x3d6   : > { %v3041_v58 = vmul.bf16 1009007652, %v2913_v55  ;;  %v4770_v40 = vmax.f32 %v4763_v54, %v4768_v4  ;;  %vm4190_vm6 = vcmp.lt.s32.totalorder %v4062_v44, 2500  ;;  %v3936_v54 = vadd.s32 648, %v6139_v22 }
 0x3d7   : > { %v3042_v35 = vmul.bf16 1009007652, %v2914_v50  ;;  %v3628_v52 = vpop.f32.mrb[208].mxu0  ;;  %vm4191_vm7 = vcmp.lt.s32.totalorder %v4063_v42, 2500 }
 0x3d8   : > { %v3629_v61 = vadd.f32 %v7248_v18, %v3628_v52  ;;  %v3630_v33 = vpop.f32.mrb[209].mxu0  ;;  %v3169_v32 = vmax.bf16 %v3041_v58, %v2913_v55 }
 0x3d9   : > { %v3631_v47 = vpop.f32.mrb[210].mxu0  ;;  %v3170_v5 = vmax.bf16 %v3042_v35, %v2914_v50  ;;  %v4064_v35 = vadd.s32 %v6875_v13, %v3935_v15  ;;  %v4065_v33 = vadd.s32 %v6875_v13, %v3936_v54 }
 0x3da   : > { %v4568_v27 = vsel %vm4184_vm15, %v3629_v61, -inf  ;;  %v3632_v39 = vadd.f32 %v7248_v18, %v3631_v47  ;;  %v3633_v12 = vpop.f32.mrb[211].mxu0 }
 0x3db   : > { %v4765_v29 = vsel %vm4624_vm5, %v4568_v27, -inf  ;;  %3842 = vmatprep.mubr.bf16.mxu0 %v3170_v5  ;;  %vm4192_vm8 = vcmp.lt.s32.totalorder %v4064_v35, 2500  ;;  %vm4193_vm9 = vcmp.lt.s32.totalorder %v4065_v33, 2500  ;;  %v3938_v12 = vadd.s32 664, %v6139_v22 }
 0x3dc   : > { %v4772_v11 = vmax.f32 %v4765_v29, %v4770_v40  ;;  %v4569_v63 = vsel %vm4185_vm0, %v3632_v39, -inf  ;;  %3843 = vmatmul.mubr.bf16.gmra.mrb[60].mxu0 %v3169_v32 }
 0x3dd   : > { %v4767_v2 = vsel %vm4624_vm5, %v4569_v63, -inf  ;;  %v4067_v23 = vadd.s32 %v6875_v13, %v3938_v12 }
 0x3de   : > { %v4774_v45 = vmax.f32 %v4767_v2, %v4772_v11  ;;  %v4066_v2 = vadd.s32 %v6875_v13, %v3937_v53 }
 0x3df   : > { %v3636_v9 = vpop.f32.mrb[212].mxu0  ;;  %vm4195_vm11 = vcmp.lt.s32.totalorder %v4067_v23, 2500 }
 0x3e0   : > { %v3637_v30 = vadd.f32 %v7248_v18, %v3636_v9  ;;  %v3638_v19 = vpop.f32.mrb[213].mxu0  ;;  %vm4194_vm10 = vcmp.lt.s32.totalorder %v4066_v2, 2500 }
 0x3e1   : > { %v3639_v0 = vpop.f32.mrb[214].mxu0 }
 0x3e2   : > { %v4570_v59 = vsel %vm4186_vm1, %v3637_v30, -inf  ;;  %v3640_v24 = vadd.f32 %v7248_v18, %v3639_v0  ;;  %v3641_v25 = vpop.f32.mrb[215].mxu0  ;;  %v3939_v0 = vadd.s32 672, %v6139_v22 }
 0x3e3   : > { %v4769_v34 = vsel %vm4624_vm5, %v4570_v59, -inf  ;;  %v3940_v25 = vadd.s32 680, %v6139_v22 }
 0x3e4   : > { %v4776_v56 = vmax.f32 %v4769_v34, %v4774_v45  ;;  %v4571_v26 = vsel %vm4187_vm2, %v3640_v24, -inf }
 0x3e5   : > { %v4771_v31 = vsel %vm4624_vm5, %v4571_v26, -inf  ;;  %v4069_v36 = vadd.s32 %v6875_v13, %v3940_v25 }
 0x3e6   : > { %v4778_v28 = vmax.f32 %v4771_v31, %v4776_v56  ;;  %v4068_v31 = vadd.s32 %v6875_v13, %v3939_v0 }
 0x3e7   : > { %v3644_v16 = vpop.f32.mrb[216].mxu0  ;;  %vm4197_vm13 = vcmp.lt.s32.totalorder %v4069_v36, 2500 }
 0x3e8   : > { %v3645_v46 = vadd.f32 %v7248_v18, %v3644_v16  ;;  %v3646_v6 = vpop.f32.mrb[217].mxu0  ;;  %vm4196_vm12 = vcmp.lt.s32.totalorder %v4068_v31, 2500 }
 0x3e9   : > { %v3647_v10 = vpop.f32.mrb[218].mxu0 }
 0x3ea   : > { %v4572_v62 = vsel %vm4188_vm3, %v3645_v46, -inf  ;;  %v3648_v7 = vadd.f32 %v7248_v18, %v3647_v10  ;;  %v3649_v51 = vpop.f32.mrb[219].mxu0  ;;  %v3941_v10 = vadd.s32 688, %v6139_v22 }
 0x3eb   : > { %v4773_v43 = vsel %vm4624_vm5, %v4572_v62, -inf  ;;  %v3942_v51 = vadd.s32 696, %v6139_v22 }
 0x3ec   : > { %v4780_v17 = vmax.f32 %v4773_v43, %v4778_v28  ;;  %v4573_v1 = vsel %vm4189_vm4, %v3648_v7, -inf }
 0x3ed   : > { %v4775_v8 = vsel %vm4624_vm5, %v4573_v1, -inf  ;;  %v4071_v15 = vadd.s32 %v6875_v13, %v3942_v51 }
 0x3ee   : > { %v4782_v3 = vmax.f32 %v4775_v8, %v4780_v17  ;;  %v4070_v8 = vadd.s32 %v6875_v13, %v3941_v10 }
 0x3ef   : > { %v3652_v14 = vpop.f32.mrb[220].mxu0  ;;  %vm4199_vm15 = vcmp.lt.s32.totalorder %v4071_v15, 2500 }
 0x3f0   : > { %v3653_v4 = vadd.f32 %v7248_v18, %v3652_v14  ;;  %v3654_v55 = vpop.f32.mrb[221].mxu0  ;;  %vm4198_vm14 = vcmp.lt.s32.totalorder %v4070_v8, 2500 }
 0x3f1   : > { %v3655_v48 = vpop.f32.mrb[222].mxu0 }
 0x3f2   : > { %v4574_v50 = vsel %vm4190_vm6, %v3653_v4, -inf  ;;  %v3656_v60 = vadd.f32 %v7248_v18, %v3655_v48  ;;  %v3657_v58 = vpop.f32.mrb[223].mxu0  ;;  %v3943_v48 = vadd.s32 704, %v6139_v22 }
 0x3f3   : > { %v4777_v40 = vsel %vm4624_vm5, %v4574_v50, -inf  ;;  %v3944_v58 = vadd.s32 712, %v6139_v22 }
 0x3f4   : > { %v4784_v52 = vmax.f32 %v4777_v40, %v4782_v3  ;;  %v4575_v20 = vsel %vm4191_vm7, %v3656_v60, -inf }
 0x3f5   : > { %v4779_v61 = vsel %vm4624_vm5, %v4575_v20, -inf  ;;  %v4073_v53 = vadd.s32 %v6875_v13, %v3944_v58 }
 0x3f6   : > { %v4786_v47 = vmax.f32 %v4779_v61, %v4784_v52  ;;  %v4072_v61 = vadd.s32 %v6875_v13, %v3943_v48 }
 0x3f7   : > { %v3660_v5 = vpop.f32.mrb[224].mxu0  ;;  %vm4201_vm1 = vcmp.lt.s32.totalorder %v4073_v53, 2500 }
 0x3f8   : > { %v3661_v32 = vadd.f32 %v7248_v18, %v3660_v5  ;;  %v3662_v27 = vpop.f32.mrb[225].mxu0  ;;  %vm4200_vm0 = vcmp.lt.s32.totalorder %v4072_v61, 2500 }
 0x3f9   : > { %v3663_v39 = vpop.f32.mrb[226].mxu0 }
 0x3fa   : > { %v4576_v29 = vsel %vm4192_vm8, %v3661_v32, -inf  ;;  %v3664_v37 = vadd.f32 %v7248_v18, %v3663_v39  ;;  %v3665_v11 = vpop.f32.mrb[227].mxu0  ;;  %v3945_v39 = vadd.s32 720, %v6139_v22 }
 0x3fb   : > { %v4781_v63 = vsel %vm4624_vm5, %v4576_v29, -inf  ;;  %v3946_v11 = vadd.s32 728, %v6139_v22 }
 0x3fc   : > { %v4788_v57 = vmax.f32 %v4781_v63, %v4786_v47  ;;  %v4577_v45 = vsel %vm4193_vm9, %v3664_v37, -inf }
 0x3fd   : > { %v4783_v9 = vsel %vm4624_vm5, %v4577_v45, -inf  ;;  %v4075_v0 = vadd.s32 %v6875_v13, %v3946_v11 }
 0x3fe   : > { %v4790_v30 = vmax.f32 %v4783_v9, %v4788_v57  ;;  %v4074_v9 = vadd.s32 %v6875_v13, %v3945_v39 }
 0x3ff   : > { %v3668_v19 = vpop.f32.mrb[228].mxu0  ;;  %vm4203_vm3 = vcmp.lt.s32.totalorder %v4075_v0, 2500 }
 0x400   : > { %v3669_v41 = vadd.f32 %v7248_v18, %v3668_v19  ;;  %v3670_v59 = vpop.f32.mrb[229].mxu0  ;;  %vm4202_vm2 = vcmp.lt.s32.totalorder %v4074_v9, 2500 }
 0x401   : > { %v3671_v24 = vpop.f32.mrb[230].mxu0 }
 0x402   : > { %v4578_v34 = vsel %vm4194_vm10, %v3669_v41, -inf  ;;  %v3672_v38 = vadd.f32 %v7248_v18, %v3671_v24  ;;  %v3673_v56 = vpop.f32.mrb[231].mxu0  ;;  %v3947_v24 = vadd.s32 736, %v6139_v22 }
 0x403   : > { %v4785_v26 = vsel %vm4624_vm5, %v4578_v34, -inf  ;;  %v3948_v56 = vadd.s32 744, %v6139_v22 }
 0x404   : > { %v4792_v21 = vmax.f32 %v4785_v26, %v4790_v30  ;;  %v4579_v28 = vsel %vm4195_vm11, %v3672_v38, -inf }
 0x405   : > { %v4787_v16 = vsel %vm4624_vm5, %v4579_v28, -inf  ;;  %v4077_v10 = vadd.s32 %v6875_v13, %v3948_v56 }
 0x406   : > { %v4794_v46 = vmax.f32 %v4787_v16, %v4792_v21  ;;  %v4076_v16 = vadd.s32 %v6875_v13, %v3947_v24 }
 0x407   : > { %v3676_v6 = vpop.f32.mrb[232].mxu0  ;;  %vm4205_vm6 = vcmp.lt.s32.totalorder %v4077_v10, 2500 }
 0x408   : > { %v3677_v49 = vadd.f32 %v7248_v18, %v3676_v6  ;;  %v3678_v62 = vpop.f32.mrb[233].mxu0  ;;  %vm4204_vm4 = vcmp.lt.s32.totalorder %v4076_v16, 2500 }
 0x409   : > { %v3679_v7 = vpop.f32.mrb[234].mxu0 }
 0x40a   : > { %v4580_v43 = vsel %vm4196_vm12, %v3677_v49, -inf  ;;  %v3680_v44 = vadd.f32 %v7248_v18, %v3679_v7  ;;  %v3681_v17 = vpop.f32.mrb[235].mxu0  ;;  %v3949_v7 = vadd.s32 752, %v6139_v22 }
 0x40b   : > { %v4789_v1 = vsel %vm4624_vm5, %v4580_v43, -inf  ;;  %v3950_v17 = vadd.s32 760, %v6139_v22 }
 0x40c   : > { %v4796_v42 = vmax.f32 %v4789_v1, %v4794_v46  ;;  %v4581_v3 = vsel %vm4197_vm13, %v3680_v44, -inf }
 0x40d   : > { %v4791_v14 = vsel %vm4624_vm5, %v4581_v3, -inf  ;;  %v4079_v48 = vadd.s32 %v6875_v13, %v3950_v17 }
 0x40e   : > { %v4798_v4 = vmax.f32 %v4791_v14, %v4796_v42  ;;  %v4078_v14 = vadd.s32 %v6875_v13, %v3949_v7 }
 0x40f   : > { %v3684_v55 = vpop.f32.mrb[236].mxu0  ;;  %vm4207_vm8 = vcmp.lt.s32.totalorder %v4079_v48, 2500 }
 0x410   : > { %v3685_v54 = vadd.f32 %v7248_v18, %v3684_v55  ;;  %v3686_v50 = vpop.f32.mrb[237].mxu0  ;;  %vm4206_vm7 = vcmp.lt.s32.totalorder %v4078_v14, 2500 }
 0x411   : > { %v3687_v60 = vpop.f32.mrb[238].mxu0 }
 0x412   : > { %v4582_v40 = vsel %vm4198_vm14, %v3685_v54, -inf  ;;  %v3688_v35 = vadd.f32 %v7248_v18, %v3687_v60  ;;  %v3689_v52 = vpop.f32.mrb[239].mxu0  ;;  %v3951_v60 = vadd.s32 768, %v6139_v22 }
 0x413   : > { %v4793_v20 = vsel %vm4624_vm5, %v4582_v40, -inf  ;;  %v3952_v52 = vadd.s32 776, %v6139_v22 }
 0x414   : > { %v4800_v33 = vmax.f32 %v4793_v20, %v4798_v4  ;;  %v4583_v47 = vsel %vm4199_vm15, %v3688_v35, -inf }
 0x415   : > { %v4795_v5 = vsel %vm4624_vm5, %v4583_v47, -inf  ;;  %v4081_v39 = vadd.s32 %v6875_v13, %v3952_v52 }
 0x416   : > { %v4802_v32 = vmax.f32 %v4795_v5, %v4800_v33  ;;  %v4080_v5 = vadd.s32 %v6875_v13, %v3951_v60 }
 0x417   : > { %v3692_v27 = vpop.f32.mrb[240].mxu0  ;;  %vm4209_vm10 = vcmp.lt.s32.totalorder %v4081_v39, 2500 }
 0x418   : > { %v3693_v12 = vadd.f32 %v7248_v18, %v3692_v27  ;;  %v3694_v29 = vpop.f32.mrb[241].mxu0  ;;  %vm4208_vm9 = vcmp.lt.s32.totalorder %v4080_v5, 2500 }
 0x419   : > { %v3695_v37 = vpop.f32.mrb[242].mxu0 }
 0x41a   : > { %v4584_v63 = vsel %vm4200_vm0, %v3693_v12, -inf  ;;  %v3696_v2 = vadd.f32 %v7248_v18, %v3695_v37  ;;  %v3697_v57 = vpop.f32.mrb[243].mxu0  ;;  %v3953_v37 = vadd.s32 784, %v6139_v22 }
 0x41b   : > { %v4797_v45 = vsel %vm4624_vm5, %v4584_v63, -inf  ;;  %v3954_v57 = vadd.s32 792, %v6139_v22 }
 0x41c   : > { %v4804_v23 = vmax.f32 %v4797_v45, %v4802_v32  ;;  %v4585_v30 = vsel %vm4201_vm1, %v3696_v2, -inf }
 0x41d   : > { %v4799_v19 = vsel %vm4624_vm5, %v4585_v30, -inf  ;;  %v4083_v24 = vadd.s32 %v6875_v13, %v3954_v57 }
 0x41e   : > { %v4806_v41 = vmax.f32 %v4799_v19, %v4804_v23  ;;  %v4082_v19 = vadd.s32 %v6875_v13, %v3953_v37 }
 0x41f   : > { %v3700_v59 = vpop.f32.mrb[244].mxu0  ;;  %vm4211_vm12 = vcmp.lt.s32.totalorder %v4083_v24, 2500 }
 0x420   : > { %v3701_v25 = vadd.f32 %v7248_v18, %v3700_v59  ;;  %v3702_v34 = vpop.f32.mrb[245].mxu0  ;;  %vm4210_vm11 = vcmp.lt.s32.totalorder %v4082_v19, 2500 }
 0x421   : > { %v3703_v38 = vpop.f32.mrb[246].mxu0 }
 0x422   : > { %v4586_v26 = vsel %vm4202_vm2, %v3701_v25, -inf  ;;  %v3704_v31 = vadd.f32 %v7248_v18, %v3703_v38  ;;  %v3705_v21 = vpop.f32.mrb[247].mxu0  ;;  %v3955_v38 = vadd.s32 800, %v6139_v22 }
 0x423   : > { %v4801_v28 = vsel %vm4624_vm5, %v4586_v26, -inf  ;;  %v3956_v21 = vadd.s32 808, %v6139_v22 }
 0x424   : > { %v4808_v36 = vmax.f32 %v4801_v28, %v4806_v41  ;;  %v4587_v46 = vsel %vm4203_vm3, %v3704_v31, -inf }
 0x425   : > { %v4803_v6 = vsel %vm4624_vm5, %v4587_v46, -inf  ;;  %v4085_v7 = vadd.s32 %v6875_v13, %v3956_v21 }
 0x426   : > { %v4810_v49 = vmax.f32 %v4803_v6, %v4808_v36  ;;  %v4084_v6 = vadd.s32 %v6875_v13, %v3955_v38 }
 0x427   : > { %v3708_v62 = vpop.f32.mrb[248].mxu0  ;;  %vm4213_vm14 = vcmp.lt.s32.totalorder %v4085_v7, 2500 }
 0x428   : > { %v3709_v51 = vadd.f32 %v7248_v18, %v3708_v62  ;;  %v3710_v43 = vpop.f32.mrb[249].mxu0  ;;  %vm4212_vm13 = vcmp.lt.s32.totalorder %v4084_v6, 2500 }
 0x429   : > { %v3711_v44 = vpop.f32.mrb[250].mxu0 }
 0x42a   : > { %v4588_v1 = vsel %vm4204_vm4, %v3709_v51, -inf  ;;  %v3712_v8 = vadd.f32 %v7248_v18, %v3711_v44  ;;  %v3713_v42 = vpop.f32.mrb[251].mxu0  ;;  %v3957_v44 = vadd.s32 816, %v6139_v22 }
 0x42b   : > { %v4805_v3 = vsel %vm4624_vm5, %v4588_v1, -inf  ;;  %v3958_v42 = vadd.s32 824, %v6139_v22 }
 0x42c   : > { %v4812_v15 = vmax.f32 %v4805_v3, %v4810_v49  ;;  %v4589_v4 = vsel %vm4205_vm6, %v3712_v8, -inf }
 0x42d   : > { %v4807_v55 = vsel %vm4624_vm5, %v4589_v4, -inf  ;;  %v4087_v60 = vadd.s32 %v6875_v13, %v3958_v42 }
 0x42e   : > { %v4814_v54 = vmax.f32 %v4807_v55, %v4812_v15  ;;  %v4086_v55 = vadd.s32 %v6875_v13, %v3957_v44 }
 0x42f   : > { %v3716_v50 = vpop.f32.mrb[252].mxu0  ;;  %vm4215_vm0 = vcmp.lt.s32.totalorder %v4087_v60, 2500 }
 0x430   : > { %v3717_v58 = vadd.f32 %v7248_v18, %v3716_v50  ;;  %v3718_v40 = vpop.f32.mrb[253].mxu0  ;;  %vm4214_vm15 = vcmp.lt.s32.totalorder %v4086_v55, 2500 }
 0x431   : > { %v3719_v35 = vpop.f32.mrb[254].mxu0 }
 0x432   : > { %v4590_v20 = vsel %vm4206_vm7, %v3717_v58, -inf  ;;  %v3720_v61 = vadd.f32 %v7248_v18, %v3719_v35  ;;  %v3721_v33 = vpop.f32.mrb[255].mxu0  ;;  %v3959_v35 = vadd.s32 832, %v6139_v22 }
 0x433   : > { %v4809_v47 = vsel %vm4624_vm5, %v4590_v20, -inf  ;;  %v3960_v33 = vadd.s32 840, %v6139_v22 }
 0x434   : > { %v4816_v53 = vmax.f32 %v4809_v47, %v4814_v54  ;;  %v4591_v32 = vsel %vm4207_vm8, %v3720_v61, -inf }
 0x435   : > { %v4811_v27 = vsel %vm4624_vm5, %v4591_v32, -inf  ;;  %v4089_v37 = vadd.s32 %v6875_v13, %v3960_v33 }
 0x436   : > { %v4818_v12 = vmax.f32 %v4811_v27, %v4816_v53  ;;  %v4088_v27 = vadd.s32 %v6875_v13, %v3959_v35 }
 0x437   : > { %v3724_v29 = vpop.f32.mrb[0].mxu0  ;;  %vm4217_vm2 = vcmp.lt.s32.totalorder %v4089_v37, 2500 }
 0x438   : > { %v3725_v11 = vadd.f32 %v7248_v18, %v3724_v29  ;;  %v3726_v63 = vpop.f32.mrb[1].mxu0  ;;  %vm4216_vm1 = vcmp.lt.s32.totalorder %v4088_v27, 2500 }
 0x439   : > { %v3727_v2 = vpop.f32.mrb[2].mxu0 }
 0x43a   : > { %v4592_v45 = vsel %vm4208_vm9, %v3725_v11, -inf  ;;  %v3728_v9 = vadd.f32 %v7248_v18, %v3727_v2  ;;  %v3729_v23 = vpop.f32.mrb[3].mxu0  ;;  %v3961_v2 = vadd.s32 848, %v6139_v22 }
 0x43b   : > { %v4813_v30 = vsel %vm4624_vm5, %v4592_v45, -inf  ;;  %v3962_v23 = vadd.s32 856, %v6139_v22 }
 0x43c   : > { %v4820_v0 = vmax.f32 %v4813_v30, %v4818_v12  ;;  %v4593_v41 = vsel %vm4209_vm10, %v3728_v9, -inf }
 0x43d   : > { %v4815_v59 = vsel %vm4624_vm5, %v4593_v41, -inf  ;;  %v4091_v38 = vadd.s32 %v6875_v13, %v3962_v23 }
 0x43e   : > { %v4822_v25 = vmax.f32 %v4815_v59, %v4820_v0  ;;  %v4090_v59 = vadd.s32 %v6875_v13, %v3961_v2 }
 0x43f   : > { %v3732_v34 = vpop.f32.mrb[4].mxu0  ;;  %vm4219_vm4 = vcmp.lt.s32.totalorder %v4091_v38, 2500 }
 0x440   : > { %v3733_v56 = vadd.f32 %v7248_v18, %v3732_v34  ;;  %v3734_v26 = vpop.f32.mrb[5].mxu0  ;;  %vm4218_vm3 = vcmp.lt.s32.totalorder %v4090_v59, 2500 }
 0x441   : > { %v3735_v31 = vpop.f32.mrb[6].mxu0 }
 0x442   : > { %v4594_v28 = vsel %vm4210_vm11, %v3733_v56, -inf  ;;  %v3736_v16 = vadd.f32 %v7248_v18, %v3735_v31  ;;  %v3737_v36 = vpop.f32.mrb[7].mxu0  ;;  %v3963_v31 = vadd.s32 864, %v6139_v22 }
 0x443   : > { %v4817_v46 = vsel %vm4624_vm5, %v4594_v28, -inf  ;;  %v3964_v36 = vadd.s32 872, %v6139_v22 }
 0x444   : > { %v4824_v10 = vmax.f32 %v4817_v46, %v4822_v25  ;;  %v4595_v49 = vsel %vm4211_vm12, %v3736_v16, -inf }
 0x445   : > { %v4819_v62 = vsel %vm4624_vm5, %v4595_v49, -inf  ;;  %v4093_v44 = vadd.s32 %v6875_v13, %v3964_v36 }
 0x446   : > { %v4826_v51 = vmax.f32 %v4819_v62, %v4824_v10  ;;  %v4092_v62 = vadd.s32 %v6875_v13, %v3963_v31 }
 0x447   : > { %v3740_v43 = vpop.f32.mrb[8].mxu0  ;;  %vm4221_vm7 = vcmp.lt.s32.totalorder %v4093_v44, 2500 }
 0x448   : > { %v3741_v17 = vadd.f32 %v7248_v18, %v3740_v43  ;;  %v3742_v1 = vpop.f32.mrb[9].mxu0  ;;  %vm4220_vm6 = vcmp.lt.s32.totalorder %v4092_v62, 2500 }
 0x449   : > { %v3743_v8 = vpop.f32.mrb[10].mxu0 }
 0x44a   : > { %v4596_v3 = vsel %vm4212_vm13, %v3741_v17, -inf  ;;  %v3744_v14 = vadd.f32 %v7248_v18, %v3743_v8  ;;  %v3745_v15 = vpop.f32.mrb[11].mxu0  ;;  %v3965_v8 = vadd.s32 880, %v6139_v22 }
 0x44b   : > { %v4821_v4 = vsel %vm4624_vm5, %v4596_v3, -inf  ;;  %v3966_v15 = vadd.s32 888, %v6139_v22 }
 0x44c   : > { %v4828_v48 = vmax.f32 %v4821_v4, %v4826_v51  ;;  %v4597_v54 = vsel %vm4213_vm14, %v3744_v14, -inf }
 0x44d   : > { %v4823_v50 = vsel %vm4624_vm5, %v4597_v54, -inf  ;;  %v4095_v35 = vadd.s32 %v6875_v13, %v3966_v15 }
 0x44e   : > { %v4830_v58 = vmax.f32 %v4823_v50, %v4828_v48  ;;  %v4094_v50 = vadd.s32 %v6875_v13, %v3965_v8 }
 0x44f   : > { %v3748_v40 = vpop.f32.mrb[12].mxu0  ;;  %vm4223_vm9 = vcmp.lt.s32.totalorder %v4095_v35, 2500 }
 0x450   : > { %v3749_v52 = vadd.f32 %v7248_v18, %v3748_v40  ;;  %v3750_v20 = vpop.f32.mrb[13].mxu0  ;;  %vm4222_vm8 = vcmp.lt.s32.totalorder %v4094_v50, 2500 }
 0x451   : > { %v3751_v61 = vpop.f32.mrb[14].mxu0 }
 0x452   : > { %v4598_v47 = vsel %vm4214_vm15, %v3749_v52, -inf  ;;  %v3752_v5 = vadd.f32 %v7248_v18, %v3751_v61  ;;  %v3753_v53 = vpop.f32.mrb[15].mxu0  ;;  %v3967_v61 = vadd.s32 896, %v6139_v22 }
 0x453   : > { %v4825_v32 = vsel %vm4624_vm5, %v4598_v47, -inf  ;;  %v3968_v53 = vadd.s32 904, %v6139_v22 }
 0x454   : > { %v4832_v39 = vmax.f32 %v4825_v32, %v4830_v58  ;;  %v4599_v12 = vsel %vm4215_vm0, %v3752_v5, -inf }
 0x455   : > { %v4827_v29 = vsel %vm4624_vm5, %v4599_v12, -inf  ;;  %v4097_v2 = vadd.s32 %v6875_v13, %v3968_v53 }
 0x456   : > { %v4834_v11 = vmax.f32 %v4827_v29, %v4832_v39  ;;  %v4096_v29 = vadd.s32 %v6875_v13, %v3967_v61 }
 0x457   : > { %v3756_v63 = vpop.f32.mrb[16].mxu0  ;;  %vm4225_vm11 = vcmp.lt.s32.totalorder %v4097_v2, 2500 }
 0x458   : > { %v3757_v57 = vadd.f32 %v7248_v18, %v3756_v63  ;;  %v3758_v45 = vpop.f32.mrb[17].mxu0  ;;  %vm4224_vm10 = vcmp.lt.s32.totalorder %v4096_v29, 2500 }
 0x459   : > { %v3759_v9 = vpop.f32.mrb[18].mxu0 }
 0x45a   : > { %v4600_v30 = vsel %vm4216_vm1, %v3757_v57, -inf  ;;  %v3760_v19 = vadd.f32 %v7248_v18, %v3759_v9  ;;  %v3761_v0 = vpop.f32.mrb[19].mxu0  ;;  %v3969_v9 = vadd.s32 912, %v6139_v22 }
 0x45b   : > { %v4829_v41 = vsel %vm4624_vm5, %v4600_v30, -inf  ;;  %v3970_v0 = vadd.s32 920, %v6139_v22 }
 0x45c   : > { %v4836_v24 = vmax.f32 %v4829_v41, %v4834_v11  ;;  %v4601_v25 = vsel %vm4217_vm2, %v3760_v19, -inf }
 0x45d   : > { %v4831_v34 = vsel %vm4624_vm5, %v4601_v25, -inf  ;;  %v4099_v31 = vadd.s32 %v6875_v13, %v3970_v0 }
 0x45e   : > { %v4838_v56 = vmax.f32 %v4831_v34, %v4836_v24  ;;  %v4098_v34 = vadd.s32 %v6875_v13, %v3969_v9 }
 0x45f   : > { %v3764_v26 = vpop.f32.mrb[20].mxu0  ;;  %vm4227_vm13 = vcmp.lt.s32.totalorder %v4099_v31, 2500 }
 0x460   : > { %v3765_v21 = vadd.f32 %v7248_v18, %v3764_v26  ;;  %v3766_v28 = vpop.f32.mrb[21].mxu0  ;;  %vm4226_vm12 = vcmp.lt.s32.totalorder %v4098_v34, 2500 }
 0x461   : > { %v3767_v16 = vpop.f32.mrb[22].mxu0 }
 0x462   : > { %v4602_v46 = vsel %vm4218_vm3, %v3765_v21, -inf  ;;  %v3768_v6 = vadd.f32 %v7248_v18, %v3767_v16  ;;  %v3769_v10 = vpop.f32.mrb[23].mxu0  ;;  %v3971_v16 = vadd.s32 928, %v6139_v22 }
 0x463   : > { %v4833_v49 = vsel %vm4624_vm5, %v4602_v46, -inf  ;;  %v3972_v10 = vadd.s32 936, %v6139_v22 }
 0x464   : > { %v4840_v7 = vmax.f32 %v4833_v49, %v4838_v56  ;;  %v4603_v51 = vsel %vm4219_vm4, %v3768_v6, -inf }
 0x465   : > { %v4835_v43 = vsel %vm4624_vm5, %v4603_v51, -inf  ;;  %v4101_v8 = vadd.s32 %v6875_v13, %v3972_v10 }
 0x466   : > { %v4842_v17 = vmax.f32 %v4835_v43, %v4840_v7  ;;  %v4100_v43 = vadd.s32 %v6875_v13, %v3971_v16 }
 0x467   : > { %v3772_v1 = vpop.f32.mrb[24].mxu0  ;;  %vm4229_vm15 = vcmp.lt.s32.totalorder %v4101_v8, 2500 }
 0x468   : > { %v3773_v42 = vadd.f32 %v7248_v18, %v3772_v1  ;;  %v3774_v3 = vpop.f32.mrb[25].mxu0  ;;  %vm4228_vm14 = vcmp.lt.s32.totalorder %v4100_v43, 2500 }
 0x469   : > { %v3775_v14 = vpop.f32.mrb[26].mxu0 }
 0x46a   : > { %v4604_v4 = vsel %vm4220_vm6, %v3773_v42, -inf  ;;  %v3776_v55 = vadd.f32 %v7248_v18, %v3775_v14  ;;  %v3777_v48 = vpop.f32.mrb[27].mxu0  ;;  %v3973_v14 = vadd.s32 944, %v6139_v22 }
 0x46b   : > { %v4837_v54 = vsel %vm4624_vm5, %v4604_v4, -inf  ;;  %v3974_v48 = vadd.s32 952, %v6139_v22 }
 0x46c   : > { %v4844_v60 = vmax.f32 %v4837_v54, %v4842_v17  ;;  %v4605_v58 = vsel %vm4221_vm7, %v3776_v55, -inf }
 0x46d   : > { %v4839_v40 = vsel %vm4624_vm5, %v4605_v58, -inf  ;;  %v4103_v61 = vadd.s32 %v6875_v13, %v3974_v48 }
 0x46e   : > { %v4846_v52 = vmax.f32 %v4839_v40, %v4844_v60  ;;  %v4102_v40 = vadd.s32 %v6875_v13, %v3973_v14 }
 0x46f   : > { %v3780_v20 = vpop.f32.mrb[28].mxu0  ;;  %vm4231_vm1 = vcmp.lt.s32.totalorder %v4103_v61, 2500 }
 0x470   : > { %v3781_v33 = vadd.f32 %v7248_v18, %v3780_v20  ;;  %v3782_v47 = vpop.f32.mrb[29].mxu0  ;;  %vm4230_vm0 = vcmp.lt.s32.totalorder %v4102_v40, 2500 }
 0x471   : > { %v3783_v5 = vpop.f32.mrb[30].mxu0 }
 0x472   : > { %v4606_v32 = vsel %vm4222_vm8, %v3781_v33, -inf  ;;  %v3784_v27 = vadd.f32 %v7248_v18, %v3783_v5  ;;  %v3785_v39 = vpop.f32.mrb[31].mxu0  ;;  %v7462_v18 = vld [vmem:[%s7591_s6] ss:$0 sm:$0xff]  ;;  %v3975_v5 = vadd.s32 960, %v6139_v22 }
 0x473   : > { %v4841_v12 = vsel %vm4624_vm5, %v4606_v32, -inf  ;;  %v3976_v39 = vadd.s32 968, %v6139_v22 }
 0x474   : > { %v4848_v37 = vmax.f32 %v4841_v12, %v4846_v52  ;;  %v4607_v11 = vsel %vm4223_vm9, %v3784_v27, -inf }
 0x475   : > { %v4843_v63 = vsel %vm4624_vm5, %v4607_v11, -inf  ;;  %v4105_v9 = vadd.s32 %v6875_v13, %v3976_v39 }
 0x476   : > { %v4850_v57 = vmax.f32 %v4843_v63, %v4848_v37  ;;  %v4104_v63 = vadd.s32 %v6875_v13, %v3975_v5 }
 0x477   : > { %v3788_v45 = vpop.f32.mrb[32].mxu0  ;;  %vm4233_vm3 = vcmp.lt.s32.totalorder %v4105_v9, 2500 }
 0x478   : > { %v3789_v23 = vadd.f32 %v7462_v18, %v3788_v45  ;;  %v3790_v30 = vpop.f32.mrb[33].mxu0  ;;  %vm4232_vm2 = vcmp.lt.s32.totalorder %v4104_v63, 2500 }
 0x479   : > { %v3791_v19 = vpop.f32.mrb[34].mxu0 }
 0x47a   : > { %v4608_v41 = vsel %vm4224_vm10, %v3789_v23, -inf  ;;  %v3792_v59 = vadd.f32 %v7462_v18, %v3791_v19  ;;  %v3793_v24 = vpop.f32.mrb[35].mxu0  ;;  %v3977_v19 = vadd.s32 976, %v6139_v22 }
 0x47b   : > { %v4845_v25 = vsel %vm4624_vm5, %v4608_v41, -inf  ;;  %v3978_v24 = vadd.s32 984, %v6139_v22 }
 0x47c   : > { %v4852_v38 = vmax.f32 %v4845_v25, %v4850_v57  ;;  %v4609_v56 = vsel %vm4225_vm11, %v3792_v59, -inf  ;;  %vm4888_vm11 = vcmask 516096  }
 0x47d   : > { %v4847_v26 = vsel %vm4624_vm5, %v4609_v56, -inf  ;;  %v4107_v16 = vadd.s32 %v6875_v13, %v3978_v24 }
 0x47e   : > { %v4854_v21 = vmax.f32 %v4847_v26, %v4852_v38  ;;  %v4106_v26 = vadd.s32 %v6875_v13, %v3977_v19 }
 0x47f   : > { %v3796_v28 = vpop.f32.mrb[36].mxu0  ;;  %vm4235_vm6 = vcmp.lt.s32.totalorder %v4107_v16, 2500 }
 0x480   : > { %v3797_v36 = vadd.f32 %v7462_v18, %v3796_v28  ;;  %v3798_v46 = vpop.f32.mrb[37].mxu0  ;;  %vm4234_vm4 = vcmp.lt.s32.totalorder %v4106_v26, 2500 }
 0x481   : > { %v3799_v6 = vpop.f32.mrb[38].mxu0 }
 0x482   : > { %v4610_v49 = vsel %vm4226_vm12, %v3797_v36, -inf  ;;  %v3800_v62 = vadd.f32 %v7462_v18, %v3799_v6  ;;  %v3801_v7 = vpop.f32.mrb[39].mxu0  ;;  %v3979_v6 = vadd.s32 992, %v6139_v22 }
 0x483   : > { %v4849_v51 = vsel %vm4624_vm5, %v4610_v49, -inf  ;;  %v3980_v7 = vadd.s32 1000, %v6139_v22 }
 0x484   : > { %v4856_v44 = vmax.f32 %v4849_v51, %v4854_v21  ;;  %v4611_v17 = vsel %vm4227_vm13, %v3800_v62, -inf }
 0x485   : > { %v4851_v1 = vsel %vm4624_vm5, %v4611_v17, -inf  ;;  %v4109_v14 = vadd.s32 %v6875_v13, %v3980_v7 }
 0x486   : > { %v4858_v42 = vmax.f32 %v4851_v1, %v4856_v44  ;;  %v4108_v1 = vadd.s32 %v6875_v13, %v3979_v6 }
 0x487   : > { %v3804_v3 = vpop.f32.mrb[40].mxu0  ;;  %vm4237_vm8 = vcmp.lt.s32.totalorder %v4109_v14, 2500 }
 0x488   : > { %v3805_v15 = vadd.f32 %v7462_v18, %v3804_v3  ;;  %v3806_v4 = vpop.f32.mrb[41].mxu0  ;;  %vm4236_vm7 = vcmp.lt.s32.totalorder %v4108_v1, 2500 }
 0x489   : > { %v3807_v55 = vpop.f32.mrb[42].mxu0 }
 0x48a   : > { %v4612_v54 = vsel %vm4228_vm14, %v3805_v15, -inf  ;;  %v3808_v50 = vadd.f32 %v7462_v18, %v3807_v55  ;;  %v3809_v60 = vpop.f32.mrb[43].mxu0  ;;  %v3981_v55 = vadd.s32 1008, %v6139_v22 }
 0x48b   : > { %v4853_v58 = vsel %vm4624_vm5, %v4612_v54, -inf  ;;  %v3982_v60 = vadd.s32 1016, %v6139_v22 }
 0x48c   : > { %v4860_v35 = vmax.f32 %v4853_v58, %v4858_v42  ;;  %v4613_v52 = vsel %vm4229_vm15, %v3808_v50, -inf }
 0x48d   : > { %v4855_v20 = vsel %vm4624_vm5, %v4613_v52, -inf  ;;  %v4111_v5 = vadd.s32 %v6875_v13, %v3982_v60 }
 0x48e   : > { %v4862_v33 = vmax.f32 %v4855_v20, %v4860_v35  ;;  %v4110_v20 = vadd.s32 %v6875_v13, %v3981_v55 }
 0x48f   : > { %v3812_v47 = vpop.f32.mrb[44].mxu0  ;;  %vm4239_vm10 = vcmp.lt.s32.totalorder %v4111_v5, 2500 }
 0x490   : > { %v3813_v53 = vadd.f32 %v7462_v18, %v3812_v47  ;;  %v3814_v32 = vpop.f32.mrb[45].mxu0  ;;  %vm4238_vm9 = vcmp.lt.s32.totalorder %v4110_v20, 2500 }
 0x491   : > { %v3815_v27 = vpop.f32.mrb[46].mxu0 }
 0x492   : > { %v4614_v12 = vsel %vm4230_vm0, %v3813_v53, -inf  ;;  %v3816_v29 = vadd.f32 %v7462_v18, %v3815_v27  ;;  %v3817_v37 = vpop.f32.mrb[47].mxu0 }
 0x493   : > { %v4857_v11 = vsel %vm4624_vm5, %v4614_v12, -inf }
 0x494   : > { %v4864_v2 = vmax.f32 %v4857_v11, %v4862_v33  ;;  %v4615_v57 = vsel %vm4231_vm1, %v3816_v29, -inf }
 0x495   : > { %v4859_v45 = vsel %vm4624_vm5, %v4615_v57, -inf }
 0x496   : > { %v4866_v23 = vmax.f32 %v4859_v45, %v4864_v2 }
 0x497   : > { %v3820_v30 = vpop.f32.mrb[48].mxu0 }
 0x498   : > { %v3821_v0 = vadd.f32 %v7462_v18, %v3820_v30  ;;  %v3822_v41 = vpop.f32.mrb[49].mxu0 }
 0x499   : > { %v3823_v59 = vpop.f32.mrb[50].mxu0 }
 0x49a   : > { %v4616_v25 = vsel %vm4232_vm2, %v3821_v0, -inf  ;;  %v3824_v34 = vadd.f32 %v7462_v18, %v3823_v59  ;;  %v3825_v38 = vpop.f32.mrb[51].mxu0  ;;  %v4886_v0 = vld [vmem:[%s5818_s12] sm:$0x1] }
 0x49b   : > { %v4861_v56 = vsel %vm4624_vm5, %v4616_v25, -inf }
 0x49c   : > { %v4868_v31 = vmax.f32 %v4861_v56, %v4866_v23  ;;  %v4617_v21 = vsel %vm4233_vm3, %v3824_v34, -inf }
 0x49d   : > { %v4863_v28 = vsel %vm4624_vm5, %v4617_v21, -inf }
 0x49e   : > { %v4870_v36 = vmax.f32 %v4863_v28, %v4868_v31 }
 0x49f   : > { %v3828_v46 = vpop.f32.mrb[52].mxu0 }
 0x4a0   : > { %v3829_v10 = vadd.f32 %v7462_v18, %v3828_v46  ;;  %v3830_v49 = vpop.f32.mrb[53].mxu0 }
 0x4a1   : > { %v3831_v62 = vpop.f32.mrb[54].mxu0 }
 0x4a2   : > { %v4618_v51 = vsel %vm4234_vm4, %v3829_v10, -inf  ;;  %v3832_v43 = vadd.f32 %v7462_v18, %v3831_v62  ;;  %v3833_v44 = vpop.f32.mrb[55].mxu0 }
 0x4a3   : > { %v4865_v17 = vsel %vm4624_vm5, %v4618_v51, -inf }
 0x4a4   : > { %v4872_v8 = vmax.f32 %v4865_v17, %v4870_v36  ;;  %v4619_v42 = vsel %vm4235_vm6, %v3832_v43, -inf }
 0x4a5   : > { %v4867_v3 = vsel %vm4624_vm5, %v4619_v42, -inf }
 0x4a6   : > { %v4877_v15 = vmax.f32 %v4867_v3, %v4872_v8 }
 0x4a7   : > { %v3836_v4 = vpop.f32.mrb[56].mxu0 }
 0x4a8   : > { %v3837_v48 = vadd.f32 %v7462_v18, %v3836_v4  ;;  %v3838_v54 = vpop.f32.mrb[57].mxu0 }
 0x4a9   : > { %v3839_v50 = vpop.f32.mrb[58].mxu0 }
 0x4aa   : > { %v4620_v58 = vsel %vm4236_vm7, %v3837_v48, -inf  ;;  %v3840_v40 = vadd.f32 %v7462_v18, %v3839_v50  ;;  %v3841_v35 = vpop.f32.mrb[59].mxu0 }
 0x4ab   : > { %v4869_v52 = vsel %vm4624_vm5, %v4620_v58, -inf }
 0x4ac   : > { %v4874_v61 = vmax.f32 %v4869_v52, %v4877_v15  ;;  %v4621_v33 = vsel %vm4237_vm8, %v3840_v40, -inf }
 0x4ad   : > { %v4871_v47 = vsel %vm4624_vm5, %v4621_v33, -inf }
 0x4ae   : > { %v4876_v53 = vmax.f32 %v4871_v47, %v4874_v61 }
 0x4af   : > { %v3844_v32 = vpop.f32.mrb[60].mxu0 }
 0x4b0   : > { %v3845_v27 = vadd.f32 %v7462_v18, %v3844_v32  ;;  %v3846_v22 = vpop.f32.mrb[61].mxu0 }
 0x4b1   : > { %v3847_v39 = vpop.f32.mrb[62].mxu0 }
 0x4b2   : > { %v4622_v12 = vsel %vm4238_vm9, %v3845_v27, -inf  ;;  %v3848_v29 = vadd.f32 %v7462_v18, %v3847_v39  ;;  %v3849_v37 = vpop.f32.mrb[63].mxu0 }
 0x4b3   : > { %v4873_v11 = vsel %vm4624_vm5, %v4622_v12, -inf }
 0x4b4   : > { %v4878_v63 = vmax.f32 %v4873_v11, %v4876_v53  ;;  %v4623_v2 = vsel %vm4239_vm10, %v3848_v29, -inf }
 0x4b5   : > { %v4875_v13 = vsel %vm4624_vm5, %v4623_v2, -inf }
 0x4b6   : > { %v4879_v57 = vmax.f32 %v4875_v13, %v4878_v63 }
 0x4b8   : > { %v4880_v45 = vrot.slane %v4879_v57, 4 }
 0x4ba   : > { %v4881_v9 = vmax.f32 %v4879_v57, %v4880_v45 }
 0x4bc   : > { %v4882_v23 = vrot.slane %v4881_v9, 2 }
 0x4be   : > { %v4883_v30 = vmax.f32 %v4881_v9, %v4882_v23 }
 0x4c0   : > { %v4884_v19 = vrot.slane %v4883_v30, 1 }
 0x4c2   : > { %v4885_v18 = vmax.f32 %v4883_v30, %v4884_v19 }
 0x4c4   : > { %v4887_v41 = vmax.f32 %v4886_v0, %v4885_v18 }
 0x4c6   : > { %4889 = vst.msk [vmem:[%s5818_s12] sm:$0x1] %vm4888_vm11, %v4887_v41 }
 0x4c7   : > { %5610 = shalt.err (!%p5607_p10)
}
 0x4c8   : > { %s5611_s12 = scalar_lea.hbm %s7529_s23, 16  ;;  %s5615_s20 = scalar_lea.hbm %s7592_s7, 32 }
 0x4c9   : > { %p5612_p11 = scmp.ne.s32.totalorder %s7529_s23, %s5611_s12  ;;  %p5616_p0 = scmp.lt.u32.totalorder %s7529_s23, %s7592_s7 }
 0x4ca   : > { %p5617_p1 = scmp.lt.u32.totalorder %s5615_s20, %s5611_s12  ;;  %p5619_p4 = scmp.lt.u32.totalorder %s5611_s12, %s7529_s23 }
 0x4cb   : > { %p5613_p12 = pnand %p5612_p11, %p5786_p3 }
 0x4cc   : > { %p5618_p2 = por %p5617_p1, %p5616_p0 }
 0x4cd   : > { %p5614_p13 = pneg %p5613_p12 }
 0x4ce   : > { %p5620_p5 = por %p5619_p4, %p5618_p2 }
 0x4d0   : > { %p5621_p6 = pnand %p5620_p5, %p5614_p13 }
 0x4d2   : > { %5624 = shalt.err (!%p5621_p6)
}
 0x4d3   : > { %5480 = dma.vmem_to_hbm [thread:$0]  (%p5786_p3), %s7531_s21, 16, %s7529_s23, %s4891_s9  }
 0x4d4 PF: > { %p5486_p7 = scmp.ge.s32.totalorder %s5691_s8, 2  ;;  %s4916_s16 = sand.u32 1, %s5663_s24  }
 0x4d5   : > { %s4917_s28 = scalar_lea.sflag [#allocation3], %s4916_s16 }
 0x4d6   : > { %p5483_p8 = pnand %p5486_p7, %p5796_p9 }
 0x4d8   : > { %5658 = dma.done.wait (!%p5483_p8), %s4917_s28, 16  }
 0x4d9   : > { %5660 = vsyncadd (!%p5483_p8), %s4917_s28, 4294967280  ;;  %s20_s8 = sadd.s32 1, %s5691_s8   ;;  %s7786_s13 = sld [smem:[#allocation5_spill]] }
 0x4da   : > { %p17_p10 = scmp.ge.s32.totalorder %s20_s8, 8   ;;  %s7787_s24 = smov %s5667_s25 }
 0x4db   : > { %s7788_s25 = smov %s5671_s26  ;;  %s7789_s26 = smov %s5804_s17 }
 0x4dc   : > { %s7790_s27 = smov %s5683_s29  ;;  %s7791_s28 = smov %s5687_s30 }
 0x4dd   : > { %s7792_s29 = smov %s7795_s11  ;;  %19 = sbr.rel (!%p17_p10) target bundleno = 5 (0x5), region = 87 }
 0x4df   : > { %s7793_s30 = smov %s7786_s13 }
 0x4e4   :  { %4921 = vsyncpa [#allocation3], 1 }
 0x4e5   :  { %4923 = vsyncpa [#allocation3 + $0x1], 1 }

</bundles_post_ra>
